<compile_context>
chip_gen: v6e
topology: v6e:2x2x1
jax: 0.10.0
libtpu: 0.0.40
codegen_flags: <defaults>
</compile_context>

<pallas_src>
import jax
import jax.numpy as jnp
import numpy as np
from jax import lax
from jax.experimental import pallas as pl
from jax.experimental.pallas import tpu as pltpu

# ---- network dimensions (toy 16x16 configuration) ----
CIN = 2                      # conv1 in channels
C1 = 32                      # conv1 out channels
C2 = 64                      # conv2 out channels
H = W = 16                   # input spatial
H2, W2 = H // 2, W // 2      # after pool1
H4, W4 = H2 // 2, W2 // 2    # after pool2
HID = 128                    # fc1 width
FC_IN = C2 * H4 * W4         # 1024 (scaled-down analogue of 1048576)

HP, WP = H + 2, W + 2        # padded conv1 input
HP2, WP2 = H2 + 2, W2 + 2    # padded conv2 input (pooled map + zero border)


# ------------------------------ Pallas kernel ------------------------------

def testnet_fused_kernel(xf_ref, b1e_ref, b1o_ref, bias1_ref,
                         b2e_ref, b2o_ref, bias2_ref,
                         wfc1_ref, bfc1_ref, wfc2_ref, bfc2_ref,
                         out_ref, p1_ref):
    """Whole forward pass for one image (the grid iterates over the batch).

    Activations use a row-flattened layout  [row, x*C + channel]:
      xf_ref : (1, HP, WP*CIN)       zero-padded input rows
      p1_ref : (HP2, WP2*C1)  VMEM   zero-padded pooled conv1 output (scratch)
    Each conv = sum over the 3 ky taps of (rows) @ (banded weight); even / odd
    output columns come from separate weight halves so relu + maxpool fuse into
    the epilogue with no lane shuffles, and the result is written back already
    padded for the next stage.
    """
    f32 = jnp.float32

    # ---------------- conv1 (3x3, pad 1) + relu + 2x2 maxpool ----------------
    acc_e = jnp.zeros((H, WP2 * C1), f32)
    acc_o = jnp.zeros((H, WP2 * C1), f32)
    for ky in range(3):
        rows = xf_ref[0, ky:ky + H, :]                         # (H, WP*CIN)
        acc_e += jnp.dot(rows, b1e_ref[ky], preferred_element_type=f32)
        acc_o += jnp.dot(rows, b1o_ref[ky], preferred_element_type=f32)
    # relu + x-direction of the pool (even/odd x were computed separately)
    c1 = jnp.maximum(jnp.maximum(acc_e + bias1_ref[...],
                                 acc_o + bias1_ref[...]), 0.0)  # (H, WP2*C1)
    # y-direction of the pool, written into the padded scratch used by conv2.
    p1_ref[...] = jnp.zeros_like(p1_ref)                        # zero border
    for y2 in range(H2):
        p1_ref[1 + y2:2 + y2, :] = jnp.maximum(
            c1[2 * y2:2 * y2 + 1, :], c1[2 * y2 + 1:2 * y2 + 2, :])

    # ---------------- conv2 (3x3, pad 1) + relu + 2x2 maxpool ----------------
    acc_e = jnp.zeros((H2, W4 * C2), f32)
    acc_o = jnp.zeros((H2, W4 * C2), f32)
    for ky in range(3):
        rows = p1_ref[ky:ky + H2, :]                            # (H2, WP2*C1)
        acc_e += jnp.dot(rows, b2e_ref[ky], preferred_element_type=f32)
        acc_o += jnp.dot(rows, b2o_ref[ky], preferred_element_type=f32)
    c2 = jnp.maximum(jnp.maximum(acc_e + bias2_ref[...],
                                 acc_o + bias2_ref[...]), 0.0)  # (H2, W4*C2)

    # --------- pool-y fused into fc1 (dropout1/dropout2 are identity) --------
    h = jnp.zeros((1, HID), f32)
    for y4 in range(H4):
        prow = jnp.maximum(c2[2 * y4:2 * y4 + 1, :],
                           c2[2 * y4 + 1:2 * y4 + 2, :])        # (1, W4*C2)
        h += jnp.dot(prow, wfc1_ref[y4], preferred_element_type=f32)
    h = jnp.maximum(h + bfc1_ref[...], 0.0)                     # fc1 + relu

    # ---------- fc2 as a VPU reduction (1-wide MXU matmul is wasteful) -------
    s = jnp.sum(h * wfc2_ref[...], axis=-1, keepdims=True) + bfc2_ref[...]
    out_ref[0] = jnp.broadcast_to(s, (1, HID))


# ------------------------------ forward wrapper ------------------------------

def testnet_forward(x_nchw, params):
    """x_nchw: (N, CIN, H, W) float32  ->  (N, 1) float32 (matches TestNet)."""
    n = x_nchw.shape[0]
    # NCHW -> NHWC, zero-pad the border (conv padding=1), flatten each padded
    # row to (WP*CIN) so the convs become 2D MXU matmuls inside the kernel.
    x = jnp.transpose(x_nchw, (0, 2, 3, 1))
    x = jnp.pad(x, ((0, 0), (1, 1), (1, 1), (0, 0)))
    xf = x.reshape(n, HP, WP * CIN)

    def const_spec(arr):
        zeros = (0,) * arr.ndim
        return pl.BlockSpec(arr.shape, lambda i, z=zeros: z)

    grid_spec = pltpu.PrefetchScalarGridSpec(
        num_scalar_prefetch=0,
        grid=(n,),
        in_specs=[
            pl.BlockSpec((1, HP, WP * CIN), lambda i: (i, 0, 0)),
            const_spec(params["b1e"]), const_spec(params["b1o"]),
            const_spec(params["bias1"]),
            const_spec(params["b2e"]), const_spec(params["b2o"]),
            const_spec(params["bias2"]),
            const_spec(params["wfc1"]), const_spec(params["bfc1"]),
            const_spec(params["wfc2"]), const_spec(params["bfc2"]),
        ],
        out_specs=pl.BlockSpec((1, 1, HID), lambda i: (i, 0, 0)),
        scratch_shapes=[pltpu.VMEM((HP2, WP2 * C1), jnp.float32)],
    )

    out = pl.pallas_call(
        testnet_fused_kernel,
        out_shape=jax.ShapeDtypeStruct((n, 1, HID), jnp.float32),
        grid_spec=grid_spec,
        compiler_params=pltpu.CompilerParams(
            dimension_semantics=("parallel",)),   # v7x: one image per TensorCore
    )(xf, params["b1e"], params["b1o"], params["bias1"],
      params["b2e"], params["b2o"], params["bias2"],
      params["wfc1"], params["bfc1"], params["wfc2"], params["bfc2"])

    return out[:, 0, :1]                          # (N, 1), matches TestNet


# -------------------- static weight transforms (done at init) --------------------

def _banded_conv_weights(w_oihw, in_w, pad_output):
    """Per-ky banded ("Toeplitz") matrices for a 3x3 / stride-1 / pad-1 conv on
    row-flattened activations [row, x*Cin + ci].

    Returns (B_even, B_odd), each (3, (in_w+2)*Cin, out_cols), with
      B_even[ky, (2*xo+kx)*Cin + ci, (xo+off)*Cout + co] = w[co, ci, ky, kx]
    (odd analogously at 2*xo+1), so  sum_ky rows[y+ky] @ B[ky]  is the conv
    output at even/odd x, laid out [y, xo*Cout + co].  With pad_output=True an
    all-zero Cout block is added on each side so the result is already the
    zero-padded input of the next conv.
    """
    cout, cin, kh, kw = w_oihw.shape
    w = np.transpose(np.asarray(w_oihw, np.float32), (2, 3, 1, 0))  # (ky,kx,ci,co)
    half = in_w // 2
    off = 1 if pad_output else 0
    ncols = (half + 2 * off) * cout
    b_even = np.zeros((kh, (in_w + 2) * cin, ncols), np.float32)
    b_odd = np.zeros_like(b_even)
    for ky in range(kh):
        for kx in range(kw):
            for xo in range(half):
                col = (xo + off) * cout
                re = (2 * xo + kx) * cin
                ro = (2 * xo + 1 + kx) * cin
                b_even[ky, re:re + cin, col:col + cout] = w[ky, kx]
                b_odd[ky, ro:ro + cin, col:col + cout] = w[ky, kx]
    return jnp.asarray(b_even), jnp.asarray(b_odd)


def _banded_bias(b, half, pad_output):
    cout = b.shape[0]
    off = 1 if pad_output else 0
    out = np.zeros(((half + 2 * off) * cout,), np.float32)
    bnp = np.asarray(b, np.float32)
    for xo in range(half):
        out[(xo + off) * cout:(xo + off + 1) * cout] = bnp
    return jnp.asarray(out).reshape(1, -1)


def init_params(key):
    """Deterministic torch-style init; returns (kernel_params, torch_layout_params)."""
    ks = jax.random.split(key, 8)

    def u(k, shape, fan_in):
        bound = 1.0 / np.sqrt(float(fan_in))
        return jax.random.uniform(k, shape, jnp.float32, -bound, bound)

    # torch layouts: conv (Cout, Cin, kh, kw); linear (out, in)
    w1 = u(ks[0], (C1, CIN, 3, 3), CIN * 9)
    b1 = u(ks[1], (C1,), CIN * 9)
    w2 = u(ks[2], (C2, C1, 3, 3), C1 * 9)
    b2 = u(ks[3], (C2,), C1 * 9)
    wf1 = u(ks[4], (HID, FC_IN), FC_IN)
    bf1 = u(ks[5], (HID,), FC_IN)
    wf2 = u(ks[6], (1, HID), HID)
    bf2 = u(ks[7], (1,), HID)

    b1e, b1o = _banded_conv_weights(w1, W, pad_output=True)     # (3, 36, 320)
    b2e, b2o = _banded_conv_weights(w2, W2, pad_output=False)   # (3, 320, 256)
    bias1 = _banded_bias(b1, W2, pad_output=True)               # (1, 320)
    bias2 = _banded_bias(b2, W4, pad_output=False)              # (1, 256)

    # fc1 weight: permute rows from torch's NCHW-flatten order to the kernel's
    # natural [y4][x4*C2 + c] layout, so no transpose/flatten happens at runtime.
    wf1_np = np.asarray(wf1, np.float32).reshape(HID, C2, H4, W4)  # [j, c, y, x]
    wfc1 = jnp.asarray(np.transpose(wf1_np, (2, 3, 1, 0)).reshape(H4, W4 * C2, HID))

    params = dict(
        b1e=b1e, b1o=b1o, bias1=bias1,
        b2e=b2e, b2o=b2o, bias2=bias2,
        wfc1=wfc1, bfc1=jnp.reshape(bf1, (1, HID)),
        wfc2=jnp.asarray(wf2), bfc2=jnp.reshape(bf2, (1, 1)),
    )
    torch_params = dict(w1=w1, b1=b1, w2=w2, b2=b2,
                        wf1=wf1, bf1=bf1, wf2=wf2, bf2=bf2)
    return params, torch_params


# ------------------------------ pure-XLA reference ------------------------------

def reference_forward(x_nchw, tp):
    """Mirrors the PyTorch module (eval mode) with plain XLA ops."""
    dn = ("NCHW", "OIHW", "NCHW")
    hp = lax.Precision.HIGHEST
    y = lax.conv_general_dilated(x_nchw, tp["w1"], (1, 1), ((1, 1), (1, 1)),
                                 dimension_numbers=dn, precision=hp)
    y = jnp.maximum(y + tp["b1"][None, :, None, None], 0.0)
    y = lax.reduce_window(y, -jnp.inf, lax.max, (1, 1, 2, 2), (1, 1, 2, 2), "VALID")
    y = lax.conv_general_dilated(y, tp["w2"], (1, 1), ((1, 1), (1, 1)),
                                 dimension_numbers=dn, precision=hp)
    y = jnp.maximum(y + tp["b2"][None, :, None, None], 0.0)
    y = lax.reduce_window(y, -jnp.inf, lax.max, (1, 1, 2, 2), (1, 1, 2, 2), "VALID")
    y = y.reshape(y.shape[0], -1)                               # torch.flatten(x, 1)
    y = jnp.maximum(jnp.dot(y, tp["wf1"].T, precision=hp) + tp["bf1"], 0.0)
    return jnp.dot(y, tp["wf2"].T, precision=hp) + tp["bf2"]


if __name__ == "__main__":
    key = jax.random.PRNGKey(0)
    k_x, k_p = jax.random.split(key)

    N = 2
    x = jax.random.normal(k_x, (N, CIN, H, W), jnp.float32)     # conv1 takes 2 channels
    params, torch_params = init_params(k_p)

    fwd = jax.jit(testnet_forward)
    out = fwd(x, params)
    jax.block_until_ready(out)

    assert out.shape == (N, 1), out.shape
    assert bool(jnp.all(jnp.isfinite(out)))

    # correctness check against a pure-XLA reference of the PyTorch forward
    ref = reference_forward(x, torch_params)
    assert jnp.allclose(out, ref, atol=2e-2, rtol=2e-2), (out, ref)

    print("KERNEL_OK")
</pallas_src>

<mosaic_0001>
module attributes {stable_mosaic.version = 11 : i64} {
  func.func @testnet_fused_kernel(%arg0: i32, %arg1: memref<1x18x36xf32, #tpu.memory_space<vmem>>, %arg2: memref<3x36x320xf32, #tpu.memory_space<vmem>>, %arg3: memref<3x36x320xf32, #tpu.memory_space<vmem>>, %arg4: memref<1x320xf32, #tpu.memory_space<vmem>>, %arg5: memref<3x320x256xf32, #tpu.memory_space<vmem>>, %arg6: memref<3x320x256xf32, #tpu.memory_space<vmem>>, %arg7: memref<1x256xf32, #tpu.memory_space<vmem>>, %arg8: memref<4x256x128xf32, #tpu.memory_space<vmem>>, %arg9: memref<1x128xf32, #tpu.memory_space<vmem>>, %arg10: memref<1x128xf32, #tpu.memory_space<vmem>>, %arg11: memref<1x1xf32, #tpu.memory_space<vmem>>, %arg12: memref<1x1x128xf32, #tpu.memory_space<vmem>>, %arg13: memref<10x320xf32, #tpu.memory_space<vmem>>) attributes {dimension_semantics = [#tpu.dimension_semantics<parallel>], iteration_bounds = array<i64: 2>, scalar_prefetch = 0 : i64, scratch_operands = 1 : i64, tpu.core_type = #tpu.core_type<tc>, window_params = [{transform_indices = @transform_0, window_bounds = array<i64: 1, 18, 36>}, {pipeline_mode = #tpu.pipeline_mode<synchronous>, transform_indices = @transform_1, window_bounds = array<i64: 3, 36, 320>}, {pipeline_mode = #tpu.pipeline_mode<synchronous>, transform_indices = @transform_2, window_bounds = array<i64: 3, 36, 320>}, {pipeline_mode = #tpu.pipeline_mode<synchronous>, transform_indices = @transform_3, window_bounds = array<i64: 1, 320>}, {pipeline_mode = #tpu.pipeline_mode<synchronous>, transform_indices = @transform_4, window_bounds = array<i64: 3, 320, 256>}, {pipeline_mode = #tpu.pipeline_mode<synchronous>, transform_indices = @transform_5, window_bounds = array<i64: 3, 320, 256>}, {pipeline_mode = #tpu.pipeline_mode<synchronous>, transform_indices = @transform_6, window_bounds = array<i64: 1, 256>}, {pipeline_mode = #tpu.pipeline_mode<synchronous>, transform_indices = @transform_7, window_bounds = array<i64: 4, 256, 128>}, {pipeline_mode = #tpu.pipeline_mode<synchronous>, transform_indices = @transform_8, window_bounds = array<i64: 1, 128>}, {pipeline_mode = #tpu.pipeline_mode<synchronous>, transform_indices = @transform_9, window_bounds = array<i64: 1, 128>}, {pipeline_mode = #tpu.pipeline_mode<synchronous>, transform_indices = @transform_10, window_bounds = array<i64: 1, 1>}, {transform_indices = @transform_11, window_bounds = array<i64: 1, 1, 128>}]} {
    %cst = arith.constant 0.000000e+00 : f32
    %0 = vector.broadcast %cst : f32 to vector<16x320xf32>
    %cst_0 = arith.constant 0.000000e+00 : f32
    %1 = vector.broadcast %cst_0 : f32 to vector<16x320xf32>
    %c0 = arith.constant 0 : index
    %c0_1 = arith.constant 0 : index
    %c0_2 = arith.constant 0 : index
    %2 = vector.load %arg1[%c0, %c0_1, %c0_2] : memref<1x18x36xf32, #tpu.memory_space<vmem>>, vector<1x16x36xf32>
    %3 = vector.shape_cast %2 : vector<1x16x36xf32> to vector<16x36xf32>
    %c0_3 = arith.constant 0 : index
    %c0_4 = arith.constant 0 : index
    %c0_5 = arith.constant 0 : index
    %4 = vector.load %arg2[%c0_3, %c0_4, %c0_5] : memref<3x36x320xf32, #tpu.memory_space<vmem>>, vector<1x36x320xf32>
    %5 = vector.shape_cast %4 : vector<1x36x320xf32> to vector<36x320xf32>
    %cst_6 = arith.constant dense<0.000000e+00> : vector<16x320xf32>
    %6 = tpu.matmul %3, %5, %cst_6 {dimension_numbers = #tpu.dot_dimension_numbers<[1], [0], [0], [1], [0, 0, 1, 1], [], []>} : vector<16x36xf32>, vector<36x320xf32>, vector<16x320xf32> -> vector<16x320xf32>
    %7 = arith.addf %0, %6 : vector<16x320xf32>
    %c0_7 = arith.constant 0 : index
    %c0_8 = arith.constant 0 : index
    %c0_9 = arith.constant 0 : index
    %8 = vector.load %arg3[%c0_7, %c0_8, %c0_9] : memref<3x36x320xf32, #tpu.memory_space<vmem>>, vector<1x36x320xf32>
    %9 = vector.shape_cast %8 : vector<1x36x320xf32> to vector<36x320xf32>
    %cst_10 = arith.constant dense<0.000000e+00> : vector<16x320xf32>
    %10 = tpu.matmul %3, %9, %cst_10 {dimension_numbers = #tpu.dot_dimension_numbers<[1], [0], [0], [1], [0, 0, 1, 1], [], []>} : vector<16x36xf32>, vector<36x320xf32>, vector<16x320xf32> -> vector<16x320xf32>
    %11 = arith.addf %1, %10 : vector<16x320xf32>
    %c0_11 = arith.constant 0 : index
    %c1 = arith.constant 1 : index
    %c0_12 = arith.constant 0 : index
    %12 = vector.load %arg1[%c0_11, %c1, %c0_12] : memref<1x18x36xf32, #tpu.memory_space<vmem>>, vector<1x16x36xf32>
    %13 = vector.shape_cast %12 : vector<1x16x36xf32> to vector<16x36xf32>
    %c1_13 = arith.constant 1 : index
    %c0_14 = arith.constant 0 : index
    %c0_15 = arith.constant 0 : index
    %14 = vector.load %arg2[%c1_13, %c0_14, %c0_15] : memref<3x36x320xf32, #tpu.memory_space<vmem>>, vector<1x36x320xf32>
    %15 = vector.shape_cast %14 : vector<1x36x320xf32> to vector<36x320xf32>
    %cst_16 = arith.constant dense<0.000000e+00> : vector<16x320xf32>
    %16 = tpu.matmul %13, %15, %cst_16 {dimension_numbers = #tpu.dot_dimension_numbers<[1], [0], [0], [1], [0, 0, 1, 1], [], []>} : vector<16x36xf32>, vector<36x320xf32>, vector<16x320xf32> -> vector<16x320xf32>
    %17 = arith.addf %7, %16 : vector<16x320xf32>
    %c1_17 = arith.constant 1 : index
    %c0_18 = arith.constant 0 : index
    %c0_19 = arith.constant 0 : index
    %18 = vector.load %arg3[%c1_17, %c0_18, %c0_19] : memref<3x36x320xf32, #tpu.memory_space<vmem>>, vector<1x36x320xf32>
    %19 = vector.shape_cast %18 : vector<1x36x320xf32> to vector<36x320xf32>
    %cst_20 = arith.constant dense<0.000000e+00> : vector<16x320xf32>
    %20 = tpu.matmul %13, %19, %cst_20 {dimension_numbers = #tpu.dot_dimension_numbers<[1], [0], [0], [1], [0, 0, 1, 1], [], []>} : vector<16x36xf32>, vector<36x320xf32>, vector<16x320xf32> -> vector<16x320xf32>
    %21 = arith.addf %11, %20 : vector<16x320xf32>
    %c0_21 = arith.constant 0 : index
    %c2 = arith.constant 2 : index
    %c0_22 = arith.constant 0 : index
    %22 = vector.load %arg1[%c0_21, %c2, %c0_22] : memref<1x18x36xf32, #tpu.memory_space<vmem>>, vector<1x16x36xf32>
    %23 = vector.shape_cast %22 : vector<1x16x36xf32> to vector<16x36xf32>
    %c2_23 = arith.constant 2 : index
    %c0_24 = arith.constant 0 : index
    %c0_25 = arith.constant 0 : index
    %24 = vector.load %arg2[%c2_23, %c0_24, %c0_25] : memref<3x36x320xf32, #tpu.memory_space<vmem>>, vector<1x36x320xf32>
    %25 = vector.shape_cast %24 : vector<1x36x320xf32> to vector<36x320xf32>
    %cst_26 = arith.constant dense<0.000000e+00> : vector<16x320xf32>
    %26 = tpu.matmul %23, %25, %cst_26 {dimension_numbers = #tpu.dot_dimension_numbers<[1], [0], [0], [1], [0, 0, 1, 1], [], []>} : vector<16x36xf32>, vector<36x320xf32>, vector<16x320xf32> -> vector<16x320xf32>
    %27 = arith.addf %17, %26 : vector<16x320xf32>
    %c2_27 = arith.constant 2 : index
    %c0_28 = arith.constant 0 : index
    %c0_29 = arith.constant 0 : index
    %28 = vector.load %arg3[%c2_27, %c0_28, %c0_29] : memref<3x36x320xf32, #tpu.memory_space<vmem>>, vector<1x36x320xf32>
    %29 = vector.shape_cast %28 : vector<1x36x320xf32> to vector<36x320xf32>
    %cst_30 = arith.constant dense<0.000000e+00> : vector<16x320xf32>
    %30 = tpu.matmul %23, %29, %cst_30 {dimension_numbers = #tpu.dot_dimension_numbers<[1], [0], [0], [1], [0, 0, 1, 1], [], []>} : vector<16x36xf32>, vector<36x320xf32>, vector<16x320xf32> -> vector<16x320xf32>
    %31 = arith.addf %21, %30 : vector<16x320xf32>
    %c0_31 = arith.constant 0 : index
    %c0_32 = arith.constant 0 : index
    %32 = vector.load %arg4[%c0_31, %c0_32] : memref<1x320xf32, #tpu.memory_space<vmem>>, vector<1x320xf32>
    %33 = vector.broadcast %32 : vector<1x320xf32> to vector<16x320xf32>
    %34 = arith.addf %27, %33 : vector<16x320xf32>
    %c0_33 = arith.constant 0 : index
    %c0_34 = arith.constant 0 : index
    %35 = vector.load %arg4[%c0_33, %c0_34] : memref<1x320xf32, #tpu.memory_space<vmem>>, vector<1x320xf32>
    %36 = vector.broadcast %35 : vector<1x320xf32> to vector<16x320xf32>
    %37 = arith.addf %31, %36 : vector<16x320xf32>
    %38 = arith.maximumf %34, %37 : vector<16x320xf32>
    %cst_35 = arith.constant 0.000000e+00 : f32
    %39 = vector.broadcast %cst_35 : f32 to vector<16x320xf32>
    %40 = arith.maximumf %38, %39 : vector<16x320xf32>
    %cst_36 = arith.constant 0.000000e+00 : f32
    %41 = vector.broadcast %cst_36 : f32 to vector<10x320xf32>
    %c0_37 = arith.constant 0 : index
    %c0_38 = arith.constant 0 : index
    %42 = vector.load %arg13[%c0_37, %c0_38] : memref<10x320xf32, #tpu.memory_space<vmem>>, vector<10x320xf32>
    tpu.vector_store %arg13[%c0_37, %c0_38], %41 {strides = array<i32>} : memref<10x320xf32, #tpu.memory_space<vmem>>, vector<10x320xf32>,
    %43 = vector.extract_strided_slice %40 {offsets = [0, 0], sizes = [1, 320], strides = [1, 1]} : vector<16x320xf32> to vector<1x320xf32>
    %44 = vector.extract_strided_slice %40 {offsets = [1, 0], sizes = [1, 320], strides = [1, 1]} : vector<16x320xf32> to vector<1x320xf32>
    %45 = arith.maximumf %43, %44 : vector<1x320xf32>
    %c1_39 = arith.constant 1 : index
    %c0_40 = arith.constant 0 : index
    %46 = vector.load %arg13[%c1_39, %c0_40] : memref<10x320xf32, #tpu.memory_space<vmem>>, vector<1x320xf32>
    tpu.vector_store %arg13[%c1_39, %c0_40], %45 {strides = array<i32>} : memref<10x320xf32, #tpu.memory_space<vmem>>, vector<1x320xf32>,
    %47 = vector.extract_strided_slice %40 {offsets = [2, 0], sizes = [1, 320], strides = [1, 1]} : vector<16x320xf32> to vector<1x320xf32>
    %48 = vector.extract_strided_slice %40 {offsets = [3, 0], sizes = [1, 320], strides = [1, 1]} : vector<16x320xf32> to vector<1x320xf32>
    %49 = arith.maximumf %47, %48 : vector<1x320xf32>
    %c2_41 = arith.constant 2 : index
    %c0_42 = arith.constant 0 : index
    %50 = vector.load %arg13[%c2_41, %c0_42] : memref<10x320xf32, #tpu.memory_space<vmem>>, vector<1x320xf32>
    tpu.vector_store %arg13[%c2_41, %c0_42], %49 {strides = array<i32>} : memref<10x320xf32, #tpu.memory_space<vmem>>, vector<1x320xf32>,
    %51 = vector.extract_strided_slice %40 {offsets = [4, 0], sizes = [1, 320], strides = [1, 1]} : vector<16x320xf32> to vector<1x320xf32>
    %52 = vector.extract_strided_slice %40 {offsets = [5, 0], sizes = [1, 320], strides = [1, 1]} : vector<16x320xf32> to vector<1x320xf32>
    %53 = arith.maximumf %51, %52 : vector<1x320xf32>
    %c3 = arith.constant 3 : index
    %c0_43 = arith.constant 0 : index
    %54 = vector.load %arg13[%c3, %c0_43] : memref<10x320xf32, #tpu.memory_space<vmem>>, vector<1x320xf32>
    tpu.vector_store %arg13[%c3, %c0_43], %53 {strides = array<i32>} : memref<10x320xf32, #tpu.memory_space<vmem>>, vector<1x320xf32>,
    %55 = vector.extract_strided_slice %40 {offsets = [6, 0], sizes = [1, 320], strides = [1, 1]} : vector<16x320xf32> to vector<1x320xf32>
    %56 = vector.extract_strided_slice %40 {offsets = [7, 0], sizes = [1, 320], strides = [1, 1]} : vector<16x320xf32> to vector<1x320xf32>
    %57 = arith.maximumf %55, %56 : vector<1x320xf32>
    %c4 = arith.constant 4 : index
    %c0_44 = arith.constant 0 : index
    %58 = vector.load %arg13[%c4, %c0_44] : memref<10x320xf32, #tpu.memory_space<vmem>>, vector<1x320xf32>
    tpu.vector_store %arg13[%c4, %c0_44], %57 {strides = array<i32>} : memref<10x320xf32, #tpu.memory_space<vmem>>, vector<1x320xf32>,
    %59 = vector.extract_strided_slice %40 {offsets = [8, 0], sizes = [1, 320], strides = [1, 1]} : vector<16x320xf32> to vector<1x320xf32>
    %60 = vector.extract_strided_slice %40 {offsets = [9, 0], sizes = [1, 320], strides = [1, 1]} : vector<16x320xf32> to vector<1x320xf32>
    %61 = arith.maximumf %59, %60 : vector<1x320xf32>
    %c5 = arith.constant 5 : index
    %c0_45 = arith.constant 0 : index
    %62 = vector.load %arg13[%c5, %c0_45] : memref<10x320xf32, #tpu.memory_space<vmem>>, vector<1x320xf32>
    tpu.vector_store %arg13[%c5, %c0_45], %61 {strides = array<i32>} : memref<10x320xf32, #tpu.memory_space<vmem>>, vector<1x320xf32>,
    %63 = vector.extract_strided_slice %40 {offsets = [10, 0], sizes = [1, 320], strides = [1, 1]} : vector<16x320xf32> to vector<1x320xf32>
    %64 = vector.extract_strided_slice %40 {offsets = [11, 0], sizes = [1, 320], strides = [1, 1]} : vector<16x320xf32> to vector<1x320xf32>
    %65 = arith.maximumf %63, %64 : vector<1x320xf32>
    %c6 = arith.constant 6 : index
    %c0_46 = arith.constant 0 : index
    %66 = vector.load %arg13[%c6, %c0_46] : memref<10x320xf32, #tpu.memory_space<vmem>>, vector<1x320xf32>
    tpu.vector_store %arg13[%c6, %c0_46], %65 {strides = array<i32>} : memref<10x320xf32, #tpu.memory_space<vmem>>, vector<1x320xf32>,
    %67 = vector.extract_strided_slice %40 {offsets = [12, 0], sizes = [1, 320], strides = [1, 1]} : vector<16x320xf32> to vector<1x320xf32>
    %68 = vector.extract_strided_slice %40 {offsets = [13, 0], sizes = [1, 320], strides = [1, 1]} : vector<16x320xf32> to vector<1x320xf32>
    %69 = arith.maximumf %67, %68 : vector<1x320xf32>
    %c7 = arith.constant 7 : index
    %c0_47 = arith.constant 0 : index
    %70 = vector.load %arg13[%c7, %c0_47] : memref<10x320xf32, #tpu.memory_space<vmem>>, vector<1x320xf32>
    tpu.vector_store %arg13[%c7, %c0_47], %69 {strides = array<i32>} : memref<10x320xf32, #tpu.memory_space<vmem>>, vector<1x320xf32>,
    %71 = vector.extract_strided_slice %40 {offsets = [14, 0], sizes = [1, 320], strides = [1, 1]} : vector<16x320xf32> to vector<1x320xf32>
    %72 = vector.extract_strided_slice %40 {offsets = [15, 0], sizes = [1, 320], strides = [1, 1]} : vector<16x320xf32> to vector<1x320xf32>
    %73 = arith.maximumf %71, %72 : vector<1x320xf32>
    %c8 = arith.constant 8 : index
    %c0_48 = arith.constant 0 : index
    %74 = vector.load %arg13[%c8, %c0_48] : memref<10x320xf32, #tpu.memory_space<vmem>>, vector<1x320xf32>
    tpu.vector_store %arg13[%c8, %c0_48], %73 {strides = array<i32>} : memref<10x320xf32, #tpu.memory_space<vmem>>, vector<1x320xf32>,
    %cst_49 = arith.constant 0.000000e+00 : f32
    %75 = vector.broadcast %cst_49 : f32 to vector<8x256xf32>
    %cst_50 = arith.constant 0.000000e+00 : f32
    %76 = vector.broadcast %cst_50 : f32 to vector<8x256xf32>
    %c0_51 = arith.constant 0 : index
    %c0_52 = arith.constant 0 : index
    %77 = vector.load %arg13[%c0_51, %c0_52] : memref<10x320xf32, #tpu.memory_space<vmem>>, vector<8x320xf32>
    %c0_53 = arith.constant 0 : index
    %c0_54 = arith.constant 0 : index
    %c0_55 = arith.constant 0 : index
    %78 = vector.load %arg5[%c0_53, %c0_54, %c0_55] : memref<3x320x256xf32, #tpu.memory_space<vmem>>, vector<1x320x256xf32>
    %79 = vector.shape_cast %78 : vector<1x320x256xf32> to vector<320x256xf32>
    %cst_56 = arith.constant dense<0.000000e+00> : vector<8x256xf32>
    %80 = tpu.matmul %77, %79, %cst_56 {dimension_numbers = #tpu.dot_dimension_numbers<[1], [0], [0], [1], [0, 0, 1, 1], [], []>} : vector<8x320xf32>, vector<320x256xf32>, vector<8x256xf32> -> vector<8x256xf32>
    %81 = arith.addf %75, %80 : vector<8x256xf32>
    %c0_57 = arith.constant 0 : index
    %c0_58 = arith.constant 0 : index
    %c0_59 = arith.constant 0 : index
    %82 = vector.load %arg6[%c0_57, %c0_58, %c0_59] : memref<3x320x256xf32, #tpu.memory_space<vmem>>, vector<1x320x256xf32>
    %83 = vector.shape_cast %82 : vector<1x320x256xf32> to vector<320x256xf32>
    %cst_60 = arith.constant dense<0.000000e+00> : vector<8x256xf32>
    %84 = tpu.matmul %77, %83, %cst_60 {dimension_numbers = #tpu.dot_dimension_numbers<[1], [0], [0], [1], [0, 0, 1, 1], [], []>} : vector<8x320xf32>, vector<320x256xf32>, vector<8x256xf32> -> vector<8x256xf32>
    %85 = arith.addf %76, %84 : vector<8x256xf32>
    %c1_61 = arith.constant 1 : index
    %c0_62 = arith.constant 0 : index
    %86 = vector.load %arg13[%c1_61, %c0_62] : memref<10x320xf32, #tpu.memory_space<vmem>>, vector<8x320xf32>
    %c1_63 = arith.constant 1 : index
    %c0_64 = arith.constant 0 : index
    %c0_65 = arith.constant 0 : index
    %87 = vector.load %arg5[%c1_63, %c0_64, %c0_65] : memref<3x320x256xf32, #tpu.memory_space<vmem>>, vector<1x320x256xf32>
    %88 = vector.shape_cast %87 : vector<1x320x256xf32> to vector<320x256xf32>
    %cst_66 = arith.constant dense<0.000000e+00> : vector<8x256xf32>
    %89 = tpu.matmul %86, %88, %cst_66 {dimension_numbers = #tpu.dot_dimension_numbers<[1], [0], [0], [1], [0, 0, 1, 1], [], []>} : vector<8x320xf32>, vector<320x256xf32>, vector<8x256xf32> -> vector<8x256xf32>
    %90 = arith.addf %81, %89 : vector<8x256xf32>
    %c1_67 = arith.constant 1 : index
    %c0_68 = arith.constant 0 : index
    %c0_69 = arith.constant 0 : index
    %91 = vector.load %arg6[%c1_67, %c0_68, %c0_69] : memref<3x320x256xf32, #tpu.memory_space<vmem>>, vector<1x320x256xf32>
    %92 = vector.shape_cast %91 : vector<1x320x256xf32> to vector<320x256xf32>
    %cst_70 = arith.constant dense<0.000000e+00> : vector<8x256xf32>
    %93 = tpu.matmul %86, %92, %cst_70 {dimension_numbers = #tpu.dot_dimension_numbers<[1], [0], [0], [1], [0, 0, 1, 1], [], []>} : vector<8x320xf32>, vector<320x256xf32>, vector<8x256xf32> -> vector<8x256xf32>
    %94 = arith.addf %85, %93 : vector<8x256xf32>
    %c2_71 = arith.constant 2 : index
    %c0_72 = arith.constant 0 : index
    %95 = vector.load %arg13[%c2_71, %c0_72] : memref<10x320xf32, #tpu.memory_space<vmem>>, vector<8x320xf32>
    %c2_73 = arith.constant 2 : index
    %c0_74 = arith.constant 0 : index
    %c0_75 = arith.constant 0 : index
    %96 = vector.load %arg5[%c2_73, %c0_74, %c0_75] : memref<3x320x256xf32, #tpu.memory_space<vmem>>, vector<1x320x256xf32>
    %97 = vector.shape_cast %96 : vector<1x320x256xf32> to vector<320x256xf32>
    %cst_76 = arith.constant dense<0.000000e+00> : vector<8x256xf32>
    %98 = tpu.matmul %95, %97, %cst_76 {dimension_numbers = #tpu.dot_dimension_numbers<[1], [0], [0], [1], [0, 0, 1, 1], [], []>} : vector<8x320xf32>, vector<320x256xf32>, vector<8x256xf32> -> vector<8x256xf32>
    %99 = arith.addf %90, %98 : vector<8x256xf32>
    %c2_77 = arith.constant 2 : index
    %c0_78 = arith.constant 0 : index
    %c0_79 = arith.constant 0 : index
    %100 = vector.load %arg6[%c2_77, %c0_78, %c0_79] : memref<3x320x256xf32, #tpu.memory_space<vmem>>, vector<1x320x256xf32>
    %101 = vector.shape_cast %100 : vector<1x320x256xf32> to vector<320x256xf32>
    %cst_80 = arith.constant dense<0.000000e+00> : vector<8x256xf32>
    %102 = tpu.matmul %95, %101, %cst_80 {dimension_numbers = #tpu.dot_dimension_numbers<[1], [0], [0], [1], [0, 0, 1, 1], [], []>} : vector<8x320xf32>, vector<320x256xf32>, vector<8x256xf32> -> vector<8x256xf32>
    %103 = arith.addf %94, %102 : vector<8x256xf32>
    %c0_81 = arith.constant 0 : index
    %c0_82 = arith.constant 0 : index
    %104 = vector.load %arg7[%c0_81, %c0_82] : memref<1x256xf32, #tpu.memory_space<vmem>>, vector<1x256xf32>
    %105 = vector.broadcast %104 : vector<1x256xf32> to vector<8x256xf32>
    %106 = arith.addf %99, %105 : vector<8x256xf32>
    %c0_83 = arith.constant 0 : index
    %c0_84 = arith.constant 0 : index
    %107 = vector.load %arg7[%c0_83, %c0_84] : memref<1x256xf32, #tpu.memory_space<vmem>>, vector<1x256xf32>
    %108 = vector.broadcast %107 : vector<1x256xf32> to vector<8x256xf32>
    %109 = arith.addf %103, %108 : vector<8x256xf32>
    %110 = arith.maximumf %106, %109 : vector<8x256xf32>
    %cst_85 = arith.constant 0.000000e+00 : f32
    %111 = vector.broadcast %cst_85 : f32 to vector<8x256xf32>
    %112 = arith.maximumf %110, %111 : vector<8x256xf32>
    %cst_86 = arith.constant 0.000000e+00 : f32
    %113 = vector.broadcast %cst_86 : f32 to vector<1x128xf32>
    %114 = vector.extract_strided_slice %112 {offsets = [0, 0], sizes = [1, 256], strides = [1, 1]} : vector<8x256xf32> to vector<1x256xf32>
    %115 = vector.extract_strided_slice %112 {offsets = [1, 0], sizes = [1, 256], strides = [1, 1]} : vector<8x256xf32> to vector<1x256xf32>
    %116 = arith.maximumf %114, %115 : vector<1x256xf32>
    %c0_87 = arith.constant 0 : index
    %c0_88 = arith.constant 0 : index
    %c0_89 = arith.constant 0 : index
    %117 = vector.load %arg8[%c0_87, %c0_88, %c0_89] : memref<4x256x128xf32, #tpu.memory_space<vmem>>, vector<1x256x128xf32>
    %118 = vector.shape_cast %117 : vector<1x256x128xf32> to vector<256x128xf32>
    %cst_90 = arith.constant dense<0.000000e+00> : vector<1x128xf32>
    %119 = tpu.matmul %116, %118, %cst_90 {dimension_numbers = #tpu.dot_dimension_numbers<[1], [0], [0], [1], [0, 0, 1, 1], [], []>} : vector<1x256xf32>, vector<256x128xf32>, vector<1x128xf32> -> vector<1x128xf32>
    %120 = arith.addf %113, %119 : vector<1x128xf32>
    %121 = vector.extract_strided_slice %112 {offsets = [2, 0], sizes = [1, 256], strides = [1, 1]} : vector<8x256xf32> to vector<1x256xf32>
    %122 = vector.extract_strided_slice %112 {offsets = [3, 0], sizes = [1, 256], strides = [1, 1]} : vector<8x256xf32> to vector<1x256xf32>
    %123 = arith.maximumf %121, %122 : vector<1x256xf32>
    %c1_91 = arith.constant 1 : index
    %c0_92 = arith.constant 0 : index
    %c0_93 = arith.constant 0 : index
    %124 = vector.load %arg8[%c1_91, %c0_92, %c0_93] : memref<4x256x128xf32, #tpu.memory_space<vmem>>, vector<1x256x128xf32>
    %125 = vector.shape_cast %124 : vector<1x256x128xf32> to vector<256x128xf32>
    %cst_94 = arith.constant dense<0.000000e+00> : vector<1x128xf32>
    %126 = tpu.matmul %123, %125, %cst_94 {dimension_numbers = #tpu.dot_dimension_numbers<[1], [0], [0], [1], [0, 0, 1, 1], [], []>} : vector<1x256xf32>, vector<256x128xf32>, vector<1x128xf32> -> vector<1x128xf32>
    %127 = arith.addf %120, %126 : vector<1x128xf32>
    %128 = vector.extract_strided_slice %112 {offsets = [4, 0], sizes = [1, 256], strides = [1, 1]} : vector<8x256xf32> to vector<1x256xf32>
    %129 = vector.extract_strided_slice %112 {offsets = [5, 0], sizes = [1, 256], strides = [1, 1]} : vector<8x256xf32> to vector<1x256xf32>
    %130 = arith.maximumf %128, %129 : vector<1x256xf32>
    %c2_95 = arith.constant 2 : index
    %c0_96 = arith.constant 0 : index
    %c0_97 = arith.constant 0 : index
    %131 = vector.load %arg8[%c2_95, %c0_96, %c0_97] : memref<4x256x128xf32, #tpu.memory_space<vmem>>, vector<1x256x128xf32>
    %132 = vector.shape_cast %131 : vector<1x256x128xf32> to vector<256x128xf32>
    %cst_98 = arith.constant dense<0.000000e+00> : vector<1x128xf32>
    %133 = tpu.matmul %130, %132, %cst_98 {dimension_numbers = #tpu.dot_dimension_numbers<[1], [0], [0], [1], [0, 0, 1, 1], [], []>} : vector<1x256xf32>, vector<256x128xf32>, vector<1x128xf32> -> vector<1x128xf32>
    %134 = arith.addf %127, %133 : vector<1x128xf32>
    %135 = vector.extract_strided_slice %112 {offsets = [6, 0], sizes = [1, 256], strides = [1, 1]} : vector<8x256xf32> to vector<1x256xf32>
    %136 = vector.extract_strided_slice %112 {offsets = [7, 0], sizes = [1, 256], strides = [1, 1]} : vector<8x256xf32> to vector<1x256xf32>
    %137 = arith.maximumf %135, %136 : vector<1x256xf32>
    %c3_99 = arith.constant 3 : index
    %c0_100 = arith.constant 0 : index
    %c0_101 = arith.constant 0 : index
    %138 = vector.load %arg8[%c3_99, %c0_100, %c0_101] : memref<4x256x128xf32, #tpu.memory_space<vmem>>, vector<1x256x128xf32>
    %139 = vector.shape_cast %138 : vector<1x256x128xf32> to vector<256x128xf32>
    %cst_102 = arith.constant dense<0.000000e+00> : vector<1x128xf32>
    %140 = tpu.matmul %137, %139, %cst_102 {dimension_numbers = #tpu.dot_dimension_numbers<[1], [0], [0], [1], [0, 0, 1, 1], [], []>} : vector<1x256xf32>, vector<256x128xf32>, vector<1x128xf32> -> vector<1x128xf32>
    %141 = arith.addf %134, %140 : vector<1x128xf32>
    %c0_103 = arith.constant 0 : index
    %c0_104 = arith.constant 0 : index
    %142 = vector.load %arg9[%c0_103, %c0_104] : memref<1x128xf32, #tpu.memory_space<vmem>>, vector<1x128xf32>
    %143 = arith.addf %141, %142 : vector<1x128xf32>
    %cst_105 = arith.constant 0.000000e+00 : f32
    %144 = vector.broadcast %cst_105 : f32 to vector<1x128xf32>
    %145 = arith.maximumf %143, %144 : vector<1x128xf32>
    %c0_106 = arith.constant 0 : index
    %c0_107 = arith.constant 0 : index
    %146 = vector.load %arg10[%c0_106, %c0_107] : memref<1x128xf32, #tpu.memory_space<vmem>>, vector<1x128xf32>
    %147 = arith.mulf %145, %146 : vector<1x128xf32>
    %cst_108 = arith.constant dense<0.000000e+00> : vector<1xf32>
    %148 = vector.multi_reduction <add>, %147, %cst_108 [1] : vector<1x128xf32> to vector<1xf32>
    %149 = vector.shape_cast %148 : vector<1xf32> to vector<1x1xf32>
    %c0_109 = arith.constant 0 : index
    %c0_110 = arith.constant 0 : index
    %150 = vector.load %arg11[%c0_109, %c0_110] : memref<1x1xf32, #tpu.memory_space<vmem>>, vector<1x1xf32>
    %151 = arith.addf %149, %150 : vector<1x1xf32>
    %152 = vector.shape_cast %151 : vector<1x1xf32> to vector<1x1xf32>
    %153 = vector.broadcast %152 : vector<1x1xf32> to vector<1x128xf32>
    %c0_111 = arith.constant 0 : index
    %c0_112 = arith.constant 0 : index
    %c0_113 = arith.constant 0 : index
    %154 = vector.load %arg12[%c0_111, %c0_112, %c0_113] : memref<1x1x128xf32, #tpu.memory_space<vmem>>, vector<1x1x128xf32>
    %155 = vector.shape_cast %154 : vector<1x1x128xf32> to vector<1x128xf32>
    %156 = vector.shape_cast %153 : vector<1x128xf32> to vector<1x1x128xf32>
    tpu.vector_store %arg12[%c0_111, %c0_112, %c0_113], %156 {strides = array<i32>} : memref<1x1x128xf32, #tpu.memory_space<vmem>>, vector<1x1x128xf32>,
    return
  }
  func.func @transform_0(%arg0: i32) -> (i32, i32, i32) {
    %c0_i32 = arith.constant 0 : i32
    %c0_i32_0 = arith.constant 0 : i32
    %c0_i32_1 = arith.constant 0 : i32
    return %arg0, %c0_i32, %c0_i32_0 : i32, i32, i32
  }
  func.func @transform_1(%arg0: i32) -> (i32, i32, i32) {
    %c0_i32 = arith.constant 0 : i32
    %c0_i32_0 = arith.constant 0 : i32
    %c0_i32_1 = arith.constant 0 : i32
    %c0_i32_2 = arith.constant 0 : i32
    return %c0_i32, %c0_i32_0, %c0_i32_1 : i32, i32, i32
  }
  func.func @transform_2(%arg0: i32) -> (i32, i32, i32) {
    %c0_i32 = arith.constant 0 : i32
    %c0_i32_0 = arith.constant 0 : i32
    %c0_i32_1 = arith.constant 0 : i32
    %c0_i32_2 = arith.constant 0 : i32
    return %c0_i32, %c0_i32_0, %c0_i32_1 : i32, i32, i32
  }
  func.func @transform_3(%arg0: i32) -> (i32, i32) {
    %c0_i32 = arith.constant 0 : i32
    %c0_i32_0 = arith.constant 0 : i32
    %c0_i32_1 = arith.constant 0 : i32
    return %c0_i32, %c0_i32_0 : i32, i32
  }
  func.func @transform_4(%arg0: i32) -> (i32, i32, i32) {
    %c0_i32 = arith.constant 0 : i32
    %c0_i32_0 = arith.constant 0 : i32
    %c0_i32_1 = arith.constant 0 : i32
    %c0_i32_2 = arith.constant 0 : i32
    return %c0_i32, %c0_i32_0, %c0_i32_1 : i32, i32, i32
  }
  func.func @transform_5(%arg0: i32) -> (i32, i32, i32) {
    %c0_i32 = arith.constant 0 : i32
    %c0_i32_0 = arith.constant 0 : i32
    %c0_i32_1 = arith.constant 0 : i32
    %c0_i32_2 = arith.constant 0 : i32
    return %c0_i32, %c0_i32_0, %c0_i32_1 : i32, i32, i32
  }
  func.func @transform_6(%arg0: i32) -> (i32, i32) {
    %c0_i32 = arith.constant 0 : i32
    %c0_i32_0 = arith.constant 0 : i32
    %c0_i32_1 = arith.constant 0 : i32
    return %c0_i32, %c0_i32_0 : i32, i32
  }
  func.func @transform_7(%arg0: i32) -> (i32, i32, i32) {
    %c0_i32 = arith.constant 0 : i32
    %c0_i32_0 = arith.constant 0 : i32
    %c0_i32_1 = arith.constant 0 : i32
    %c0_i32_2 = arith.constant 0 : i32
    return %c0_i32, %c0_i32_0, %c0_i32_1 : i32, i32, i32
  }
  func.func @transform_8(%arg0: i32) -> (i32, i32) {
    %c0_i32 = arith.constant 0 : i32
    %c0_i32_0 = arith.constant 0 : i32
    %c0_i32_1 = arith.constant 0 : i32
    return %c0_i32, %c0_i32_0 : i32, i32
  }
  func.func @transform_9(%arg0: i32) -> (i32, i32) {
    %c0_i32 = arith.constant 0 : i32
    %c0_i32_0 = arith.constant 0 : i32
    %c0_i32_1 = arith.constant 0 : i32
    return %c0_i32, %c0_i32_0 : i32, i32
  }
  func.func @transform_10(%arg0: i32) -> (i32, i32) {
    %c0_i32 = arith.constant 0 : i32
    %c0_i32_0 = arith.constant 0 : i32
    %c0_i32_1 = arith.constant 0 : i32
    return %c0_i32, %c0_i32_0 : i32, i32
  }
  func.func @transform_11(%arg0: i32) -> (i32, i32, i32) {
    %c0_i32 = arith.constant 0 : i32
    %c0_i32_0 = arith.constant 0 : i32
    %c0_i32_1 = arith.constant 0 : i32
    return %arg0, %c0_i32, %c0_i32_0 : i32, i32, i32
  }
}

</mosaic_0001>

<bundles_post_ra>
// kernel: testnet_forward.1
= control target key start
LH: loop header
LB: loop body
LE: loop exit
PB: predicated region body
PF: predicated region fallthrough
CT: control target
= control target key end

     0   :  { %s4774_s0 = inlined_call_operand.vmem [shape: f32[2,18,36], index: 0, kind: input, shape index: {}]   ;;  %s4775_s1 = inlined_call_operand.vmem [shape: f32[3,36,320], index: 1, kind: input, shape index: {}]   ;;  %s4776_s2 = inlined_call_operand.hbm [shape: f32[3,36,320], index: 2, kind: input, shape index: {}]   ;;  %s4777_s3 = inlined_call_operand.vmem [shape: f32[1,320], index: 3, kind: input, shape index: {}]   ;;  %s4778_s4 = inlined_call_operand.hbm [shape: f32[3,320,256], index: 4, kind: input, shape index: {}]   ;;  %s4779_s5 = inlined_call_operand.hbm [shape: f32[3,320,256], index: 5, kind: input, shape index: {}]   ;;  %s4780_s6 = inlined_call_operand.vmem [shape: f32[1,256], index: 6, kind: input, shape index: {}]   ;;  %s4781_s7 = inlined_call_operand.hbm [shape: f32[4,256,128], index: 7, kind: input, shape index: {}]   ;;  %s4782_s8 = inlined_call_operand.vmem [shape: f32[1,128], index: 8, kind: input, shape index: {}]   ;;  %s4783_s9 = inlined_call_operand.vmem [shape: f32[1,128], index: 9, kind: input, shape index: {}]   ;;  %s4784_s10 = inlined_call_operand.<no memory space> [shape: f32[1,1], index: 10, kind: input, shape index: {}]   ;;  %s4785_s11 = inlined_call_operand.vmem [shape: f32[2,1,128], index: 11, kind: output, shape index: {}]  }
   0x1   :  { %v16_v0 = vstv %s4784_s10 }
   0x2   :  { %17 = vst [vmem:[#allocation3] sm:$0x1] %v16_v0 }
   0x3   :  { %18 = vsyncpa [#allocation5], 0 }
   0x4   :  { %19 = vsyncpa [#allocation7], 0 }
   0x5   :  { %20 = vsyncpa [#allocation10], 0  ;;  %s4327_s19 = smov 0  }
   0x6 LB: > { %s4251_s20 = smov [#allocation6]   ;;  %s4333_s22 = sadd.s32 4294967295, %s4249_s19   ;;  %s4249_s19 = sphi %s4327_s19, %s26_s19  }
   0x7   : > { %s324_s21 = sshll.u32 %s4251_s20, 4  ;;  %p3715_p0 = scmp.ge.s32.totalorder %s4249_s19, 1  ;;  %s325_s21 = int_to_ptr.vmem [resolvable:$true] %s324_s21 }
   0x8   : > { %p293_p1 = scmp.lt.s32.totalorder %s4249_s19, 3  ;;  %p4097_p2 = scmp.eq.s32.totalorder %s4333_s22, 0 }
   0x9   : > { %s4252_s23 = smov [#allocation4]   ;;  %s4253_s26 = smov [#allocation8]  }
   0xa   : > { %p4338_p3 = pnand %p3715_p0, %p293_p1  ;;  %s308_s24 = sshll.u32 %s4252_s23, 4  ;;  %s4344_s24 = int_to_ptr.vmem [resolvable:$true] %s308_s24 }
   0xb   : > { %s4352_s27 = sshll.u32 %s4253_s26, 4  ;;  %s4138_s28 = scalar_lea.vmem %s325_s21, 30720  ;;  %s338_s27 = int_to_ptr.vmem [resolvable:$true] %s4352_s27 }
   0xc   : > { %p4084_p4 = pneg %p4338_p3  ;;  %p4139_p7 = scmp.ne.s32.totalorder %s325_s21, %s4138_s28 }
   0xd   : > { %p4146_p10 = scmp.lt.s32.totalorder %s325_s21, %s325_s21  ;;  %p4147_p11 = scmp.lt.s32.totalorder %s4138_s28, %s4138_s28 }
   0xe   : > { %p4348_p5 = pnand %p4097_p2, %p4084_p4 }
   0xf   : > { %p4148_p12 = por %p4147_p11, %p4146_p10 }
  0x10   : > { %p4129_p6 = pneg %p4348_p5 }
  0x12   : > { %p4141_p8 = pnand %p4139_p7, %p4129_p6 }
  0x14   : > { %p4142_p9 = pneg %p4141_p8 }
  0x16   : > { %p4149_p13 = pnand %p4148_p12, %p4142_p9 }
  0x18   : > { %4152 = shalt.err (!%p4149_p13)
}
  0x19   : > { %s4254_s29 = smov 256   ;;  %s4255_s30 = smov 16  }
  0x1a   : > { %4090 = dma.hbm_to_vmem [thread:$0]  (!%p4348_p5), %s4778_s4, 30720, %s325_s21, [#allocation7], %s4254_s29, %s4254_s29, %s4255_s30  }
  0x1b   : > { %s4164_s14 = scalar_lea.vmem %s4344_s24, 5760  ;;  %p4172_p7 = scmp.lt.s32.totalorder %s4344_s24, %s4344_s24 }
  0x1c   : > { %p4165_p0 = scmp.ne.s32.totalorder %s4344_s24, %s4164_s14  ;;  %p4173_p8 = scmp.lt.s32.totalorder %s4164_s14, %s4164_s14 }
  0x1e   : > { %p4167_p1 = pnand %p4165_p0, %p4129_p6  ;;  %p4174_p9 = por %p4173_p8, %p4172_p7 }
  0x20   : > { %p4168_p4 = pneg %p4167_p1 }
  0x22   : > { %p4175_p10 = pnand %p4174_p9, %p4168_p4 }
  0x24   : > { %4178 = shalt.err (!%p4175_p10)
}
  0x25   : > { %s4256_s15 = smov 384   ;;  %s4257_s16 = smov 24  }
  0x26   : > { %4087 = dma.hbm_to_vmem [thread:$0]  (!%p4348_p5), %s4776_s2, 5760, %s4344_s24, [#allocation5], %s4256_s15, %s4256_s15, %s4257_s16  }
  0x27   : > { %s4258_s20 = smov [#allocation9]   ;;  %s4190_s23 = scalar_lea.vmem %s338_s27, 30720 }
  0x28   : > { %s353_s21 = sshll.u32 %s4258_s20, 4  ;;  %p4191_p11 = scmp.ne.s32.totalorder %s338_s27, %s4190_s23  ;;  %s354_s21 = int_to_ptr.vmem [resolvable:$true] %s353_s21 }
  0x29   : > { %p4198_p0 = scmp.lt.s32.totalorder %s338_s27, %s338_s27  ;;  %p4199_p1 = scmp.lt.s32.totalorder %s4190_s23, %s4190_s23 }
  0x2a   : > { %p4193_p12 = pnand %p4191_p11, %p4129_p6 }
  0x2b   : > { %p4200_p4 = por %p4199_p1, %p4198_p0 }
  0x2c   : > { %p4194_p13 = pneg %p4193_p12 }
  0x2e   : > { %p4201_p7 = pnand %p4200_p4, %p4194_p13 }
  0x30   : > { %4204 = shalt.err (!%p4201_p7)
}
  0x31   : > { %4093 = dma.hbm_to_vmem [thread:$0]  (!%p4348_p5), %s4779_s5, 30720, %s338_s27, [#allocation7], %s4254_s29, %s4254_s29, %s4255_s30  }
  0x32   : > { %s4216_s28 = scalar_lea.vmem %s354_s21, 16384  ;;  %p4224_p11 = scmp.lt.s32.totalorder %s354_s21, %s354_s21 }
  0x33   : > { %p4217_p8 = scmp.ne.s32.totalorder %s354_s21, %s4216_s28  ;;  %p4225_p12 = scmp.lt.s32.totalorder %s4216_s28, %s4216_s28 }
  0x35   : > { %p4219_p9 = pnand %p4217_p8, %p4129_p6  ;;  %p4226_p13 = por %p4225_p12, %p4224_p11 }
  0x37   : > { %p4220_p10 = pneg %p4219_p9 }
  0x39   : > { %p4227_p0 = pnand %p4226_p13, %p4220_p10 }
  0x3b   : > { %4230 = shalt.err (!%p4227_p0)
}
  0x3c   : > { %s4259_s12 = smov 128   ;;  %s4260_s13 = smov 8  }
  0x3d   : > { %4096 = dma.hbm_to_vmem [thread:$0]  (!%p4348_p5), %s4781_s7, 16384, %s354_s21, [#allocation10], %s4259_s12, %s4259_s12, %s4260_s13  }
  0x3e   : > { %386 = sbr.rel (%p4338_p3) target bundleno = 1334 (0x536), region = 64 }
  0x43   : > { %4236 = dma.done.wait (%p4097_p2), [#allocation5], 5760  }
  0x44   : > { %4238 = vsyncadd (%p4097_p2), [#allocation5], 4294961536 }
  0x45   : > { %4240 = dma.done.wait (%p4097_p2), [#allocation7], 61440  }
  0x46   : > { %4242 = vsyncadd (%p4097_p2), [#allocation7], 4294905856 }
  0x47   : > { %4244 = dma.done.wait (%p4097_p2), [#allocation10], 16384  }
  0x48   : > { %4246 = vsyncadd (%p4097_p2), [#allocation10], 4294950912  ;;  %p436_p3 = scmp.lt.s32.totalorder %s4333_s22, 1  ;;  %v4261_v1 = vmov 0.0   ;;  %vm501_vm0 = vcmask 1043456   ;;  %v3737_v5 = vld [vmem:[%s4775_s1 + $0xc8] sm:$0xff] }
  0x49   : > { %575 = vmatprep.mubr.f32.mxu0 %v4261_v1  ;;  %1583 = vst [vmem:[#allocation2] sm:$0xff] %v4261_v1  ;;  %1584 = vst [vmem:[#allocation2 + $0x8] sm:$0xff] %v4261_v1  ;;  %v3740_v2 = vld [vmem:[%s4775_s1 + $0xe0] sm:$0xf]  ;;  %v3741_v3 = vld [vmem:[%s4775_s1 + $0xe8] sm:$0xf] }
  0x4a   : > { %1587 = vst [vmem:[#allocation2 + $0x18] sm:$0x3] %v4261_v1  ;;  %1588 = vst [vmem:[#allocation2 + $0x20] sm:$0x3] %v4261_v1  ;;  %s4791_s22 = smov (!%p436_p3, %s4333_s22), 1  ;;  %3742 = vmatprep.subr.msk.mxu0 %vm501_vm0, %v3740_v2  ;;  %3989 = vmatprep.subr.msk.mxu1 %vm501_vm0, %v3741_v3  ;;  %v3738_v6 = vld [vmem:[%s4775_s1 + $0xd0] sm:$0xff] }
  0x4b   : > { %v3739_v4 = vld [vmem:[%s4775_s1 + $0xd8] sm:$0xf]  ;;  %v3736_v7 = vld [vmem:[%s4775_s1 + $0xc0] sm:$0xff]  ;;  %s4067_s26 = smul.u32 24, %s4791_s22  ;;  %3990 = vmatpush3.msk.msra.mxu1 %vm501_vm0, %v3741_v3  ;;  %v3734_v8 = vld [vmem:[%s4775_s1 + $0xb0] sm:$0xff]  ;;  %vm494_vm1 = vcmask 293888   ;;  %s443_s15 = scalar_lea.vmem %s4785_s11, %s4791_s22 }
  0x4c   : > { %3743 = vmatpush1.msk.msra.mxu0 %vm501_vm0, %v3739_v4  ;;  %v3735_v9 = vld [vmem:[%s4775_s1 + $0xb8] sm:$0xff]  ;;  %3991 = vmatprep.subr.mxu1 %v3738_v6  ;;  %v3733_v10 = vld [vmem:[%s4775_s1 + $0xa8] sm:$0xff]  ;;  %v3732_v12 = vld [vmem:[%s4775_s1 + $0xa0] sm:$0xff]  ;;  %vm1585_vm2 = vcmask 523264   ;;  %vm1589_vm3 = vcmask 517120   ;;  %vm2011_vm5 = vcmask 1046528  }
  0x4d   : > { %535 = vmatprep.subr.mxu0 %v3737_v5  ;;  %3992 = vmatpush3.msra.mxu1 %v3738_v6  ;;  %v3731_v11 = vld [vmem:[%s4775_s1 + $0x98] sm:$0xff]  ;;  %v3730_v13 = vld [vmem:[%s4775_s1 + $0x90] sm:$0xff]  ;;  %s4467_s21 = scalar_lea.vmem %s4774_s0, %s4067_s26  ;;  %v3728_v14 = vld [vmem:[%s4775_s1 + $0x80] sm:$0xff]  ;;  %1586 = vst.msk [vmem:[#allocation2 + $0x10] sm:$0xff] %vm1585_vm2, %v4261_v1  ;;  %vm2770_vm6 = vcmask 1045504   ;;  %vm3613_vm7 = vcmask 1040384  }
  0x4e   : > { %536 = vmatpush1.msra.mxu0 %v3736_v7  ;;  %3993 = vmatprep.subr.mxu1 %v3735_v9  ;;  %v3729_v15 = vld [vmem:[%s4775_s1 + $0x88] sm:$0xff]  ;;  %v3727_v16 = vld [vmem:[%s4775_s1 + $0x78] sm:$0xff]  ;;  %v460_v19 = vld [vmem:[%s4775_s1 + $0x70] sm:$0xf]  ;;  %1590 = vst.msk [vmem:[#allocation2 + $0x28] sm:$0x3] %vm1589_vm3, %v4261_v1 }
  0x4f   : > { %537 = vmatprep.subr.mxu0 %v3734_v8  ;;  %3994 = vmatpush3.msra.mxu1 %v3735_v9  ;;  %v4479_v17 = vld [vmem:[%s4467_s21 + $0x1] sm:$0xff]  ;;  %v4488_v20 = vld [vmem:[%s4467_s21 + $0x9] sm:$0xff]  ;;  %v457_v23 = vld [vmem:[%s4775_s1 + $0x58] sm:$0xff] }
  0x50   : > { %538 = vmatpush1.msra.mxu0 %v3733_v10  ;;  %3995 = vmatprep.subr.mxu1 %v3732_v12  ;;  %v459_v18 = vld [vmem:[%s4775_s1 + $0x68] sm:$0xf]  ;;  %v458_v21 = vld [vmem:[%s4775_s1 + $0x60] sm:$0xf]  ;;  %v456_v22 = vld [vmem:[%s4775_s1 + $0x50] sm:$0xff] }
  0x51   : > { %539 = vmatprep.subr.mxu0 %v3731_v11  ;;  %3996 = vmatpush3.msra.mxu1 %v3732_v12  ;;  %v455_v24 = vld [vmem:[%s4775_s1 + $0x48] sm:$0xff]  ;;  %v453_v25 = vld [vmem:[%s4775_s1 + $0x38] sm:$0xff]  ;;  %v454_v26 = vld [vmem:[%s4775_s1 + $0x40] sm:$0xff] }
  0x52   : > { %540 = vmatpush1.msra.mxu0 %v3730_v13  ;;  %3997 = vmatprep.subr.mxu1 %v3729_v15  ;;  %v452_v27 = vld [vmem:[%s4775_s1 + $0x30] sm:$0xff]  ;;  %v451_v28 = vld [vmem:[%s4775_s1 + $0x28] sm:$0xff]  ;;  %v450_v29 = vld [vmem:[%s4775_s1 + $0x20] sm:$0xff] }
  0x53   : > { %541 = vmatprep.subr.mxu0 %v3728_v14  ;;  %3998 = vmatpush3.msra.mxu1 %v3729_v15  ;;  %v449_v30 = vld [vmem:[%s4775_s1 + $0x18] sm:$0xff]  ;;  %v448_v31 = vld [vmem:[%s4775_s1 + $0x10] sm:$0xff]  ;;  %v447_v32 = vld [vmem:[%s4775_s1 + $0x8] sm:$0xff] }
  0x54   : > { %542 = vmatpush1.msra.mxu0 %v3727_v16  ;;  %3999 = vmatprep.mubr.msk.f32.mxu1 %vm494_vm1, %v4479_v17  ;;  %v446_v33 = vld [vmem:[%s4775_s1] sm:$0xff]  ;;  %v4547_v35 = vld [vmem:[%s4467_s21 + $0x8] sm:$0xff]  ;;  %v844_v36 = vld [vmem:[#allocation4 + $0xe0] sm:$0xf] }
  0x55   : > { %3744 = vmatmul.mubr.msk.f32.vlgmr.msra.gmra.mxu0 %vm494_vm1, %v4479_v17  ;;  %3749 = vmatprep.subr.msk.mxu0 %vm501_vm0, %v459_v18  ;;  %v4543_v34 = vld [vmem:[%s4467_s21] sm:$0xff]  ;;  %v845_v37 = vld [vmem:[#allocation4 + $0xe8] sm:$0xf]  ;;  %v843_v38 = vld [vmem:[#allocation4 + $0xd8] sm:$0xf] }
  0x56   : > { %4002 = vmatprep.subr.msk.mxu1 %vm501_vm0, %v460_v19  ;;  %4000 = vmatmul.mubr.msk.f32.vlgmr.msra.gmra.mxu1 %vm494_vm1, %v4488_v20  ;;  %v841_v39 = vld [vmem:[#allocation4 + $0xc8] sm:$0xff]  ;;  %v842_v40 = vld [vmem:[#allocation4 + $0xd0] sm:$0xff]  ;;  %v840_v41 = vld [vmem:[#allocation4 + $0xc0] sm:$0xff] }
  0x57   : > { %3750 = vmatpush1.msk.msra.mxu0 %vm501_vm0, %v458_v21  ;;  %4003 = vmatpush3.msk.msra.mxu1 %vm501_vm0, %v460_v19  ;;  %v838_v42 = vld [vmem:[#allocation4 + $0xb0] sm:$0xff]  ;;  %v839_v43 = vld [vmem:[#allocation4 + $0xb8] sm:$0xff]  ;;  %v837_v44 = vld [vmem:[#allocation4 + $0xa8] sm:$0xff] }
  0x58   : > { %702 = vmatprep.subr.mxu0 %v456_v22  ;;  %4004 = vmatprep.subr.mxu1 %v457_v23  ;;  %v835_v45 = vld [vmem:[#allocation4 + $0x98] sm:$0xff]  ;;  %v836_v46 = vld [vmem:[#allocation4 + $0xa0] sm:$0xff]  ;;  %v834_v47 = vld [vmem:[#allocation4 + $0x90] sm:$0xff] }
  0x59   : > { %703 = vmatpush1.msra.mxu0 %v455_v24  ;;  %4005 = vmatpush3.msra.mxu1 %v457_v23  ;;  %v832_v48 = vld [vmem:[#allocation4 + $0x80] sm:$0xff]  ;;  %v833_v49 = vld [vmem:[#allocation4 + $0x88] sm:$0xff]  ;;  %v831_v50 = vld [vmem:[#allocation4 + $0x78] sm:$0xff] }
  0x5a   : > { %581 = vmatprep.mubr.f32.mxu0 %v4261_v1  ;;  %704 = vmatprep.subr.mxu0 %v453_v25  ;;  %v474_v51 = vld [vmem:[#allocation4 + $0x68] sm:$0xf]  ;;  %v475_v52 = vld [vmem:[#allocation4 + $0x70] sm:$0xf]  ;;  %v473_v53 = vld [vmem:[#allocation4 + $0x60] sm:$0xf] }
  0x5b   : > { %4006 = vmatprep.subr.mxu1 %v454_v26  ;;  %3745 = vmatmul.mubr.msk.f32.gmra.mxu0 %vm494_vm1, %v4488_v20  ;;  %v471_v54 = vld [vmem:[#allocation4 + $0x50] sm:$0xff]  ;;  %v472_v55 = vld [vmem:[#allocation4 + $0x58] sm:$0xff]  ;;  %v470_v56 = vld [vmem:[#allocation4 + $0x48] sm:$0xff] }
  0x5c   : > { %4007 = vmatpush3.msra.mxu1 %v454_v26  ;;  %705 = vmatpush1.msra.mxu0 %v452_v27  ;;  %v468_v57 = vld [vmem:[#allocation4 + $0x38] sm:$0xff]  ;;  %v469_v58 = vld [vmem:[#allocation4 + $0x40] sm:$0xff]  ;;  %v467_v59 = vld [vmem:[#allocation4 + $0x30] sm:$0xff] }
  0x5d   : > { %4008 = vmatprep.subr.mxu1 %v451_v28  ;;  %706 = vmatprep.subr.mxu0 %v450_v29  ;;  %v466_v60 = vld [vmem:[#allocation4 + $0x28] sm:$0xff]  ;;  %v465_v61 = vld [vmem:[#allocation4 + $0x20] sm:$0xff]  ;;  %v464_v62 = vld [vmem:[#allocation4 + $0x18] sm:$0xff] }
  0x5e   : > { %4009 = vmatpush3.msra.mxu1 %v451_v28  ;;  %707 = vmatpush1.msra.mxu0 %v449_v30  ;;  %v463_v63 = vld [vmem:[#allocation4 + $0x10] sm:$0xff]  ;;  %v462_v0 = vld [vmem:[#allocation4 + $0x8] sm:$0xff]  ;;  %v461_v2 = vld [vmem:[#allocation4] sm:$0xff] }
  0x5f   : > { %4010 = vmatprep.subr.mxu1 %v448_v31  ;;  %708 = vmatprep.subr.mxu0 %v447_v32  ;;  %v3783_v3 = vld [vmem:[%s4775_s1 + $0x158] sm:$0xf]  ;;  %v3784_v4 = vld [vmem:[%s4775_s1 + $0x160] sm:$0xf]  ;;  %v3782_v5 = vld [vmem:[%s4775_s1 + $0x150] sm:$0xf] }
  0x60   : > { %742 = vmatprep.mubr.f32.mxu0 %v4261_v1  ;;  %709 = vmatpush1.msra.mxu0 %v446_v33  ;;  %v3780_v6 = vld [vmem:[%s4775_s1 + $0x140] sm:$0xff]  ;;  %v3781_v7 = vld [vmem:[%s4775_s1 + $0x148] sm:$0xff]  ;;  %v3779_v8 = vld [vmem:[%s4775_s1 + $0x138] sm:$0xff] }
  0x61   : > { %4011 = vmatpush3.msra.mxu1 %v448_v31  ;;  %4012 = vmatprep.mubr.msk.f32.mxu1 %vm494_vm1, %v4543_v34  ;;  %v3777_v9 = vld [vmem:[%s4775_s1 + $0x128] sm:$0xff]  ;;  %v3778_v10 = vld [vmem:[%s4775_s1 + $0x130] sm:$0xff]  ;;  %v3776_v11 = vld [vmem:[%s4775_s1 + $0x120] sm:$0xff] }
  0x62   : > { %3751 = vmatmul.mubr.msk.f32.vlgmr.msra.gmra.mxu0 %vm494_vm1, %v4543_v34  ;;  %4013 = vmatmul.mubr.msk.f32.vlgmr.msra.gmra.mxu1 %vm494_vm1, %v4547_v35  ;;  %v3774_v12 = vld [vmem:[%s4775_s1 + $0x110] sm:$0xff]  ;;  %v3775_v13 = vld [vmem:[%s4775_s1 + $0x118] sm:$0xff]  ;;  %v3773_v14 = vld [vmem:[%s4775_s1 + $0x108] sm:$0xff] }
  0x63   : > { %3756 = vmatprep.subr.msk.mxu0 %vm501_vm0, %v844_v36  ;;  %4015 = vmatprep.subr.msk.mxu1 %vm501_vm0, %v845_v37  ;;  %v3771_v15 = vld [vmem:[%s4775_s1 + $0xf8] sm:$0xff]  ;;  %v3772_v16 = vld [vmem:[%s4775_s1 + $0x100] sm:$0xff]  ;;  %v1169_v19 = vld [vmem:[%s4467_s21 + $0xa] sm:$0xff] }
  0x64   : > { %3757 = vmatpush1.msk.msra.mxu0 %vm501_vm0, %v843_v38  ;;  %4016 = vmatpush3.msk.msra.mxu1 %vm501_vm0, %v845_v37  ;;  %v1168_v18 = vld [vmem:[%s4467_s21 + $0x2] sm:$0xff]  ;;  %v1374_v21 = vld [vmem:[#allocation4 + $0x160] sm:$0xf]  ;;  %v1371_v24 = vld [vmem:[#allocation4 + $0x148] sm:$0xff] }
  0x65   : > { %879 = vmatprep.subr.mxu0 %v841_v39  ;;  %4017 = vmatprep.subr.mxu1 %v842_v40  ;;  %v1372_v22 = vld [vmem:[#allocation4 + $0x150] sm:$0xf]  ;;  %v1370_v23 = vld [vmem:[#allocation4 + $0x140] sm:$0xff]  ;;  %v1369_v25 = vld [vmem:[#allocation4 + $0x138] sm:$0xff] }
  0x66   : > { %748 = vmatprep.mubr.f32.mxu0 %v4261_v1  ;;  %880 = vmatpush1.msra.mxu0 %v840_v41  ;;  %v1367_v26 = vld [vmem:[#allocation4 + $0x128] sm:$0xff]  ;;  %v1368_v27 = vld [vmem:[#allocation4 + $0x130] sm:$0xff]  ;;  %v1366_v28 = vld [vmem:[#allocation4 + $0x120] sm:$0xff] }
  0x67   : > { %4018 = vmatpush3.msra.mxu1 %v842_v40  ;;  %3752 = vmatmul.mubr.msk.f32.gmra.mxu0 %vm494_vm1, %v4547_v35  ;;  %v1364_v29 = vld [vmem:[#allocation4 + $0x110] sm:$0xff]  ;;  %v1365_v30 = vld [vmem:[#allocation4 + $0x118] sm:$0xff]  ;;  %v1363_v31 = vld [vmem:[#allocation4 + $0x108] sm:$0xff] }
  0x68   : > { %881 = vmatprep.subr.mxu0 %v838_v42  ;;  %4019 = vmatprep.subr.mxu1 %v839_v43  ;;  %v1361_v32 = vld [vmem:[#allocation4 + $0xf8] sm:$0xff]  ;;  %v1362_v33 = vld [vmem:[#allocation4 + $0x100] sm:$0xff]  ;;  %v1954_v37 = vld [vmem:[#allocation6 + $0x368] sm:$0xff] }
  0x69   : > { %882 = vmatpush1.msra.mxu0 %v837_v44  ;;  %4020 = vmatpush3.msra.mxu1 %v839_v43  ;;  %v1955_v36 = vld [vmem:[#allocation6 + $0x370] sm:$0xff]  ;;  %v1953_v38 = vld [vmem:[#allocation6 + $0x360] sm:$0xff]  ;;  %v1952_v39 = vld [vmem:[#allocation6 + $0x358] sm:$0xff] }
  0x6a   : > { %883 = vmatprep.subr.mxu0 %v835_v45  ;;  %4021 = vmatprep.subr.mxu1 %v836_v46  ;;  %v1951_v40 = vld [vmem:[#allocation6 + $0x350] sm:$0xff]  ;;  %v1950_v41 = vld [vmem:[#allocation6 + $0x348] sm:$0xff]  ;;  %v1949_v42 = vld [vmem:[#allocation6 + $0x340] sm:$0xff] }
  0x6b   : > { %884 = vmatpush1.msra.mxu0 %v834_v47  ;;  %4022 = vmatpush3.msra.mxu1 %v836_v46  ;;  %v1948_v43 = vld [vmem:[#allocation6 + $0x338] sm:$0xff]  ;;  %v1947_v44 = vld [vmem:[#allocation6 + $0x330] sm:$0xff]  ;;  %v1946_v45 = vld [vmem:[#allocation6 + $0x328] sm:$0xff] }
  0x6c   : > { %885 = vmatprep.subr.mxu0 %v832_v48  ;;  %4023 = vmatprep.subr.mxu1 %v833_v49  ;;  %v1945_v46 = vld [vmem:[#allocation6 + $0x320] sm:$0xff]  ;;  %v1944_v47 = vld [vmem:[#allocation6 + $0x318] sm:$0xff]  ;;  %v1943_v48 = vld [vmem:[#allocation6 + $0x310] sm:$0xff] }
  0x6d   : > { %886 = vmatpush1.msra.mxu0 %v831_v50  ;;  %919 = vmatprep.mubr.f32.mxu0 %v4261_v1  ;;  %v1941_v50 = vld [vmem:[#allocation6 + $0x300] sm:$0xff] }
  0x6e   : > { %4024 = vmatpush3.msra.mxu1 %v833_v49  ;;  %3758 = vmatmul.mubr.msk.f32.vlgmr.msra.gmra.mxu0 %vm494_vm1, %v4479_v17  ;;  %v1942_v49 = vld [vmem:[#allocation6 + $0x308] sm:$0xff] }
  0x6f   : > { %4025 = vmatprep.mubr.msk.f32.mxu1 %vm494_vm1, %v4479_v17  ;;  %3763 = vmatprep.subr.msk.mxu0 %vm501_vm0, %v474_v51  ;;  %v3770_v17 = vld [vmem:[%s4775_s1 + $0xf0] sm:$0xff] }
  0x70   : > { %4028 = vmatprep.subr.msk.mxu1 %vm501_vm0, %v475_v52  ;;  %4026 = vmatmul.mubr.msk.f32.vlgmr.msra.gmra.mxu1 %vm494_vm1, %v4488_v20  ;;  %v1940_v51 = vld [vmem:[#allocation6 + $0x2f8] sm:$0xff] }
  0x71   : > { %3764 = vmatpush1.msk.msra.mxu0 %vm501_vm0, %v473_v53  ;;  %4029 = vmatpush3.msk.msra.mxu1 %vm501_vm0, %v475_v52  ;;  %v1939_v52 = vld [vmem:[#allocation6 + $0x2f0] sm:$0xff]  ;;  %v1938_v53 = vld [vmem:[#allocation6 + $0x2e8] sm:$0xff] }
  0x72   : > { %1040 = vmatprep.subr.mxu0 %v471_v54  ;;  %4030 = vmatprep.subr.mxu1 %v472_v55  ;;  %v1937_v54 = vld [vmem:[#allocation6 + $0x2e0] sm:$0xff] }
  0x73   : > { %1041 = vmatpush1.msra.mxu0 %v470_v56  ;;  %4031 = vmatpush3.msra.mxu1 %v472_v55  ;;  %v1936_v55 = vld [vmem:[#allocation6 + $0x2d8] sm:$0xff]  ;;  %v1935_v56 = vld [vmem:[#allocation6 + $0x2d0] sm:$0xff] }
  0x74   : > { %925 = vmatprep.mubr.f32.mxu0 %v4261_v1  ;;  %1042 = vmatprep.subr.mxu0 %v468_v57  ;;  %v1934_v57 = vld [vmem:[#allocation6 + $0x2c8] sm:$0xff] }
  0x75   : > { %4032 = vmatprep.subr.mxu1 %v469_v58  ;;  %3759 = vmatmul.mubr.msk.f32.gmra.mxu0 %vm494_vm1, %v4488_v20  ;;  %v1373_v20 = vld [vmem:[#allocation4 + $0x158] sm:$0xf] }
  0x76   : > { %4033 = vmatpush3.msra.mxu1 %v469_v58  ;;  %1043 = vmatpush1.msra.mxu0 %v467_v59  ;;  %v1933_v58 = vld [vmem:[#allocation6 + $0x2c0] sm:$0xff]  ;;  %v1932_v59 = vld [vmem:[#allocation6 + $0x2b8] sm:$0xff] }
  0x77   : > { %4034 = vmatprep.subr.mxu1 %v466_v60  ;;  %1044 = vmatprep.subr.mxu0 %v465_v61  ;;  %v1930_v61 = vld [vmem:[#allocation6 + $0x2a8] sm:$0xff] }
  0x78   : > { %4035 = vmatpush3.msra.mxu1 %v466_v60  ;;  %1045 = vmatpush1.msra.mxu0 %v464_v62  ;;  %v1931_v60 = vld [vmem:[#allocation6 + $0x2b0] sm:$0xff]  ;;  %v1929_v62 = vld [vmem:[#allocation6 + $0x2a0] sm:$0xff] }
  0x79   : > { %4036 = vmatprep.subr.mxu1 %v463_v63  ;;  %1046 = vmatprep.subr.mxu0 %v462_v0  ;;  %v1927_v0 = vld [vmem:[#allocation6 + $0x290] sm:$0xff] }
  0x7a   : > { %1080 = vmatprep.mubr.f32.mxu0 %v4261_v1  ;;  %1047 = vmatpush1.msra.mxu0 %v461_v2  ;;  %v1926_v2 = vld [vmem:[#allocation6 + $0x288] sm:$0xff] }
  0x7b   : > { %4037 = vmatpush3.msra.mxu1 %v463_v63  ;;  %4038 = vmatprep.mubr.msk.f32.mxu1 %vm494_vm1, %v4543_v34  ;;  %v1928_v63 = vld [vmem:[#allocation6 + $0x298] sm:$0xff] }
  0x7c   : > { %3765 = vmatmul.mubr.msk.f32.vlgmr.msra.gmra.mxu0 %vm494_vm1, %v4543_v34  ;;  %4039 = vmatmul.mubr.msk.f32.vlgmr.msra.gmra.mxu1 %vm494_vm1, %v4547_v35  ;;  %v1360_v34 = vld [vmem:[#allocation4 + $0xf0] sm:$0xff] }
  0x7d   : > { %3785 = vmatprep.subr.msk.mxu0 %vm501_vm0, %v3783_v3  ;;  %4041 = vmatprep.subr.msk.mxu1 %vm501_vm0, %v3784_v4  ;;  %v1925_v3 = vld [vmem:[#allocation6 + $0x280] sm:$0xff] }
  0x7e   : > { %3786 = vmatpush1.msk.msra.mxu0 %vm501_vm0, %v3782_v5  ;;  %4042 = vmatpush3.msk.msra.mxu1 %vm501_vm0, %v3784_v4  ;;  %v1988_v4 = vld [vmem:[#allocation6 + $0x478] sm:$0xff]  ;;  %v1987_v5 = vld [vmem:[#allocation6 + $0x470] sm:$0xff] }
  0x7f   : > { %1225 = vmatprep.subr.mxu0 %v3780_v6  ;;  %4043 = vmatprep.subr.mxu1 %v3781_v7  ;;  %v1986_v6 = vld [vmem:[#allocation6 + $0x468] sm:$0xff] }
  0x80   : > { %1086 = vmatprep.mubr.f32.mxu0 %v4261_v1  ;;  %1226 = vmatpush1.msra.mxu0 %v3779_v8  ;;  %v1984_v8 = vld [vmem:[#allocation6 + $0x458] sm:$0xff] }
  0x81   : > { %4044 = vmatpush3.msra.mxu1 %v3781_v7  ;;  %3766 = vmatmul.mubr.msk.f32.gmra.mxu0 %vm494_vm1, %v4547_v35  ;;  %v1956_v35 = vld [vmem:[#allocation6 + $0x378] sm:$0xff]  ;;  %v1985_v7 = vld [vmem:[#allocation6 + $0x460] sm:$0xff] }
  0x82   : > { %1227 = vmatprep.subr.mxu0 %v3777_v9  ;;  %4045 = vmatprep.subr.mxu1 %v3778_v10  ;;  %v1983_v9 = vld [vmem:[#allocation6 + $0x450] sm:$0xff] }
  0x83   : > { %1228 = vmatpush1.msra.mxu0 %v3776_v11  ;;  %4046 = vmatpush3.msra.mxu1 %v3778_v10  ;;  %v1982_v10 = vld [vmem:[#allocation6 + $0x448] sm:$0xff]  ;;  %v1981_v11 = vld [vmem:[#allocation6 + $0x440] sm:$0xff] }
  0x84   : > { %1229 = vmatprep.subr.mxu0 %v3774_v12  ;;  %4047 = vmatprep.subr.mxu1 %v3775_v13  ;;  %v1980_v12 = vld [vmem:[#allocation6 + $0x438] sm:$0xff] }
  0x85   : > { %1230 = vmatpush1.msra.mxu0 %v3773_v14  ;;  %4048 = vmatpush3.msra.mxu1 %v3775_v13  ;;  %v1979_v13 = vld [vmem:[#allocation6 + $0x430] sm:$0xff]  ;;  %v1978_v14 = vld [vmem:[#allocation6 + $0x428] sm:$0xff] }
  0x86   : > { %1231 = vmatprep.subr.mxu0 %v3771_v15  ;;  %4049 = vmatprep.subr.mxu1 %v3772_v16  ;;  %v1977_v15 = vld [vmem:[#allocation6 + $0x420] sm:$0xff] }
  0x87   : > { %1232 = vmatpush1.msra.mxu0 %v3770_v17  ;;  %1265 = vmatprep.mubr.f32.mxu0 %v4261_v1  ;;  %v1975_v17 = vld [vmem:[#allocation6 + $0x410] sm:$0xff] }
  0x88   : > { %4050 = vmatpush3.msra.mxu1 %v3772_v16  ;;  %4051 = vmatprep.mubr.msk.f32.mxu1 %vm494_vm1, %v1168_v18  ;;  %v1976_v16 = vld [vmem:[#allocation6 + $0x418] sm:$0xff] }
  0x89   : > { %3787 = vmatmul.mubr.msk.f32.vlgmr.msra.gmra.mxu0 %vm494_vm1, %v1168_v18  ;;  %4052 = vmatmul.mubr.msk.f32.vlgmr.msra.gmra.mxu1 %vm494_vm1, %v1169_v19 }
  0x8a   : > { %3792 = vmatprep.subr.msk.mxu0 %vm501_vm0, %v1373_v20  ;;  %4054 = vmatprep.subr.msk.mxu1 %vm501_vm0, %v1374_v21  ;;  %v2004_v20 = vld [vmem:[#allocation6 + $0x4f8] sm:$0xff] }
  0x8b   : > { %3793 = vmatpush1.msk.msra.mxu0 %vm501_vm0, %v1372_v22  ;;  %4055 = vmatpush3.msk.msra.mxu1 %vm501_vm0, %v1374_v21  ;;  %v1972_v21 = vld [vmem:[#allocation6 + $0x3f8] sm:$0xff]  ;;  %v2003_v22 = vld [vmem:[#allocation6 + $0x4f0] sm:$0xff] }
  0x8c   : > { %1408 = vmatprep.subr.mxu0 %v1370_v23  ;;  %4056 = vmatprep.subr.mxu1 %v1371_v24  ;;  %v1971_v23 = vld [vmem:[#allocation6 + $0x3f0] sm:$0xff] }
  0x8d   : > { %1271 = vmatprep.mubr.f32.mxu0 %v4261_v1  ;;  %1409 = vmatpush1.msra.mxu0 %v1369_v25  ;;  %v1970_v25 = vld [vmem:[#allocation6 + $0x3e8] sm:$0xff] }
  0x8e   : > { %4057 = vmatpush3.msra.mxu1 %v1371_v24  ;;  %3788 = vmatmul.mubr.msk.f32.gmra.mxu0 %vm494_vm1, %v1169_v19  ;;  %v2002_v24 = vld [vmem:[#allocation6 + $0x4e8] sm:$0xff] }
  0x8f   : > { %1410 = vmatprep.subr.mxu0 %v1367_v26  ;;  %4058 = vmatprep.subr.mxu1 %v1368_v27  ;;  %v2001_v26 = vld [vmem:[#allocation6 + $0x4e0] sm:$0xff] }
  0x90   : > { %1411 = vmatpush1.msra.mxu0 %v1366_v28  ;;  %4059 = vmatpush3.msra.mxu1 %v1368_v27  ;;  %v1969_v27 = vld [vmem:[#allocation6 + $0x3e0] sm:$0xff]  ;;  %v2000_v28 = vld [vmem:[#allocation6 + $0x4d8] sm:$0xff] }
  0x91   : > { %1412 = vmatprep.subr.mxu0 %v1364_v29  ;;  %4060 = vmatprep.subr.mxu1 %v1365_v30  ;;  %v1968_v29 = vld [vmem:[#allocation6 + $0x3d8] sm:$0xff] }
  0x92   : > { %1413 = vmatpush1.msra.mxu0 %v1363_v31  ;;  %4061 = vmatpush3.msra.mxu1 %v1365_v30  ;;  %v1999_v30 = vld [vmem:[#allocation6 + $0x4d0] sm:$0xff] }
  0x93   : > { %1414 = vmatprep.subr.mxu0 %v1361_v32  ;;  %4062 = vmatprep.subr.mxu1 %v1362_v33  ;;  %v1967_v31 = vld [vmem:[#allocation6 + $0x3d0] sm:$0xff]  ;;  %v1998_v32 = vld [vmem:[#allocation6 + $0x4c8] sm:$0xff] }
  0x94   : > { %1415 = vmatpush1.msra.mxu0 %v1360_v34  ;;  %1448 = vmatprep.mubr.f32.mxu0 %v4261_v1  ;;  %v1997_v34 = vld [vmem:[#allocation6 + $0x4c0] sm:$0xff] }
  0x95   : > { %4063 = vmatpush3.msra.mxu1 %v1362_v33  ;;  %4064 = vmatprep.mubr.msk.f32.mxu1 %vm494_vm1, %v1168_v18  ;;  %v1966_v33 = vld [vmem:[#allocation6 + $0x3c8] sm:$0xff] }
  0x96   : > { %3794 = vmatmul.mubr.msk.f32.vlgmr.msra.gmra.mxu0 %vm494_vm1, %v1168_v18  ;;  %4065 = vmatmul.mubr.msk.f32.vlgmr.msra.gmra.mxu1 %vm494_vm1, %v1169_v19  ;;  %v1974_v18 = vld [vmem:[#allocation6 + $0x408] sm:$0xff] }
  0x97   : > { %1454 = vmatprep.mubr.f32.mxu0 %v4261_v1  ;;  %2160 = vmatprep.mubr.f32.mxu1 %v4261_v1 }
  0x98   : > { %2025 = vmatprep.subr.mxu0 %v1956_v35  ;;  %2112 = vmatprep.subr.mxu1 %v2004_v20  ;;  %v1965_v35 = vld [vmem:[#allocation6 + $0x3c0] sm:$0xff] }
  0x99   : > { %2026 = vmatpush1.msra.mxu0 %v1955_v36  ;;  %2113 = vmatpush1.msra.mxu1 %v2003_v22  ;;  %v1996_v36 = vld [vmem:[#allocation6 + $0x4b8] sm:$0xff] }
  0x9a   : > { %3795 = vmatmul.mubr.msk.f32.gmra.mxu0 %vm494_vm1, %v1169_v19  ;;  %2027 = vmatprep.subr.mxu0 %v1954_v37  ;;  %v1973_v19 = vld [vmem:[#allocation6 + $0x400] sm:$0xff]  ;;  %v1964_v37 = vld [vmem:[#allocation6 + $0x3b8] sm:$0xff] }
  0x9b   : > { %2028 = vmatpush1.msra.mxu0 %v1953_v38  ;;  %2114 = vmatprep.subr.mxu1 %v2002_v24  ;;  %v1995_v38 = vld [vmem:[#allocation6 + $0x4b0] sm:$0xff] }
  0x9c   : > { %2029 = vmatprep.subr.mxu0 %v1952_v39  ;;  %2115 = vmatpush1.msra.mxu1 %v2001_v26  ;;  %v1963_v39 = vld [vmem:[#allocation6 + $0x3b0] sm:$0xff]  ;;  %v4262_v26 = vmov 1966171168  }
  0x9d   : > { %2030 = vmatpush1.msra.mxu0 %v1951_v40  ;;  %2116 = vmatprep.subr.mxu1 %v2000_v28  ;;  %v1994_v40 = vld [vmem:[#allocation6 + $0x4a8] sm:$0xff] }
  0x9e   : > { %2031 = vmatprep.subr.mxu0 %v1950_v41  ;;  %2117 = vmatpush1.msra.mxu1 %v1999_v30  ;;  %v1962_v41 = vld [vmem:[#allocation6 + $0x3a8] sm:$0xff] }
  0x9f   : > { %2032 = vmatpush1.msra.mxu0 %v1949_v42  ;;  %2118 = vmatprep.subr.mxu1 %v1998_v32  ;;  %v1993_v42 = vld [vmem:[#allocation6 + $0x4a0] sm:$0xff] }
  0xa0   : > { %2033 = vmatprep.subr.mxu0 %v1948_v43  ;;  %2119 = vmatpush1.msra.mxu1 %v1997_v34  ;;  %v1961_v43 = vld [vmem:[#allocation6 + $0x3a0] sm:$0xff] }
  0xa1   : > { %2034 = vmatpush1.msra.mxu0 %v1947_v44  ;;  %2120 = vmatprep.subr.mxu1 %v1996_v36  ;;  %v1992_v44 = vld [vmem:[#allocation6 + $0x498] sm:$0xff] }
  0xa2   : > { %2035 = vmatprep.subr.mxu0 %v1946_v45  ;;  %2121 = vmatpush1.msra.mxu1 %v1995_v38  ;;  %v1960_v45 = vld [vmem:[#allocation6 + $0x398] sm:$0xff] }
  0xa3   : > { %2036 = vmatpush1.msra.mxu0 %v1945_v46  ;;  %2122 = vmatprep.subr.mxu1 %v1994_v40  ;;  %v1991_v46 = vld [vmem:[#allocation6 + $0x490] sm:$0xff] }
  0xa4   : > { %2037 = vmatprep.subr.mxu0 %v1944_v47  ;;  %2123 = vmatpush1.msra.mxu1 %v1993_v42  ;;  %v1959_v47 = vld [vmem:[#allocation6 + $0x390] sm:$0xff] }
  0xa5   : > { %2038 = vmatpush1.msra.mxu0 %v1943_v48  ;;  %v1990_v48 = vld [vmem:[#allocation6 + $0x488] sm:$0xff]  ;;  %2124 = vmatprep.subr.mxu1 %v1992_v44 }
  0xa6   : > { %2039 = vmatprep.subr.mxu0 %v1942_v49  ;;  %v1958_v49 = vld [vmem:[#allocation6 + $0x388] sm:$0xff]  ;;  %2125 = vmatpush1.msra.mxu1 %v1991_v46 }
  0xa7   : > { %2040 = vmatpush1.msra.mxu0 %v1941_v50  ;;  %v1989_v50 = vld [vmem:[#allocation6 + $0x480] sm:$0xff]  ;;  %2126 = vmatprep.subr.mxu1 %v1990_v48 }
  0xa8   : > { %2041 = vmatprep.subr.mxu0 %v1940_v51  ;;  %v1957_v51 = vld [vmem:[#allocation6 + $0x380] sm:$0xff]  ;;  %2127 = vmatpush1.msra.mxu1 %v1989_v50 }
  0xa9   : > { %2042 = vmatpush1.msra.mxu0 %v1939_v52  ;;  %v1789_v52 = vld [vmem:[#allocation6 + $0xf8] sm:$0xff] }
  0xaa   : > { %2043 = vmatprep.subr.mxu0 %v1938_v53  ;;  %2170 = vmatprep.subr.mxu1 %v1789_v52  ;;  %v1837_v53 = vld [vmem:[#allocation6 + $0x278] sm:$0xff] }
  0xab   : > { %2044 = vmatpush1.msra.mxu0 %v1937_v54 }
  0xac   : > { %2045 = vmatprep.subr.mxu0 %v1936_v55 }
  0xad   : > { %2046 = vmatpush1.msra.mxu0 %v1935_v56 }
  0xae   : > { %2047 = vmatprep.subr.mxu0 %v1934_v57 }
  0xaf   : > { %2048 = vmatpush1.msra.mxu0 %v1933_v58 }
  0xb0   : > { %2049 = vmatprep.subr.mxu0 %v1932_v59 }
  0xb1   : > { %2050 = vmatpush1.msra.mxu0 %v1931_v60 }
  0xb2   : > { %2051 = vmatprep.subr.mxu0 %v1930_v61 }
  0xb3   : > { %2052 = vmatpush1.msra.mxu0 %v1929_v62 }
  0xb4   : > { %2053 = vmatprep.subr.mxu0 %v1928_v63 }
  0xb5   : > { %2054 = vmatpush1.msra.mxu0 %v1927_v0 }
  0xb6   : > { %2055 = vmatprep.subr.mxu0 %v1926_v2 }
  0xb7   : > { %2056 = vmatpush1.msra.mxu0 %v1925_v3 }
  0xb8   : > { %2057 = vmatprep.subr.mxu0 %v1988_v4 }
  0xb9   : > { %2058 = vmatpush2.msra.mxu0 %v1987_v5 }
  0xba   : > { %2059 = vmatprep.subr.mxu0 %v1986_v6 }
  0xbb   : > { %2060 = vmatpush2.msra.mxu0 %v1985_v7 }
  0xbc   : > { %2061 = vmatprep.subr.mxu0 %v1984_v8 }
  0xbd   : > { %2062 = vmatpush2.msra.mxu0 %v1983_v9 }
  0xbe   : > { %2063 = vmatprep.subr.mxu0 %v1982_v10 }
  0xbf   : > { %2064 = vmatpush2.msra.mxu0 %v1981_v11 }
  0xc0   : > { %2065 = vmatprep.subr.mxu0 %v1980_v12  ;;  %v1544_v12 = vlaneseq }
  0xc1   : > { %2066 = vmatpush2.msra.mxu0 %v1979_v13 }
  0xc2   : > { %2067 = vmatprep.subr.mxu0 %v1978_v14  ;;  %vm4675_vm4 = vcmp.lt.s32.totalorder %v1544_v12, 320 }
  0xc3   : > { %2068 = vmatpush2.msra.mxu0 %v1977_v15 }
  0xc4   : > { %2069 = vmatprep.subr.mxu0 %v1976_v16  ;;  %v4658_v16 = vshrl.u32 %v1544_v12, 7 }
  0xc5   : > { %2070 = vmatpush2.msra.mxu0 %v1975_v17 }
  0xc6   : > { %2071 = vmatprep.subr.mxu0 %v1974_v18  ;;  %v1554_v20 = vsub.s32 2, %v4658_v16 }
  0xc7   : > { %2072 = vmatpush2.msra.mxu0 %v1973_v19  ;;  %v1546_v19 = vsub.s32 0, %v4658_v16 }
  0xc8   : > { %2073 = vmatprep.subr.mxu0 %v1972_v21  ;;  %v1550_v21 = vsub.s32 1, %v4658_v16 }
  0xc9   : > { %2074 = vmatpush2.msra.mxu0 %v1971_v23  ;;  %v1542_v23 = vld [vmem:[%s4777_s3] sm:$0x7] }
  0xca   : > { %2075 = vmatprep.subr.mxu0 %v1970_v25  ;;  %v1555_v30 = vrot.slane %v1542_v23, %v1554_v20 }
  0xcb   : > { %2076 = vmatpush2.msra.mxu0 %v1969_v27  ;;  %v4666_v27 = vunpack.c.l.s4 %v4262_v26 }
  0xcc   : > { %2077 = vmatprep.subr.mxu0 %v1968_v29  ;;  %v1547_v29 = vrot.slane %v1542_v23, %v1546_v19 }
  0xcd   : > { %2078 = vmatpush2.msra.mxu0 %v1967_v31  ;;  %v1551_v31 = vrot.slane %v1542_v23, %v1550_v21  ;;  %v1609_v26 = vunpack.c.0.s8 %v4666_v27 }
  0xce   : > { %2079 = vmatprep.subr.mxu0 %v1966_v33 }
  0xcf   : > { %2080 = vmatpush2.msra.mxu0 %v1965_v35 }
  0xd0   : > { %2081 = vmatprep.subr.mxu0 %v1964_v37 }
  0xd1   : > { %2082 = vmatpush2.msra.mxu0 %v1963_v39 }
  0xd2   : > { %2083 = vmatprep.subr.mxu0 %v1962_v41 }
  0xd3   : > { %2084 = vmatpush2.msra.mxu0 %v1961_v43 }
  0xd4   : > { %2085 = vmatprep.subr.mxu0 %v1960_v45 }
  0xd5   : > { %2086 = vmatpush2.msra.mxu0 %v1959_v47 }
  0xd6   : > { %2087 = vmatprep.subr.mxu0 %v1958_v49 }
  0xd7   : > { %2088 = vmatpush2.msra.mxu0 %v1957_v51 }
  0xd8   : > { %2257 = vmatprep.subr.mxu0 %v1837_v53 }
 0x115   : > { %v577_v54 = vpop.f32.mrf.mxu0 }
 0x116   : > { %v4001_v3 = vpop.f32.mrf.mxu1 }
 0x117   : > { %v579_v55 = vpop.f32.mrf.mxu0 }
 0x118   : > { %v654_v5 = vpop.f32.mrf.mxu1 }
 0x11b   : > { %v583_v56 = vpop.f32.mrf.mxu0 }
 0x11d   : > { %v585_v57 = vpop.f32.mrf.mxu0 }
 0x122   : > { %v744_v58 = vpop.f32.mrf.mxu0  ;;  %v4014_v6 = vpop.f32.mrf.mxu1 }
 0x123   : > { %v745_v25 = vadd.f32 %v744_v58, %v577_v54  ;;  %v827_v28 = vadd.f32 %v4014_v6, %v4001_v3 }
 0x124   : > { %v746_v59 = vpop.f32.mrf.mxu0  ;;  %v821_v8 = vpop.f32.mrf.mxu1 }
 0x125   : > { %v747_v33 = vadd.f32 %v746_v59, %v579_v55  ;;  %v822_v34 = vadd.f32 %v821_v8, %v654_v5 }
 0x127   : > { %v750_v60 = vpop.f32.mrf.mxu0 }
 0x128   : > { %v751_v38 = vadd.f32 %v750_v60, %v583_v56 }
 0x129   : > { %v752_v61 = vpop.f32.mrf.mxu0 }
 0x12a   : > { %v753_v39 = vadd.f32 %v752_v61, %v585_v57 }
 0x12e   : > { %v921_v62 = vpop.f32.mrf.mxu0 }
 0x130   : > { %v923_v63 = vpop.f32.mrf.mxu0  ;;  %v4027_v10 = vpop.f32.mrf.mxu1 }
 0x132   : > { %v998_v13 = vpop.f32.mrf.mxu1 }
 0x135   : > { %v927_v0 = vpop.f32.mrf.mxu0 }
 0x137   : > { %v929_v2 = vpop.f32.mrf.mxu0 }
 0x13c   : > { %v1082_v4 = vpop.f32.mrf.mxu0  ;;  %v4040_v15 = vpop.f32.mrf.mxu1 }
 0x13d   : > { %v1083_v35 = vadd.f32 %v1082_v4, %v921_v62  ;;  %v1165_v40 = vadd.f32 %v4040_v15, %v4027_v10 }
 0x13e   : > { %v1084_v7 = vpop.f32.mrf.mxu0  ;;  %v1159_v18 = vpop.f32.mrf.mxu1 }
 0x13f   : > { %v1085_v43 = vadd.f32 %v1084_v7, %v923_v63  ;;  %v1160_v44 = vadd.f32 %v1159_v18, %v998_v13 }
 0x141   : > { %v1088_v9 = vpop.f32.mrf.mxu0 }
 0x142   : > { %v1089_v48 = vadd.f32 %v1088_v9, %v927_v0 }
 0x143   : > { %v1090_v11 = vpop.f32.mrf.mxu0 }
 0x144   : > { %v1091_v53 = vadd.f32 %v1090_v11, %v929_v2 }
 0x149   : > { %v1267_v14 = vpop.f32.mrf.mxu0  ;;  %v4053_v24 = vpop.f32.mrf.mxu1 }
 0x14a   : > { %v1353_v36 = vadd.f32 %v1267_v14, %v745_v25  ;;  %v1358_v41 = vadd.f32 %v4053_v24, %v827_v28 }
 0x14b   : > { %v1269_v17 = vpop.f32.mrf.mxu0  ;;  %v1344_v37 = vpop.f32.mrf.mxu1 }
 0x14c   : > { %v1354_v45 = vadd.f32 %v1269_v17, %v747_v33  ;;  %v1355_v49 = vadd.f32 %v1344_v37, %v822_v34  ;;  %v1559_v54 = vadd.f32 %v1547_v29, %v1353_v36  ;;  %v1564_v56 = vadd.f32 %v1555_v30, %v1358_v41 }
 0x14e   : > { %v1273_v22 = vpop.f32.mrf.mxu0  ;;  %v1560_v63 = vadd.f32 %v1551_v31, %v1354_v45  ;;  %v1561_v6 = vadd.f32 %v1555_v30, %v1355_v49 }
 0x14f   : > { %v1356_v50 = vadd.f32 %v1273_v22, %v751_v38 }
 0x150   : > { %v1275_v32 = vpop.f32.mrf.mxu0 }
 0x151   : > { %v1357_v57 = vadd.f32 %v1275_v32, %v753_v39  ;;  %v1562_v0 = vadd.f32 %v1547_v29, %v1356_v50  ;;  %v1612_v39 = vsub.s32 %v1609_v26, %v4658_v16  ;;  %v1786_v26 = vld [vmem:[#allocation6 + $0xe0] sm:$0xff] }
 0x153   : > { %v1563_v14 = vadd.f32 %v1551_v31, %v1357_v57 }
 0x156   : > { %v1450_v42 = vpop.f32.mrf.mxu0  ;;  %v4066_v47 = vpop.f32.mrf.mxu1 }
 0x157   : > { %v1536_v46 = vadd.f32 %v1450_v42, %v1083_v35  ;;  %v1541_v51 = vadd.f32 %v4066_v47, %v1165_v40 }
 0x158   : > { %v1452_v52 = vpop.f32.mrf.mxu0  ;;  %v1527_v59 = vpop.f32.mrf.mxu1 }
 0x159   : > { %v1565_v55 = vadd.f32 %v1547_v29, %v1536_v46  ;;  %v1537_v58 = vadd.f32 %v1452_v52, %v1085_v43  ;;  %v1570_v60 = vadd.f32 %v1555_v30, %v1541_v51  ;;  %v1538_v61 = vadd.f32 %v1527_v59, %v1160_v44  ;;  %v1823_v52 = vld [vmem:[#allocation6 + $0x208] sm:$0xff] }
 0x15a   : > { %v1456_v62 = vpop.f32.mrf.mxu0 }
 0x15b   : > { %v1571_v3 = vmax.f32 %v1559_v54, %v1565_v55  ;;  %v1566_v4 = vadd.f32 %v1551_v31, %v1537_v58  ;;  %v1539_v5 = vadd.f32 %v1456_v62, %v1089_v48  ;;  %v1576_v7 = vmax.f32 %v1564_v56, %v1570_v60 }
 0x15c   : > { %v1567_v8 = vadd.f32 %v1555_v30, %v1538_v61  ;;  %v1458_v9 = vpop.f32.mrf.mxu0 }
 0x15d   : > { %v1577_v10 = vmax.f32 %v1571_v3, 0.0  ;;  %v1572_v2 = vmax.f32 %v1560_v63, %v1566_v4  ;;  %v1568_v11 = vadd.f32 %v1547_v29, %v1539_v5  ;;  %v1540_v13 = vadd.f32 %v1458_v9, %v1091_v53 }
 0x15e   : > { %v1582_v15 = vmax.f32 %v1576_v7, 0.0  ;;  %v1573_v17 = vmax.f32 %v1561_v6, %v1567_v8 }
 0x15f   : > { %v1594_v18 = vrot.slane %v1577_v10, 1  ;;  %v1578_v20 = vmax.f32 %v1572_v2, 0.0  ;;  %v1574_v22 = vmax.f32 %v1562_v0, %v1568_v11  ;;  %v1569_v23 = vadd.f32 %v1551_v31, %v1540_v13 }
 0x160   : > { %v1680_v24 = vrot.slane %v1582_v15, 1  ;;  %v1579_v25 = vmax.f32 %v1573_v17, 0.0  ;;  %v1788_v17 = vld [vmem:[#allocation6 + $0xf0] sm:$0xff] }
 0x161   : > { %v1595_v28 = vrot.slane %v1578_v20, 1  ;;  %v1580_v32 = vmax.f32 %v1574_v22, 0.0  ;;  %v1575_v33 = vmax.f32 %v1563_v14, %v1569_v23  ;;  %v1600_v35 = vmax.f32 %v1577_v10, %v1594_v18  ;;  %v1787_v23 = vld [vmem:[#allocation6 + $0xe8] sm:$0xff] }
 0x162   : > { %v1686_v30 = vmax.f32 %v1582_v15, %v1680_v24  ;;  %v1596_v34 = vrot.slane %v1579_v25, 1 }
 0x163   : > { %v1601_v36 = vmax.f32 %v1578_v20, %v1595_v28  ;;  %v1678_v29 = vrot.slane %v1580_v32, 1  ;;  %v1581_v37 = vmax.f32 %v1575_v33, 0.0  ;;  %v1785_v33 = vld [vmem:[#allocation6 + $0xd8] sm:$0xff] }
 0x164   : > { %v1602_v38 = vmax.f32 %v1579_v25, %v1596_v34  ;;  %v1723_v31 = vcombine.high %v1686_v30, %v1686_v30  ;;  %v1704_v53 = vrot.slane %v1686_v30, %v1612_v39  ;;  %v1836_v25 = vld [vmem:[#allocation6 + $0x270] sm:$0xff]  ;;  %v1834_v30 = vld [vmem:[#allocation6 + $0x260] sm:$0xff] }
 0x165   : > { %v1606_v40 = vcombine.low %v1600_v35, %v1601_v36  ;;  %v1642_v41 = vcombine.high %v1600_v35, %v1601_v36  ;;  %v1679_v42 = vrot.slane %v1581_v37, 1  ;;  %v1684_v44 = vmax.f32 %v1580_v32, %v1678_v29  ;;  %v1835_v32 = vld [vmem:[#allocation6 + $0x268] sm:$0xff]  ;;  %v1784_v34 = vld [vmem:[#allocation6 + $0xd0] sm:$0xff]  ;;  %v1833_v35 = vld [vmem:[#allocation6 + $0x258] sm:$0xff] }
 0x166   : > { %v1643_v43 = vcombine.high %v1602_v38, %v1602_v38  ;;  %v1620_v46 = vrot.slane %v1602_v38, %v1612_v39  ;;  %v1737_v55 = vrot.slane %v1723_v31, %v1612_v39  ;;  %v1783_v36 = vld [vmem:[#allocation6 + $0xc8] sm:$0xff]  ;;  %v1832_v29 = vld [vmem:[#allocation6 + $0x250] sm:$0xff] }
 0x167   : > { %v1613_v45 = vrot.slane %v1606_v40, %v1612_v39  ;;  %v1650_v27 = vrot.slane %v1642_v41, %v1612_v39  ;;  %v1685_v47 = vmax.f32 %v1581_v37, %v1679_v42  ;;  %v1782_v37 = vld [vmem:[#allocation6 + $0xc0] sm:$0xff]  ;;  %v1831_v38 = vld [vmem:[#allocation6 + $0x248] sm:$0xff]  ;;  %v1780_v41 = vld [vmem:[#allocation6 + $0xb0] sm:$0xff] }
 0x168   : > { %v1657_v48 = vrot.slane %v1643_v43, %v1612_v39  ;;  %v1830_v40 = vld [vmem:[#allocation6 + $0x240] sm:$0xff]  ;;  %v1829_v42 = vld [vmem:[#allocation6 + $0x238] sm:$0xff]  ;;  %v1779_v31 = vld [vmem:[#allocation6 + $0xa8] sm:$0xff] }
 0x169   : > { %v1621_v49 = vcombine.low %v1613_v45, %v1620_v46  ;;  %v1690_v50 = vcombine.low %v1684_v44, %v1685_v47  ;;  %v1722_v51 = vcombine.high %v1684_v44, %v1685_v47  ;;  %v1828_v43 = vld [vmem:[#allocation6 + $0x230] sm:$0xff]  ;;  %v1778_v44 = vld [vmem:[#allocation6 + $0xa0] sm:$0xff]  ;;  %v1827_v45 = vld [vmem:[#allocation6 + $0x228] sm:$0xff] }
 0x16a   : > { %v1658_v54 = vcombine.low %v1650_v27, %v1657_v48  ;;  %v1777_v27 = vld [vmem:[#allocation6 + $0x98] sm:$0xff]  ;;  %v1826_v46 = vld [vmem:[#allocation6 + $0x220] sm:$0xff]  ;;  %v1776_v47 = vld [vmem:[#allocation6 + $0x90] sm:$0xff] }
 0x16b   : > { %v1628_v58 = vrot.slane %v1621_v49, %v1612_v39  ;;  %v1697_v59 = vrot.slane %v1690_v50, %v1612_v39  ;;  %v1730_v56 = vrot.slane %v1722_v51, %v1612_v39  ;;  %v1825_v48 = vld [vmem:[#allocation6 + $0x218] sm:$0xff]  ;;  %v1775_v49 = vld [vmem:[#allocation6 + $0x88] sm:$0xff]  ;;  %v1824_v50 = vld [vmem:[#allocation6 + $0x210] sm:$0xff] }
 0x16c   : > { %v1665_v57 = vrot.slane %v1658_v54, %v1612_v39  ;;  %v1774_v51 = vld [vmem:[#allocation6 + $0x80] sm:$0xff] }
 0x16d   : > { %1635 = vst.msk [vmem:[#allocation2 + $0x1] ss:$8 sm:$0x7] %vm4675_vm4, %v1628_v58  ;;  %v1637_v60 = vcombine.high %v1628_v58, %v1628_v58  ;;  %v1705_v61 = vcombine.low %v1697_v59, %v1704_v53  ;;  %v1738_v62 = vcombine.low %v1730_v56, %v1737_v55  ;;  %v1773_v53 = vld [vmem:[#allocation6 + $0x78] sm:$0xff]  ;;  %v1822_v54 = vld [vmem:[#allocation6 + $0x200] sm:$0xff]  ;;  %v1772_v55 = vld [vmem:[#allocation6 + $0x70] sm:$0xff] }
 0x16e   : > { %1668 = vst.msk [vmem:[#allocation2 + $0x3] ss:$8 sm:$0x7] %vm4675_vm4, %v1665_v57  ;;  %v1670_v12 = vcombine.high %v1665_v57, %v1665_v57  ;;  %v2344_v58 = vld [vmem:[#allocation8 + $0x378] sm:$0xff]  ;;  %v1771_v59 = vld [vmem:[#allocation6 + $0x68] sm:$0xff]  ;;  %v2343_v57 = vld [vmem:[#allocation8 + $0x370] sm:$0xff] }
 0x16f   : > { %1640 = vst.msk [vmem:[#allocation2 + $0x2] ss:$8 sm:$0x7] %vm4675_vm4, %v1637_v60  ;;  %v1712_v63 = vrot.slane %v1705_v61, %v1612_v39  ;;  %v1745_v3 = vrot.slane %v1738_v62, %v1612_v39  ;;  %v1781_v39 = vld [vmem:[#allocation6 + $0xb8] sm:$0xff]  ;;  %v1770_v60 = vld [vmem:[#allocation6 + $0x60] sm:$0xff]  ;;  %v2342_v61 = vld [vmem:[#allocation8 + $0x368] sm:$0xff] }
 0x170   : > { %1673 = vst.msk [vmem:[#allocation2 + $0x4] ss:$8 sm:$0x7] %vm4675_vm4, %v1670_v12  ;;  %v1769_v62 = vld [vmem:[#allocation6 + $0x58] sm:$0xff]  ;;  %v2341_v12 = vld [vmem:[#allocation8 + $0x360] sm:$0xff] }
 0x171   : > { %1715 = vst.msk [vmem:[#allocation2 + $0x5] ss:$8 sm:$0x7] %vm4675_vm4, %v1712_v63  ;;  %v1717_v4 = vcombine.high %v1712_v63, %v1712_v63  ;;  %1748 = vst.msk [vmem:[#allocation2 + $0x7] ss:$8 sm:$0x7] %vm4675_vm4, %v1745_v3  ;;  %v1750_v5 = vcombine.high %v1745_v3, %v1745_v3 }
 0x172   : > { %v1768_v63 = vld [vmem:[#allocation6 + $0x50] sm:$0xff]  ;;  %v2340_v3 = vld [vmem:[#allocation8 + $0x358] sm:$0xff] }
 0x173   : > { %1720 = vst.msk [vmem:[#allocation2 + $0x6] ss:$8 sm:$0x7] %vm4675_vm4, %v1717_v4  ;;  %1753 = vst.msk [vmem:[#allocation2 + $0x18] ss:$8 sm:$0x7] %vm4675_vm4, %v1750_v5 }
 0x174   : > { %v1767_v4 = vld [vmem:[#allocation6 + $0x48] sm:$0xff]  ;;  %v2339_v5 = vld [vmem:[#allocation8 + $0x350] sm:$0xff] }
 0x17a   : > { %v1919_v6 = vld [vmem:[#allocation2 + $0x8] sm:$0xfe]  ;;  %v1922_v0 = vld [vmem:[#allocation2 + $0x20] sm:$0x1]  ;;  %v1920_v7 = vld [vmem:[#allocation2 + $0x10] sm:$0xfe] }
 0x17b   : > { %v2015_v8 = vrot.slane %v1919_v6, 1  ;;  %v2016_v9 = vrot.slane %v1922_v0, 1  ;;  %v1923_v10 = vld [vmem:[#allocation2 + $0x28] sm:$0x1]  ;;  %v2018_v2 = vrot.slane %v1920_v7, 1  ;;  %v4712_v56 = vld [vmem:[#allocation2 + $0x10] sm:$0xff] }
 0x17c   : > { %v2019_v11 = vrot.slane %v1923_v10, 1  ;;  %v1918_v13 = vld [vmem:[#allocation2] sm:$0xfe]  ;;  %v1921_v14 = vld [vmem:[#allocation2 + $0x18] sm:$0x1]  ;;  %v4708_v28 = vld [vmem:[#allocation2 + $0x8] sm:$0xff] }
 0x17d   : > { %v4696_v15 = vsel %vm2011_vm5, %v2015_v8, %v2016_v9  ;;  %v2012_v18 = vrot.slane %v1918_v13, 1  ;;  %v2013_v20 = vrot.slane %v1921_v14, 1  ;;  %v1766_v6 = vld [vmem:[#allocation6 + $0x40] sm:$0xff]  ;;  %v2338_v0 = vld [vmem:[#allocation8 + $0x348] sm:$0xff]  ;;  %v1765_v7 = vld [vmem:[#allocation6 + $0x38] sm:$0xff] }
 0x17e   : > { %2089 = vmatprep.mubr.f32.mxu0 %v4696_v15  ;;  %v4700_v22 = vsel %vm2011_vm5, %v2018_v2, %v2019_v11  ;;  %v2337_v8 = vld [vmem:[#allocation8 + $0x340] sm:$0xff]  ;;  %v1764_v9 = vld [vmem:[#allocation6 + $0x30] sm:$0xff]  ;;  %v2336_v10 = vld [vmem:[#allocation8 + $0x338] sm:$0xff] }
 0x17f   : > { %3799 = vmatmul.mubr.msk.f32.vlgmr.msra.gmra.mxu1 %vm1585_vm2, %v4700_v22  ;;  %v4705_v24 = vsel %vm2011_vm5, %v2012_v18, %v2013_v20  ;;  %v1763_v2 = vld [vmem:[#allocation6 + $0x28] sm:$0xff]  ;;  %v2335_v11 = vld [vmem:[#allocation8 + $0x330] sm:$0xff]  ;;  %v1762_v13 = vld [vmem:[#allocation6 + $0x20] sm:$0xff] }
 0x180   : > { %2171 = vmatpush1.msra.mxu1 %v1788_v17  ;;  %2090 = vmatmul.mubr.f32.vlgmr.msra.gmra.mxu0 %v4705_v24  ;;  %v2334_v14 = vld [vmem:[#allocation8 + $0x328] sm:$0xff]  ;;  %v2333_v17 = vld [vmem:[#allocation8 + $0x320] sm:$0xff]  ;;  %v1760_v18 = vld [vmem:[#allocation6 + $0x10] sm:$0xff] }
 0x181   : > { %2172 = vmatprep.subr.mxu1 %v1787_v23  ;;  %2234 = vmatprep.mubr.f32.mxu1 %v4708_v28  ;;  %v2332_v20 = vld [vmem:[#allocation8 + $0x318] sm:$0xff]  ;;  %v1759_v23 = vld [vmem:[#allocation6 + $0x8] sm:$0xff] }
 0x182   : > { %2258 = vmatpush1.msra.mxu0 %v1836_v25  ;;  %2173 = vmatpush1.msra.mxu1 %v1786_v26  ;;  %v2331_v25 = vld [vmem:[#allocation8 + $0x310] sm:$0xff]  ;;  %v1758_v26 = vld [vmem:[#allocation6] sm:$0xff] }
 0x183   : > { %2259 = vmatprep.subr.mxu0 %v1835_v32  ;;  %2174 = vmatprep.subr.mxu1 %v1785_v33  ;;  %v2330_v32 = vld [vmem:[#allocation8 + $0x308] sm:$0xff]  ;;  %v1821_v33 = vld [vmem:[#allocation6 + $0x1f8] sm:$0xff] }
 0x184   : > { %2260 = vmatpush1.msra.mxu0 %v1834_v30  ;;  %2175 = vmatpush1.msra.mxu1 %v1784_v34  ;;  %v2329_v30 = vld [vmem:[#allocation8 + $0x300] sm:$0xff]  ;;  %v1820_v34 = vld [vmem:[#allocation6 + $0x1f0] sm:$0xff] }
 0x185   : > { %2261 = vmatprep.subr.mxu0 %v1833_v35  ;;  %2176 = vmatprep.subr.mxu1 %v1783_v36  ;;  %v2328_v35 = vld [vmem:[#allocation8 + $0x2f8] sm:$0xff]  ;;  %v1819_v36 = vld [vmem:[#allocation6 + $0x1e8] sm:$0xff] }
 0x186   : > { %2262 = vmatpush1.msra.mxu0 %v1832_v29  ;;  %2177 = vmatpush1.msra.mxu1 %v1782_v37  ;;  %v2327_v29 = vld [vmem:[#allocation8 + $0x2f0] sm:$0xff]  ;;  %v1818_v37 = vld [vmem:[#allocation6 + $0x1e0] sm:$0xff] }
 0x187   : > { %2263 = vmatprep.subr.mxu0 %v1831_v38  ;;  %2178 = vmatprep.subr.mxu1 %v1781_v39  ;;  %v2326_v38 = vld [vmem:[#allocation8 + $0x2e8] sm:$0xff]  ;;  %v1817_v39 = vld [vmem:[#allocation6 + $0x1d8] sm:$0xff] }
 0x188   : > { %2264 = vmatpush1.msra.mxu0 %v1830_v40  ;;  %2179 = vmatpush1.msra.mxu1 %v1780_v41  ;;  %v2325_v40 = vld [vmem:[#allocation8 + $0x2e0] sm:$0xff]  ;;  %v1816_v41 = vld [vmem:[#allocation6 + $0x1d0] sm:$0xff] }
 0x189   : > { %2265 = vmatprep.subr.mxu0 %v1829_v42  ;;  %2180 = vmatprep.subr.mxu1 %v1779_v31  ;;  %v2324_v42 = vld [vmem:[#allocation8 + $0x2d8] sm:$0xff]  ;;  %v1815_v31 = vld [vmem:[#allocation6 + $0x1c8] sm:$0xff] }
 0x18a   : > { %2266 = vmatpush1.msra.mxu0 %v1828_v43  ;;  %2181 = vmatpush1.msra.mxu1 %v1778_v44  ;;  %v2323_v43 = vld [vmem:[#allocation8 + $0x2d0] sm:$0xff]  ;;  %v1814_v44 = vld [vmem:[#allocation6 + $0x1c0] sm:$0xff] }
 0x18b   : > { %2267 = vmatprep.subr.mxu0 %v1827_v45  ;;  %2182 = vmatprep.subr.mxu1 %v1777_v27  ;;  %v2322_v45 = vld [vmem:[#allocation8 + $0x2c8] sm:$0xff]  ;;  %v1813_v27 = vld [vmem:[#allocation6 + $0x1b8] sm:$0xff] }
 0x18c   : > { %2268 = vmatpush1.msra.mxu0 %v1826_v46  ;;  %2183 = vmatpush1.msra.mxu1 %v1776_v47  ;;  %v2321_v46 = vld [vmem:[#allocation8 + $0x2c0] sm:$0xff]  ;;  %v1812_v47 = vld [vmem:[#allocation6 + $0x1b0] sm:$0xff] }
 0x18d   : > { %2269 = vmatprep.subr.mxu0 %v1825_v48  ;;  %2184 = vmatprep.subr.mxu1 %v1775_v49  ;;  %v2320_v48 = vld [vmem:[#allocation8 + $0x2b8] sm:$0xff]  ;;  %v1811_v49 = vld [vmem:[#allocation6 + $0x1a8] sm:$0xff] }
 0x18e   : > { %2270 = vmatpush1.msra.mxu0 %v1824_v50  ;;  %2185 = vmatpush1.msra.mxu1 %v1774_v51  ;;  %v2319_v50 = vld [vmem:[#allocation8 + $0x2b0] sm:$0xff]  ;;  %v1810_v51 = vld [vmem:[#allocation6 + $0x1a0] sm:$0xff] }
 0x18f   : > { %2271 = vmatprep.subr.mxu0 %v1823_v52  ;;  %2186 = vmatprep.subr.mxu1 %v1773_v53  ;;  %v2318_v52 = vld [vmem:[#allocation8 + $0x2a8] sm:$0xff]  ;;  %v1809_v53 = vld [vmem:[#allocation6 + $0x198] sm:$0xff] }
 0x190   : > { %2272 = vmatpush1.msra.mxu0 %v1822_v54  ;;  %2305 = vmatprep.mubr.f32.mxu0 %v4261_v1  ;;  %v2317_v54 = vld [vmem:[#allocation8 + $0x2a0] sm:$0xff] }
 0x191   : > { %2187 = vmatpush1.msra.mxu1 %v1772_v55  ;;  %3800 = vmatmul.mubr.msk.f32.vlgmr.msra.gmra.mxu0 %vm1585_vm2, %v4712_v56  ;;  %v1808_v55 = vld [vmem:[#allocation6 + $0x190] sm:$0xff] }
 0x192   : > { %2393 = vmatprep.subr.mxu0 %v2344_v58  ;;  %2188 = vmatprep.subr.mxu1 %v1771_v59  ;;  %v2316_v58 = vld [vmem:[#allocation8 + $0x298] sm:$0xff]  ;;  %v1807_v59 = vld [vmem:[#allocation6 + $0x188] sm:$0xff] }
 0x193   : > { %2394 = vmatpush1.msra.mxu0 %v2343_v57  ;;  %2457 = vmatprep.mubr.f32.mxu0 %v4696_v15  ;;  %v1761_v15 = vld [vmem:[#allocation6 + $0x18] sm:$0xff]  ;;  %v2315_v57 = vld [vmem:[#allocation8 + $0x290] sm:$0xff] }
 0x194   : > { %2189 = vmatpush1.msra.mxu1 %v1770_v60  ;;  %2395 = vmatprep.subr.mxu0 %v2342_v61  ;;  %v1806_v60 = vld [vmem:[#allocation6 + $0x180] sm:$0xff]  ;;  %v2314_v61 = vld [vmem:[#allocation8 + $0x288] sm:$0xff] }
 0x195   : > { %2190 = vmatprep.subr.mxu1 %v1769_v62  ;;  %2396 = vmatpush1.msra.mxu0 %v2341_v12  ;;  %v1805_v62 = vld [vmem:[#allocation6 + $0x178] sm:$0xff]  ;;  %v2313_v12 = vld [vmem:[#allocation8 + $0x280] sm:$0xff] }
 0x196   : > { %2191 = vmatpush1.msra.mxu1 %v1768_v63  ;;  %2397 = vmatprep.subr.mxu0 %v2340_v3  ;;  %v1804_v63 = vld [vmem:[#allocation6 + $0x170] sm:$0xff]  ;;  %v2376_v3 = vld [vmem:[#allocation8 + $0x478] sm:$0xff] }
 0x197   : > { %2192 = vmatprep.subr.mxu1 %v1767_v4  ;;  %2398 = vmatpush1.msra.mxu0 %v2339_v5  ;;  %v1803_v4 = vld [vmem:[#allocation6 + $0x168] sm:$0xff]  ;;  %v2375_v5 = vld [vmem:[#allocation8 + $0x470] sm:$0xff] }
 0x198   : > { %2193 = vmatpush1.msra.mxu1 %v1766_v6  ;;  %2399 = vmatprep.subr.mxu0 %v2338_v0  ;;  %v1802_v6 = vld [vmem:[#allocation6 + $0x160] sm:$0xff]  ;;  %v2374_v0 = vld [vmem:[#allocation8 + $0x468] sm:$0xff] }
 0x199   : > { %2194 = vmatprep.subr.mxu1 %v1765_v7  ;;  %2400 = vmatpush1.msra.mxu0 %v2337_v8  ;;  %v1801_v7 = vld [vmem:[#allocation6 + $0x158] sm:$0xff]  ;;  %v2373_v8 = vld [vmem:[#allocation8 + $0x460] sm:$0xff] }
 0x19a   : > { %2195 = vmatpush1.msra.mxu1 %v1764_v9  ;;  %2401 = vmatprep.subr.mxu0 %v2336_v10  ;;  %v1800_v9 = vld [vmem:[#allocation6 + $0x150] sm:$0xff]  ;;  %v2372_v10 = vld [vmem:[#allocation8 + $0x458] sm:$0xff] }
 0x19b   : > { %2196 = vmatprep.subr.mxu1 %v1763_v2  ;;  %2402 = vmatpush1.msra.mxu0 %v2335_v11  ;;  %v1799_v2 = vld [vmem:[#allocation6 + $0x148] sm:$0xff]  ;;  %v2371_v11 = vld [vmem:[#allocation8 + $0x450] sm:$0xff] }
 0x19c   : > { %2197 = vmatpush1.msra.mxu1 %v1762_v13  ;;  %2403 = vmatprep.subr.mxu0 %v2334_v14  ;;  %v1798_v13 = vld [vmem:[#allocation6 + $0x140] sm:$0xff]  ;;  %v2370_v14 = vld [vmem:[#allocation8 + $0x448] sm:$0xff] }
 0x19d   : > { %2198 = vmatprep.subr.mxu1 %v1761_v15  ;;  %2404 = vmatpush1.msra.mxu0 %v2333_v17  ;;  %v1797_v15 = vld [vmem:[#allocation6 + $0x138] sm:$0xff]  ;;  %v2369_v17 = vld [vmem:[#allocation8 + $0x440] sm:$0xff] }
 0x19e   : > { %2199 = vmatpush1.msra.mxu1 %v1760_v18  ;;  %2405 = vmatprep.subr.mxu0 %v2332_v20  ;;  %v1796_v18 = vld [vmem:[#allocation6 + $0x130] sm:$0xff]  ;;  %v2368_v20 = vld [vmem:[#allocation8 + $0x438] sm:$0xff] }
 0x19f   : > { %2200 = vmatprep.subr.mxu1 %v1759_v23  ;;  %2406 = vmatpush1.msra.mxu0 %v2331_v25  ;;  %v1795_v23 = vld [vmem:[#allocation6 + $0x128] sm:$0xff]  ;;  %v2367_v25 = vld [vmem:[#allocation8 + $0x430] sm:$0xff] }
 0x1a0   : > { %2201 = vmatpush1.msra.mxu1 %v1758_v26  ;;  %2407 = vmatprep.subr.mxu0 %v2330_v32  ;;  %v1794_v26 = vld [vmem:[#allocation6 + $0x120] sm:$0xff]  ;;  %v2366_v32 = vld [vmem:[#allocation8 + $0x428] sm:$0xff] }
 0x1a1   : > { %2202 = vmatprep.subr.mxu1 %v1821_v33  ;;  %2408 = vmatpush1.msra.mxu0 %v2329_v30  ;;  %v1793_v33 = vld [vmem:[#allocation6 + $0x118] sm:$0xff]  ;;  %v2365_v30 = vld [vmem:[#allocation8 + $0x420] sm:$0xff] }
 0x1a2   : > { %2203 = vmatpush2.msra.mxu1 %v1820_v34  ;;  %2409 = vmatprep.subr.mxu0 %v2328_v35  ;;  %v1792_v34 = vld [vmem:[#allocation6 + $0x110] sm:$0xff]  ;;  %v2364_v35 = vld [vmem:[#allocation8 + $0x418] sm:$0xff] }
 0x1a3   : > { %2204 = vmatprep.subr.mxu1 %v1819_v36  ;;  %2410 = vmatpush1.msra.mxu0 %v2327_v29  ;;  %v1791_v36 = vld [vmem:[#allocation6 + $0x108] sm:$0xff]  ;;  %v2363_v29 = vld [vmem:[#allocation8 + $0x410] sm:$0xff] }
 0x1a4   : > { %2205 = vmatpush2.msra.mxu1 %v1818_v37  ;;  %2411 = vmatprep.subr.mxu0 %v2326_v38  ;;  %v1790_v37 = vld [vmem:[#allocation6 + $0x100] sm:$0xff]  ;;  %v2362_v38 = vld [vmem:[#allocation8 + $0x408] sm:$0xff] }
 0x1a5   : > { %2206 = vmatprep.subr.mxu1 %v1817_v39  ;;  %2412 = vmatpush1.msra.mxu0 %v2325_v40  ;;  %v2361_v39 = vld [vmem:[#allocation8 + $0x400] sm:$0xff]  ;;  %v2392_v40 = vld [vmem:[#allocation8 + $0x4f8] sm:$0xff] }
 0x1a6   : > { %2207 = vmatpush2.msra.mxu1 %v1816_v41  ;;  %2413 = vmatprep.subr.mxu0 %v2324_v42  ;;  %v2360_v41 = vld [vmem:[#allocation8 + $0x3f8] sm:$0xff]  ;;  %v4717_v42 = vld [vmem:[#allocation2] sm:$0xff] }
 0x1a7   : > { %2208 = vmatprep.subr.mxu1 %v1815_v31  ;;  %2414 = vmatpush1.msra.mxu0 %v2323_v43  ;;  %v2391_v31 = vld [vmem:[#allocation8 + $0x4f0] sm:$0xff] }
 0x1a8   : > { %2209 = vmatpush2.msra.mxu1 %v1814_v44  ;;  %2415 = vmatprep.subr.mxu0 %v2322_v45  ;;  %v2359_v43 = vld [vmem:[#allocation8 + $0x3f0] sm:$0xff]  ;;  %v2390_v44 = vld [vmem:[#allocation8 + $0x4e8] sm:$0xff] }
 0x1a9   : > { %2210 = vmatprep.subr.mxu1 %v1813_v27  ;;  %2416 = vmatpush1.msra.mxu0 %v2321_v46  ;;  %v2358_v45 = vld [vmem:[#allocation8 + $0x3e8] sm:$0xff]  ;;  %v2389_v27 = vld [vmem:[#allocation8 + $0x4e0] sm:$0xff] }
 0x1aa   : > { %2211 = vmatpush2.msra.mxu1 %v1812_v47  ;;  %2417 = vmatprep.subr.mxu0 %v2320_v48  ;;  %v2357_v46 = vld [vmem:[#allocation8 + $0x3e0] sm:$0xff]  ;;  %v2388_v47 = vld [vmem:[#allocation8 + $0x4d8] sm:$0xff] }
 0x1ab   : > { %2212 = vmatprep.subr.mxu1 %v1811_v49  ;;  %2418 = vmatpush1.msra.mxu0 %v2319_v50  ;;  %v2356_v48 = vld [vmem:[#allocation8 + $0x3d8] sm:$0xff]  ;;  %v2387_v49 = vld [vmem:[#allocation8 + $0x4d0] sm:$0xff] }
 0x1ac   : > { %2213 = vmatpush2.msra.mxu1 %v1810_v51  ;;  %2419 = vmatprep.subr.mxu0 %v2318_v52  ;;  %v2355_v50 = vld [vmem:[#allocation8 + $0x3d0] sm:$0xff]  ;;  %v2386_v51 = vld [vmem:[#allocation8 + $0x4c8] sm:$0xff] }
 0x1ad   : > { %2214 = vmatprep.subr.mxu1 %v1809_v53  ;;  %2420 = vmatpush1.msra.mxu0 %v2317_v54  ;;  %v2354_v52 = vld [vmem:[#allocation8 + $0x3c8] sm:$0xff]  ;;  %v2385_v53 = vld [vmem:[#allocation8 + $0x4c0] sm:$0xff] }
 0x1ae   : > { %2215 = vmatpush2.msra.mxu1 %v1808_v55  ;;  %2421 = vmatprep.subr.mxu0 %v2316_v58  ;;  %v2353_v54 = vld [vmem:[#allocation8 + $0x3c0] sm:$0xff]  ;;  %v2384_v55 = vld [vmem:[#allocation8 + $0x4b8] sm:$0xff] }
 0x1af   : > { %2216 = vmatprep.subr.mxu1 %v1807_v59  ;;  %2422 = vmatpush1.msra.mxu0 %v2315_v57  ;;  %v2352_v58 = vld [vmem:[#allocation8 + $0x3b8] sm:$0xff]  ;;  %v2383_v59 = vld [vmem:[#allocation8 + $0x4b0] sm:$0xff] }
 0x1b0   : > { %2217 = vmatpush2.msra.mxu1 %v1806_v60  ;;  %2423 = vmatprep.subr.mxu0 %v2314_v61  ;;  %v2351_v57 = vld [vmem:[#allocation8 + $0x3b0] sm:$0xff]  ;;  %v2382_v60 = vld [vmem:[#allocation8 + $0x4a8] sm:$0xff] }
 0x1b1   : > { %2218 = vmatprep.subr.mxu1 %v1805_v62  ;;  %2424 = vmatpush1.msra.mxu0 %v2313_v12  ;;  %v2350_v61 = vld [vmem:[#allocation8 + $0x3a8] sm:$0xff]  ;;  %v2381_v62 = vld [vmem:[#allocation8 + $0x4a0] sm:$0xff] }
 0x1b2   : > { %2219 = vmatpush2.msra.mxu1 %v1804_v63  ;;  %2425 = vmatprep.subr.mxu0 %v2376_v3  ;;  %v2349_v12 = vld [vmem:[#allocation8 + $0x3a0] sm:$0xff]  ;;  %v2380_v63 = vld [vmem:[#allocation8 + $0x498] sm:$0xff] }
 0x1b3   : > { %2220 = vmatprep.subr.mxu1 %v1803_v4  ;;  %2426 = vmatpush2.msra.mxu0 %v2375_v5  ;;  %v2348_v3 = vld [vmem:[#allocation8 + $0x398] sm:$0xff]  ;;  %v2379_v4 = vld [vmem:[#allocation8 + $0x490] sm:$0xff] }
 0x1b4   : > { %2221 = vmatpush2.msra.mxu1 %v1802_v6  ;;  %2427 = vmatprep.subr.mxu0 %v2374_v0  ;;  %v2347_v5 = vld [vmem:[#allocation8 + $0x390] sm:$0xff]  ;;  %v2378_v6 = vld [vmem:[#allocation8 + $0x488] sm:$0xff] }
 0x1b5   : > { %2222 = vmatprep.subr.mxu1 %v1801_v7  ;;  %2428 = vmatpush2.msra.mxu0 %v2373_v8  ;;  %v2346_v0 = vld [vmem:[#allocation8 + $0x388] sm:$0xff]  ;;  %v2377_v7 = vld [vmem:[#allocation8 + $0x480] sm:$0xff] }
 0x1b6   : > { %2223 = vmatpush2.msra.mxu1 %v1800_v9  ;;  %2429 = vmatprep.subr.mxu0 %v2372_v10  ;;  %v2345_v8 = vld [vmem:[#allocation8 + $0x380] sm:$0xff]  ;;  %v1869_v9 = vld [vmem:[#allocation8 + $0xf8] sm:$0xff]  ;;  %v1868_v10 = vld [vmem:[#allocation8 + $0xf0] sm:$0xff] }
 0x1b7   : > { %2224 = vmatprep.subr.mxu1 %v1799_v2  ;;  %2430 = vmatpush2.msra.mxu0 %v2371_v11  ;;  %v1917_v2 = vld [vmem:[#allocation8 + $0x278] sm:$0xff]  ;;  %v1867_v11 = vld [vmem:[#allocation8 + $0xe8] sm:$0xff] }
 0x1b8   : > { %2225 = vmatpush2.msra.mxu1 %v1798_v13  ;;  %2431 = vmatprep.subr.mxu0 %v2370_v14  ;;  %v1916_v13 = vld [vmem:[#allocation8 + $0x270] sm:$0xff]  ;;  %v1866_v14 = vld [vmem:[#allocation8 + $0xe0] sm:$0xff] }
 0x1b9   : > { %2226 = vmatprep.subr.mxu1 %v1797_v15  ;;  %2432 = vmatpush2.msra.mxu0 %v2369_v17  ;;  %v1915_v15 = vld [vmem:[#allocation8 + $0x268] sm:$0xff]  ;;  %v1865_v17 = vld [vmem:[#allocation8 + $0xd8] sm:$0xff] }
 0x1ba   : > { %2227 = vmatpush2.msra.mxu1 %v1796_v18  ;;  %2433 = vmatprep.subr.mxu0 %v2368_v20  ;;  %v1914_v18 = vld [vmem:[#allocation8 + $0x260] sm:$0xff]  ;;  %v1864_v20 = vld [vmem:[#allocation8 + $0xd0] sm:$0xff] }
 0x1bb   : > { %2228 = vmatprep.subr.mxu1 %v1795_v23  ;;  %2434 = vmatpush2.msra.mxu0 %v2367_v25  ;;  %v1913_v23 = vld [vmem:[#allocation8 + $0x258] sm:$0xff]  ;;  %v1912_v25 = vld [vmem:[#allocation8 + $0x250] sm:$0xff] }
 0x1bc   : > { %2229 = vmatpush2.msra.mxu1 %v1794_v26  ;;  %2435 = vmatprep.subr.mxu0 %v2366_v32  ;;  %v1862_v26 = vld [vmem:[#allocation8 + $0xc0] sm:$0xff]  ;;  %v1861_v32 = vld [vmem:[#allocation8 + $0xb8] sm:$0xff] }
 0x1bd   : > { %2230 = vmatprep.subr.mxu1 %v1793_v33  ;;  %2436 = vmatpush2.msra.mxu0 %v2365_v30  ;;  %v1860_v33 = vld [vmem:[#allocation8 + $0xb0] sm:$0xff]  ;;  %v1909_v30 = vld [vmem:[#allocation8 + $0x238] sm:$0xff] }
 0x1be   : > { %2231 = vmatpush2.msra.mxu1 %v1792_v34  ;;  %2437 = vmatprep.subr.mxu0 %v2364_v35  ;;  %v1859_v34 = vld [vmem:[#allocation8 + $0xa8] sm:$0xff]  ;;  %v1908_v35 = vld [vmem:[#allocation8 + $0x230] sm:$0xff] }
 0x1bf   : > { %2232 = vmatprep.subr.mxu1 %v1791_v36  ;;  %2438 = vmatpush2.msra.mxu0 %v2363_v29  ;;  %v1858_v36 = vld [vmem:[#allocation8 + $0xa0] sm:$0xff]  ;;  %v1907_v29 = vld [vmem:[#allocation8 + $0x228] sm:$0xff] }
 0x1c0   : > { %2233 = vmatpush2.msra.mxu1 %v1790_v37  ;;  %2439 = vmatprep.subr.mxu0 %v2362_v38  ;;  %v1857_v37 = vld [vmem:[#allocation8 + $0x98] sm:$0xff]  ;;  %v1906_v38 = vld [vmem:[#allocation8 + $0x220] sm:$0xff] }
 0x1c1   : > { %2235 = vmatmul.mubr.f32.vlgmr.msra.gmra.mxu1 %v4717_v42  ;;  %2440 = vmatpush2.msra.mxu0 %v2361_v39  ;;  %v1856_v39 = vld [vmem:[#allocation8 + $0x90] sm:$0xff] }
 0x1c2   : > { %2480 = vmatprep.subr.mxu1 %v2392_v40  ;;  %2441 = vmatprep.subr.mxu0 %v2360_v41  ;;  %v1905_v40 = vld [vmem:[#allocation8 + $0x218] sm:$0xff]  ;;  %v1855_v41 = vld [vmem:[#allocation8 + $0x88] sm:$0xff] }
 0x1c3   : > { %2481 = vmatpush1.msra.mxu1 %v2391_v31  ;;  %2442 = vmatpush2.msra.mxu0 %v2359_v43  ;;  %v1904_v31 = vld [vmem:[#allocation8 + $0x210] sm:$0xff]  ;;  %v1854_v43 = vld [vmem:[#allocation8 + $0x80] sm:$0xff] }
 0x1c4   : > { %2482 = vmatprep.subr.mxu1 %v2390_v44  ;;  %2443 = vmatprep.subr.mxu0 %v2358_v45  ;;  %v2678_v44 = vld [vmem:[#allocation2 + $0x8] sm:$0xfc]  ;;  %v2681_v45 = vld [vmem:[#allocation2 + $0x20] sm:$0x3] }
 0x1c5   : > { %2483 = vmatpush1.msra.mxu1 %v2389_v27  ;;  %2444 = vmatpush2.msra.mxu0 %v2357_v46  ;;  %v1903_v27 = vld [vmem:[#allocation8 + $0x208] sm:$0xff]  ;;  %v1853_v46 = vld [vmem:[#allocation8 + $0x78] sm:$0xff] }
 0x1c6   : > { %2484 = vmatprep.subr.mxu1 %v2388_v47  ;;  %2445 = vmatprep.subr.mxu0 %v2356_v48  ;;  %v1902_v47 = vld [vmem:[#allocation8 + $0x200] sm:$0xff]  ;;  %v1852_v48 = vld [vmem:[#allocation8 + $0x70] sm:$0xff] }
 0x1c7   : > { %2485 = vmatpush1.msra.mxu1 %v2387_v49  ;;  %2446 = vmatpush2.msra.mxu0 %v2355_v50  ;;  %v2774_v49 = vrot.slane %v2678_v44, 2  ;;  %v2775_v50 = vrot.slane %v2681_v45, 2  ;;  %v2690_v44 = vld [vmem:[#allocation6 + $0x530] sm:$0xff]  ;;  %v1890_v45 = vld [vmem:[#allocation8 + $0x1a0] sm:$0xff] }
 0x1c8   : > { %2486 = vmatprep.subr.mxu1 %v2386_v51  ;;  %2447 = vmatprep.subr.mxu0 %v2354_v52  ;;  %v2715_v51 = vld [vmem:[#allocation6 + $0x5f8] sm:$0xff]  ;;  %v1851_v52 = vld [vmem:[#allocation8 + $0x68] sm:$0xff] }
 0x1c9   : > { %2487 = vmatpush1.msra.mxu1 %v2385_v53  ;;  %2448 = vmatpush2.msra.mxu0 %v2353_v54  ;;  %v2714_v53 = vld [vmem:[#allocation6 + $0x5f0] sm:$0xff]  ;;  %v1850_v54 = vld [vmem:[#allocation8 + $0x60] sm:$0xff] }
 0x1ca   : > { %2488 = vmatprep.subr.mxu1 %v2384_v55  ;;  %2449 = vmatprep.subr.mxu0 %v2352_v58  ;;  %v2713_v55 = vld [vmem:[#allocation6 + $0x5e8] sm:$0xff]  ;;  %v4729_v58 = vsel %vm2770_vm6, %v2774_v49, %v2775_v50  ;;  %v2687_v49 = vld [vmem:[#allocation6 + $0x518] sm:$0xff] }
 0x1cb   : > { %2489 = vmatpush1.msra.mxu1 %v2383_v59  ;;  %2450 = vmatpush2.msra.mxu0 %v2351_v57  ;;  %v1849_v59 = vld [vmem:[#allocation8 + $0x58] sm:$0xff]  ;;  %v2712_v57 = vld [vmem:[#allocation6 + $0x5e0] sm:$0xff]  ;;  %v1887_v50 = vld [vmem:[#allocation8 + $0x188] sm:$0xff] }
 0x1cc   : > { %2490 = vmatprep.subr.mxu1 %v2382_v60  ;;  %2451 = vmatprep.subr.mxu0 %v2350_v61  ;;  %v1848_v60 = vld [vmem:[#allocation8 + $0x50] sm:$0xff]  ;;  %v2711_v61 = vld [vmem:[#allocation6 + $0x5d8] sm:$0xff] }
 0x1cd   : > { %2491 = vmatpush1.msra.mxu1 %v2381_v62  ;;  %2452 = vmatpush2.msra.mxu0 %v2349_v12  ;;  %v1847_v62 = vld [vmem:[#allocation8 + $0x48] sm:$0xff]  ;;  %v2710_v12 = vld [vmem:[#allocation6 + $0x5d0] sm:$0xff] }
 0x1ce   : > { %2492 = vmatprep.subr.mxu1 %v2380_v63  ;;  %2453 = vmatprep.subr.mxu0 %v2348_v3  ;;  %v2709_v63 = vld [vmem:[#allocation6 + $0x5c8] sm:$0xff]  ;;  %v1845_v3 = vld [vmem:[#allocation8 + $0x38] sm:$0xff] }
 0x1cf   : > { %2493 = vmatpush1.msra.mxu1 %v2379_v4  ;;  %2454 = vmatpush2.msra.mxu0 %v2347_v5  ;;  %v2708_v4 = vld [vmem:[#allocation6 + $0x5c0] sm:$0xff]  ;;  %v1844_v5 = vld [vmem:[#allocation8 + $0x30] sm:$0xff] }
 0x1d0   : > { %2494 = vmatprep.subr.mxu1 %v2378_v6  ;;  %2455 = vmatprep.subr.mxu0 %v2346_v0  ;;  %v2707_v6 = vld [vmem:[#allocation6 + $0x5b8] sm:$0xff]  ;;  %v1843_v0 = vld [vmem:[#allocation8 + $0x28] sm:$0xff] }
 0x1d1   : > { %2495 = vmatpush1.msra.mxu1 %v2377_v7  ;;  %2528 = vmatprep.mubr.f32.mxu1 %v4261_v1  ;;  %v2706_v7 = vld [vmem:[#allocation6 + $0x5b0] sm:$0xff] }
 0x1d2   : > { %2456 = vmatpush2.msra.mxu0 %v2345_v8  ;;  %3801 = vmatmul.mubr.msk.f32.vlgmr.msra.gmra.mxu1 %vm1585_vm2, %v4700_v22  ;;  %v1863_v22 = vld [vmem:[#allocation8 + $0xc8] sm:$0xff]  ;;  %v1842_v8 = vld [vmem:[#allocation8 + $0x20] sm:$0xff] }
 0x1d3   : > { %2535 = vmatprep.subr.mxu1 %v1869_v9  ;;  %2458 = vmatmul.mubr.f32.vlgmr.msra.gmra.mxu0 %v4705_v24  ;;  %v1911_v24 = vld [vmem:[#allocation8 + $0x248] sm:$0xff] }
 0x1d4   : > { %2536 = vmatpush1.msra.mxu1 %v1868_v10  ;;  %2599 = vmatprep.mubr.f32.mxu1 %v4708_v28  ;;  %v1910_v28 = vld [vmem:[#allocation8 + $0x240] sm:$0xff]  ;;  %v2705_v9 = vld [vmem:[#allocation6 + $0x5a8] sm:$0xff]  ;;  %v1841_v10 = vld [vmem:[#allocation8 + $0x18] sm:$0xff] }
 0x1d5   : > { %2622 = vmatprep.subr.mxu0 %v1917_v2  ;;  %2537 = vmatprep.subr.mxu1 %v1867_v11  ;;  %v2704_v2 = vld [vmem:[#allocation6 + $0x5a0] sm:$0xff]  ;;  %v1840_v11 = vld [vmem:[#allocation8 + $0x10] sm:$0xff] }
 0x1d6   : > { %2623 = vmatpush1.msra.mxu0 %v1916_v13  ;;  %2538 = vmatpush1.msra.mxu1 %v1866_v14  ;;  %v2703_v13 = vld [vmem:[#allocation6 + $0x598] sm:$0xff]  ;;  %v1839_v14 = vld [vmem:[#allocation8 + $0x8] sm:$0xff] }
 0x1d7   : > { %2624 = vmatprep.subr.mxu0 %v1915_v15  ;;  %2539 = vmatprep.subr.mxu1 %v1865_v17  ;;  %v2702_v15 = vld [vmem:[#allocation6 + $0x590] sm:$0xff]  ;;  %v1838_v17 = vld [vmem:[#allocation8] sm:$0xff] }
 0x1d8   : > { %2625 = vmatpush1.msra.mxu0 %v1914_v18  ;;  %2540 = vmatpush1.msra.mxu1 %v1864_v20  ;;  %v2701_v18 = vld [vmem:[#allocation6 + $0x588] sm:$0xff]  ;;  %v1901_v20 = vld [vmem:[#allocation8 + $0x1f8] sm:$0xff] }
 0x1d9   : > { %2626 = vmatprep.subr.mxu0 %v1913_v23  ;;  %2541 = vmatprep.subr.mxu1 %v1863_v22  ;;  %v2700_v23 = vld [vmem:[#allocation6 + $0x580] sm:$0xff]  ;;  %v1900_v22 = vld [vmem:[#allocation8 + $0x1f0] sm:$0xff] }
 0x1da   : > { %2627 = vmatpush1.msra.mxu0 %v1912_v25  ;;  %2542 = vmatpush1.msra.mxu1 %v1862_v26  ;;  %v2699_v25 = vld [vmem:[#allocation6 + $0x578] sm:$0xff]  ;;  %v1899_v26 = vld [vmem:[#allocation8 + $0x1e8] sm:$0xff] }
 0x1db   : > { %2628 = vmatprep.subr.mxu0 %v1911_v24  ;;  %2543 = vmatprep.subr.mxu1 %v1861_v32  ;;  %v2698_v24 = vld [vmem:[#allocation6 + $0x570] sm:$0xff]  ;;  %v1898_v32 = vld [vmem:[#allocation8 + $0x1e0] sm:$0xff] }
 0x1dc   : > { %2629 = vmatpush1.msra.mxu0 %v1910_v28  ;;  %2544 = vmatpush1.msra.mxu1 %v1860_v33  ;;  %v2697_v28 = vld [vmem:[#allocation6 + $0x568] sm:$0xff]  ;;  %v1897_v33 = vld [vmem:[#allocation8 + $0x1d8] sm:$0xff] }
 0x1dd   : > { %2630 = vmatprep.subr.mxu0 %v1909_v30  ;;  %2545 = vmatprep.subr.mxu1 %v1859_v34  ;;  %v2696_v30 = vld [vmem:[#allocation6 + $0x560] sm:$0xff]  ;;  %v1896_v34 = vld [vmem:[#allocation8 + $0x1d0] sm:$0xff] }
 0x1de   : > { %2631 = vmatpush1.msra.mxu0 %v1908_v35  ;;  %2546 = vmatpush1.msra.mxu1 %v1858_v36  ;;  %v2695_v35 = vld [vmem:[#allocation6 + $0x558] sm:$0xff]  ;;  %v1895_v36 = vld [vmem:[#allocation8 + $0x1c8] sm:$0xff] }
 0x1df   : > { %2632 = vmatprep.subr.mxu0 %v1907_v29  ;;  %2547 = vmatprep.subr.mxu1 %v1857_v37  ;;  %v2694_v29 = vld [vmem:[#allocation6 + $0x550] sm:$0xff]  ;;  %v1894_v37 = vld [vmem:[#allocation8 + $0x1c0] sm:$0xff] }
 0x1e0   : > { %2633 = vmatpush1.msra.mxu0 %v1906_v38  ;;  %2548 = vmatpush1.msra.mxu1 %v1856_v39  ;;  %v2693_v38 = vld [vmem:[#allocation6 + $0x548] sm:$0xff]  ;;  %v1893_v39 = vld [vmem:[#allocation8 + $0x1b8] sm:$0xff] }
 0x1e1   : > { %2634 = vmatprep.subr.mxu0 %v1905_v40  ;;  %2549 = vmatprep.subr.mxu1 %v1855_v41  ;;  %v2692_v40 = vld [vmem:[#allocation6 + $0x540] sm:$0xff]  ;;  %v1892_v41 = vld [vmem:[#allocation8 + $0x1b0] sm:$0xff] }
 0x1e2   : > { %2635 = vmatpush1.msra.mxu0 %v1904_v31  ;;  %2550 = vmatpush1.msra.mxu1 %v1854_v43  ;;  %v2691_v31 = vld [vmem:[#allocation6 + $0x538] sm:$0xff]  ;;  %v1891_v43 = vld [vmem:[#allocation8 + $0x1a8] sm:$0xff] }
 0x1e3   : > { %2636 = vmatprep.subr.mxu0 %v1903_v27  ;;  %2551 = vmatprep.subr.mxu1 %v1853_v46  ;;  %v2689_v27 = vld [vmem:[#allocation6 + $0x528] sm:$0xff]  ;;  %v1889_v46 = vld [vmem:[#allocation8 + $0x198] sm:$0xff] }
 0x1e4   : > { %2637 = vmatpush1.msra.mxu0 %v1902_v47  ;;  %2670 = vmatprep.mubr.f32.mxu0 %v4261_v1  ;;  %v2688_v47 = vld [vmem:[#allocation6 + $0x520] sm:$0xff] }
 0x1e5   : > { %2552 = vmatpush1.msra.mxu1 %v1852_v48  ;;  %3802 = vmatmul.mubr.msk.f32.vlgmr.msra.gmra.mxu0 %vm1585_vm2, %v4712_v56  ;;  %v1846_v56 = vld [vmem:[#allocation8 + $0x40] sm:$0xff]  ;;  %v1888_v48 = vld [vmem:[#allocation8 + $0x190] sm:$0xff] }
 0x1e6   : > { %2784 = vmatprep.subr.mxu0 %v2715_v51  ;;  %2553 = vmatprep.subr.mxu1 %v1851_v52  ;;  %v2686_v51 = vld [vmem:[#allocation6 + $0x510] sm:$0xff]  ;;  %v1886_v52 = vld [vmem:[#allocation8 + $0x180] sm:$0xff] }
 0x1e7   : > { %2785 = vmatpush1.msra.mxu0 %v2714_v53  ;;  %2848 = vmatprep.mubr.f32.mxu0 %v4729_v58  ;;  %v2685_v53 = vld [vmem:[#allocation6 + $0x508] sm:$0xff] }
 0x1e8   : > { %2554 = vmatpush1.msra.mxu1 %v1850_v54  ;;  %2786 = vmatprep.subr.mxu0 %v2713_v55  ;;  %v1885_v54 = vld [vmem:[#allocation8 + $0x178] sm:$0xff]  ;;  %v2684_v55 = vld [vmem:[#allocation6 + $0x500] sm:$0xff] }
 0x1e9   : > { %2555 = vmatprep.subr.mxu1 %v1849_v59  ;;  %2787 = vmatpush1.msra.mxu0 %v2712_v57  ;;  %v1884_v59 = vld [vmem:[#allocation8 + $0x170] sm:$0xff]  ;;  %v2747_v57 = vld [vmem:[#allocation6 + $0x6f8] sm:$0xff] }
 0x1ea   : > { %2556 = vmatpush1.msra.mxu1 %v1848_v60  ;;  %2788 = vmatprep.subr.mxu0 %v2711_v61  ;;  %v1883_v60 = vld [vmem:[#allocation8 + $0x168] sm:$0xff]  ;;  %v2746_v61 = vld [vmem:[#allocation6 + $0x6f0] sm:$0xff] }
 0x1eb   : > { %2557 = vmatprep.subr.mxu1 %v1847_v62  ;;  %2789 = vmatpush1.msra.mxu0 %v2710_v12  ;;  %v1882_v62 = vld [vmem:[#allocation8 + $0x160] sm:$0xff]  ;;  %v2745_v12 = vld [vmem:[#allocation6 + $0x6e8] sm:$0xff] }
 0x1ec   : > { %2558 = vmatpush1.msra.mxu1 %v1846_v56  ;;  %2790 = vmatprep.subr.mxu0 %v2709_v63  ;;  %v1881_v56 = vld [vmem:[#allocation8 + $0x158] sm:$0xff]  ;;  %v2744_v63 = vld [vmem:[#allocation6 + $0x6e0] sm:$0xff] }
 0x1ed   : > { %2559 = vmatprep.subr.mxu1 %v1845_v3  ;;  %2791 = vmatpush1.msra.mxu0 %v2708_v4  ;;  %v1880_v3 = vld [vmem:[#allocation8 + $0x150] sm:$0xff]  ;;  %v2743_v4 = vld [vmem:[#allocation6 + $0x6d8] sm:$0xff] }
 0x1ee   : > { %2560 = vmatpush1.msra.mxu1 %v1844_v5  ;;  %2792 = vmatprep.subr.mxu0 %v2707_v6  ;;  %v1879_v5 = vld [vmem:[#allocation8 + $0x148] sm:$0xff]  ;;  %v2742_v6 = vld [vmem:[#allocation6 + $0x6d0] sm:$0xff] }
 0x1ef   : > { %2561 = vmatprep.subr.mxu1 %v1843_v0  ;;  %2793 = vmatpush1.msra.mxu0 %v2706_v7  ;;  %v1878_v0 = vld [vmem:[#allocation8 + $0x140] sm:$0xff]  ;;  %v2741_v7 = vld [vmem:[#allocation6 + $0x6c8] sm:$0xff] }
 0x1f0   : > { %2562 = vmatpush1.msra.mxu1 %v1842_v8  ;;  %2794 = vmatprep.subr.mxu0 %v2705_v9  ;;  %v1877_v8 = vld [vmem:[#allocation8 + $0x138] sm:$0xff]  ;;  %v2740_v9 = vld [vmem:[#allocation6 + $0x6c0] sm:$0xff] }
 0x1f1   : > { %2563 = vmatprep.subr.mxu1 %v1841_v10  ;;  %2795 = vmatpush1.msra.mxu0 %v2704_v2  ;;  %v1876_v10 = vld [vmem:[#allocation8 + $0x130] sm:$0xff]  ;;  %v2739_v2 = vld [vmem:[#allocation6 + $0x6b8] sm:$0xff] }
 0x1f2   : > { %2564 = vmatpush1.msra.mxu1 %v1840_v11  ;;  %2796 = vmatprep.subr.mxu0 %v2703_v13  ;;  %v1875_v11 = vld [vmem:[#allocation8 + $0x128] sm:$0xff]  ;;  %v2738_v13 = vld [vmem:[#allocation6 + $0x6b0] sm:$0xff] }
 0x1f3   : > { %2565 = vmatprep.subr.mxu1 %v1839_v14  ;;  %2797 = vmatpush1.msra.mxu0 %v2702_v15  ;;  %v1874_v14 = vld [vmem:[#allocation8 + $0x120] sm:$0xff]  ;;  %v2737_v15 = vld [vmem:[#allocation6 + $0x6a8] sm:$0xff] }
 0x1f4   : > { %2566 = vmatpush1.msra.mxu1 %v1838_v17  ;;  %2798 = vmatprep.subr.mxu0 %v2701_v18  ;;  %v1873_v17 = vld [vmem:[#allocation8 + $0x118] sm:$0xff]  ;;  %v2736_v18 = vld [vmem:[#allocation6 + $0x6a0] sm:$0xff] }
 0x1f5   : > { %2567 = vmatprep.subr.mxu1 %v1901_v20  ;;  %2799 = vmatpush1.msra.mxu0 %v2700_v23  ;;  %v1872_v20 = vld [vmem:[#allocation8 + $0x110] sm:$0xff]  ;;  %v2735_v23 = vld [vmem:[#allocation6 + $0x698] sm:$0xff] }
 0x1f6   : > { %2568 = vmatpush2.msra.mxu1 %v1900_v22  ;;  %2800 = vmatprep.subr.mxu0 %v2699_v25  ;;  %v1871_v22 = vld [vmem:[#allocation8 + $0x108] sm:$0xff]  ;;  %v2734_v25 = vld [vmem:[#allocation6 + $0x690] sm:$0xff] }
 0x1f7   : > { %2569 = vmatprep.subr.mxu1 %v1899_v26  ;;  %2801 = vmatpush1.msra.mxu0 %v2698_v24  ;;  %v1870_v26 = vld [vmem:[#allocation8 + $0x100] sm:$0xff]  ;;  %v2733_v24 = vld [vmem:[#allocation6 + $0x688] sm:$0xff] }
 0x1f8   : > { %2570 = vmatpush2.msra.mxu1 %v1898_v32  ;;  %2802 = vmatprep.subr.mxu0 %v2697_v28  ;;  %v2732_v32 = vld [vmem:[#allocation6 + $0x680] sm:$0xff]  ;;  %v2763_v28 = vld [vmem:[#allocation6 + $0x778] sm:$0xff] }
 0x1f9   : > { %2571 = vmatprep.subr.mxu1 %v1897_v33  ;;  %2803 = vmatpush1.msra.mxu0 %v2696_v30  ;;  %v2731_v33 = vld [vmem:[#allocation6 + $0x678] sm:$0xff]  ;;  %v2762_v30 = vld [vmem:[#allocation6 + $0x770] sm:$0xff] }
 0x1fa   : > { %2572 = vmatpush2.msra.mxu1 %v1896_v34  ;;  %2804 = vmatprep.subr.mxu0 %v2695_v35  ;;  %v2730_v34 = vld [vmem:[#allocation6 + $0x670] sm:$0xff]  ;;  %v2761_v35 = vld [vmem:[#allocation6 + $0x768] sm:$0xff] }
 0x1fb   : > { %2573 = vmatprep.subr.mxu1 %v1895_v36  ;;  %2805 = vmatpush1.msra.mxu0 %v2694_v29  ;;  %v2729_v36 = vld [vmem:[#allocation6 + $0x668] sm:$0xff]  ;;  %v2760_v29 = vld [vmem:[#allocation6 + $0x760] sm:$0xff] }
 0x1fc   : > { %2574 = vmatpush2.msra.mxu1 %v1894_v37  ;;  %2806 = vmatprep.subr.mxu0 %v2693_v38  ;;  %v2728_v37 = vld [vmem:[#allocation6 + $0x660] sm:$0xff]  ;;  %v2759_v38 = vld [vmem:[#allocation6 + $0x758] sm:$0xff] }
 0x1fd   : > { %2575 = vmatprep.subr.mxu1 %v1893_v39  ;;  %2807 = vmatpush1.msra.mxu0 %v2692_v40  ;;  %v2727_v39 = vld [vmem:[#allocation6 + $0x658] sm:$0xff]  ;;  %v2758_v40 = vld [vmem:[#allocation6 + $0x750] sm:$0xff] }
 0x1fe   : > { %2576 = vmatpush2.msra.mxu1 %v1892_v41  ;;  %2808 = vmatprep.subr.mxu0 %v2691_v31  ;;  %v2726_v41 = vld [vmem:[#allocation6 + $0x650] sm:$0xff]  ;;  %v2757_v31 = vld [vmem:[#allocation6 + $0x748] sm:$0xff] }
 0x1ff   : > { %2577 = vmatprep.subr.mxu1 %v1891_v43  ;;  %2809 = vmatpush1.msra.mxu0 %v2690_v44  ;;  %v2725_v43 = vld [vmem:[#allocation6 + $0x648] sm:$0xff]  ;;  %v2724_v44 = vld [vmem:[#allocation6 + $0x640] sm:$0xff] }
 0x200   : > { %2578 = vmatpush2.msra.mxu1 %v1890_v45  ;;  %2810 = vmatprep.subr.mxu0 %v2689_v27  ;;  %v2755_v45 = vld [vmem:[#allocation6 + $0x738] sm:$0xff] }
 0x201   : > { %2579 = vmatprep.subr.mxu1 %v1889_v46  ;;  %2811 = vmatpush1.msra.mxu0 %v2688_v47  ;;  %v2723_v27 = vld [vmem:[#allocation6 + $0x638] sm:$0xff]  ;;  %v2754_v46 = vld [vmem:[#allocation6 + $0x730] sm:$0xff] }
 0x202   : > { %2580 = vmatpush2.msra.mxu1 %v1888_v48  ;;  %2812 = vmatprep.subr.mxu0 %v2687_v49  ;;  %v2722_v47 = vld [vmem:[#allocation6 + $0x630] sm:$0xff]  ;;  %v2679_v48 = vld [vmem:[#allocation2 + $0x10] sm:$0xfc]  ;;  %v2753_v49 = vld [vmem:[#allocation6 + $0x728] sm:$0xff] }
 0x203   : > { %2581 = vmatprep.subr.mxu1 %v1887_v50  ;;  %2813 = vmatpush1.msra.mxu0 %v2686_v51  ;;  %v2721_v50 = vld [vmem:[#allocation6 + $0x628] sm:$0xff] }
 0x204   : > { %2582 = vmatpush2.msra.mxu1 %v1886_v52  ;;  %2814 = vmatprep.subr.mxu0 %v2685_v53  ;;  %v2682_v51 = vld [vmem:[#allocation2 + $0x28] sm:$0x3]  ;;  %v2752_v52 = vld [vmem:[#allocation6 + $0x720] sm:$0xff] }
 0x205   : > { %2583 = vmatprep.subr.mxu1 %v1885_v54  ;;  %2815 = vmatpush1.msra.mxu0 %v2684_v55  ;;  %v2720_v53 = vld [vmem:[#allocation6 + $0x620] sm:$0xff]  ;;  %v2677_v54 = vld [vmem:[#allocation2] sm:$0xfc]  ;;  %v2751_v55 = vld [vmem:[#allocation6 + $0x718] sm:$0xff] }
 0x206   : > { %2584 = vmatpush2.msra.mxu1 %v1884_v59  ;;  %2816 = vmatprep.subr.mxu0 %v2747_v57  ;;  %v2719_v59 = vld [vmem:[#allocation6 + $0x618] sm:$0xff] }
 0x207   : > { %2585 = vmatprep.subr.mxu1 %v1883_v60  ;;  %2817 = vmatpush2.msra.mxu0 %v2746_v61  ;;  %v2680_v57 = vld [vmem:[#allocation2 + $0x18] sm:$0x3]  ;;  %v2750_v60 = vld [vmem:[#allocation6 + $0x710] sm:$0xff] }
 0x208   : > { %2586 = vmatpush2.msra.mxu1 %v1882_v62  ;;  %2818 = vmatprep.subr.mxu0 %v2745_v12  ;;  %v2718_v61 = vld [vmem:[#allocation6 + $0x610] sm:$0xff]  ;;  %v2749_v62 = vld [vmem:[#allocation6 + $0x708] sm:$0xff] }
 0x209   : > { %2587 = vmatprep.subr.mxu1 %v1881_v56  ;;  %2819 = vmatpush2.msra.mxu0 %v2744_v63  ;;  %v2717_v12 = vld [vmem:[#allocation6 + $0x608] sm:$0xff]  ;;  %v2777_v56 = vrot.slane %v2679_v48, 2  ;;  %v2778_v63 = vrot.slane %v2682_v51, 2  ;;  %v2935_v51 = vld [vmem:[#allocation8 + $0x530] sm:$0xff] }
 0x20a   : > { %2588 = vmatpush2.msra.mxu1 %v1880_v3  ;;  %2820 = vmatprep.subr.mxu0 %v2743_v4  ;;  %v2748_v3 = vld [vmem:[#allocation6 + $0x700] sm:$0xff]  ;;  %v2771_v4 = vrot.slane %v2677_v54, 2  ;;  %v2938_v48 = vld [vmem:[#allocation8 + $0x548] sm:$0xff]  ;;  %v2931_v54 = vld [vmem:[#allocation8 + $0x510] sm:$0xff] }
 0x20b   : > { %2589 = vmatprep.subr.mxu1 %v1879_v5  ;;  %2821 = vmatpush2.msra.mxu0 %v2742_v6  ;;  %v2772_v5 = vrot.slane %v2680_v57, 2  ;;  %v2716_v6 = vld [vmem:[#allocation6 + $0x600] sm:$0xff]  ;;  %v2992_v57 = vld [vmem:[#allocation8 + $0x6f8] sm:$0xff] }
 0x20c   : > { %2590 = vmatpush2.msra.mxu1 %v1878_v0  ;;  %2822 = vmatprep.subr.mxu0 %v2741_v7  ;;  %v2960_v0 = vld [vmem:[#allocation8 + $0x5f8] sm:$0xff]  ;;  %v4735_v7 = vsel %vm2770_vm6, %v2777_v56, %v2778_v63  ;;  %v2987_v56 = vld [vmem:[#allocation8 + $0x6d0] sm:$0xff]  ;;  %v2986_v63 = vld [vmem:[#allocation8 + $0x6c8] sm:$0xff] }
 0x20d   : > { %2591 = vmatprep.subr.mxu1 %v1877_v8  ;;  %2823 = vmatpush2.msra.mxu0 %v2740_v9  ;;  %v2959_v8 = vld [vmem:[#allocation8 + $0x5f0] sm:$0xff]  ;;  %v4740_v9 = vsel %vm2770_vm6, %v2771_v4, %v2772_v5  ;;  %v2984_v4 = vld [vmem:[#allocation8 + $0x6b8] sm:$0xff] }
 0x20e   : > { %2592 = vmatpush2.msra.mxu1 %v1876_v10  ;;  %2824 = vmatprep.subr.mxu0 %v2739_v2  ;;  %v3008_v10 = vld [vmem:[#allocation8 + $0x778] sm:$0xff]  ;;  %v2958_v2 = vld [vmem:[#allocation8 + $0x5e8] sm:$0xff]  ;;  %v2983_v5 = vld [vmem:[#allocation8 + $0x6b0] sm:$0xff] }
 0x20f   : > { %2593 = vmatprep.subr.mxu1 %v1875_v11  ;;  %2825 = vmatpush2.msra.mxu0 %v2738_v13  ;;  %v3007_v11 = vld [vmem:[#allocation8 + $0x770] sm:$0xff]  ;;  %v2957_v13 = vld [vmem:[#allocation8 + $0x5e0] sm:$0xff] }
 0x210   : > { %2594 = vmatpush2.msra.mxu1 %v1874_v14  ;;  %2826 = vmatprep.subr.mxu0 %v2737_v15  ;;  %v3006_v14 = vld [vmem:[#allocation8 + $0x768] sm:$0xff]  ;;  %v2956_v15 = vld [vmem:[#allocation8 + $0x5d8] sm:$0xff] }
 0x211   : > { %2595 = vmatprep.subr.mxu1 %v1873_v17  ;;  %2827 = vmatpush2.msra.mxu0 %v2736_v18  ;;  %v3005_v17 = vld [vmem:[#allocation8 + $0x760] sm:$0xff]  ;;  %v2955_v18 = vld [vmem:[#allocation8 + $0x5d0] sm:$0xff] }
 0x212   : > { %2596 = vmatpush2.msra.mxu1 %v1872_v20  ;;  %2828 = vmatprep.subr.mxu0 %v2735_v23  ;;  %v3004_v20 = vld [vmem:[#allocation8 + $0x758] sm:$0xff]  ;;  %v2954_v23 = vld [vmem:[#allocation8 + $0x5c8] sm:$0xff] }
 0x213   : > { %2597 = vmatprep.subr.mxu1 %v1871_v22  ;;  %2829 = vmatpush2.msra.mxu0 %v2734_v25  ;;  %v3003_v22 = vld [vmem:[#allocation8 + $0x750] sm:$0xff]  ;;  %v2953_v25 = vld [vmem:[#allocation8 + $0x5c0] sm:$0xff] }
 0x214   : > { %2598 = vmatpush2.msra.mxu1 %v1870_v26  ;;  %2830 = vmatprep.subr.mxu0 %v2733_v24  ;;  %v3002_v26 = vld [vmem:[#allocation8 + $0x748] sm:$0xff]  ;;  %v2952_v24 = vld [vmem:[#allocation8 + $0x5b8] sm:$0xff] }
 0x215   : > { %2600 = vmatmul.mubr.f32.vlgmr.msra.gmra.mxu1 %v4717_v42  ;;  %2831 = vmatpush2.msra.mxu0 %v2732_v32  ;;  %v2756_v42 = vld [vmem:[#allocation6 + $0x740] sm:$0xff]  ;;  %v2951_v32 = vld [vmem:[#allocation8 + $0x5b0] sm:$0xff] }
 0x216   : > { %2871 = vmatprep.subr.mxu1 %v2763_v28  ;;  %2832 = vmatprep.subr.mxu0 %v2731_v33  ;;  %v3000_v28 = vld [vmem:[#allocation8 + $0x738] sm:$0xff]  ;;  %v2950_v33 = vld [vmem:[#allocation8 + $0x5a8] sm:$0xff] }
 0x217   : > { %2872 = vmatpush1.msra.mxu1 %v2762_v30  ;;  %2833 = vmatpush2.msra.mxu0 %v2730_v34  ;;  %v2999_v30 = vld [vmem:[#allocation8 + $0x730] sm:$0xff]  ;;  %v2949_v34 = vld [vmem:[#allocation8 + $0x5a0] sm:$0xff] }
 0x218   : > { %2873 = vmatprep.subr.mxu1 %v2761_v35  ;;  %2834 = vmatprep.subr.mxu0 %v2729_v36  ;;  %v2998_v35 = vld [vmem:[#allocation8 + $0x728] sm:$0xff]  ;;  %v2948_v36 = vld [vmem:[#allocation8 + $0x598] sm:$0xff] }
 0x219   : > { %2874 = vmatpush1.msra.mxu1 %v2760_v29  ;;  %2835 = vmatpush2.msra.mxu0 %v2728_v37  ;;  %v2997_v29 = vld [vmem:[#allocation8 + $0x720] sm:$0xff]  ;;  %v2947_v37 = vld [vmem:[#allocation8 + $0x590] sm:$0xff] }
 0x21a   : > { %2875 = vmatprep.subr.mxu1 %v2759_v38  ;;  %2836 = vmatprep.subr.mxu0 %v2727_v39  ;;  %v2996_v38 = vld [vmem:[#allocation8 + $0x718] sm:$0xff]  ;;  %v2946_v39 = vld [vmem:[#allocation8 + $0x588] sm:$0xff] }
 0x21b   : > { %2876 = vmatpush1.msra.mxu1 %v2758_v40  ;;  %2837 = vmatpush2.msra.mxu0 %v2726_v41  ;;  %v2995_v40 = vld [vmem:[#allocation8 + $0x710] sm:$0xff]  ;;  %v2945_v41 = vld [vmem:[#allocation8 + $0x580] sm:$0xff] }
 0x21c   : > { %2877 = vmatprep.subr.mxu1 %v2757_v31  ;;  %2838 = vmatprep.subr.mxu0 %v2725_v43  ;;  %v2994_v31 = vld [vmem:[#allocation8 + $0x708] sm:$0xff]  ;;  %v2944_v43 = vld [vmem:[#allocation8 + $0x578] sm:$0xff] }
 0x21d   : > { %2878 = vmatpush1.msra.mxu1 %v2756_v42  ;;  %2839 = vmatpush2.msra.mxu0 %v2724_v44  ;;  %v2993_v42 = vld [vmem:[#allocation8 + $0x700] sm:$0xff]  ;;  %v2943_v44 = vld [vmem:[#allocation8 + $0x570] sm:$0xff] }
 0x21e   : > { %2879 = vmatprep.subr.mxu1 %v2755_v45  ;;  %2840 = vmatprep.subr.mxu0 %v2723_v27  ;;  %v2942_v45 = vld [vmem:[#allocation8 + $0x568] sm:$0xff]  ;;  %v2941_v27 = vld [vmem:[#allocation8 + $0x560] sm:$0xff] }
 0x21f   : > { %2880 = vmatpush1.msra.mxu1 %v2754_v46  ;;  %2841 = vmatpush2.msra.mxu0 %v2722_v47  ;;  %v2940_v46 = vld [vmem:[#allocation8 + $0x558] sm:$0xff]  ;;  %v2939_v47 = vld [vmem:[#allocation8 + $0x550] sm:$0xff] }
 0x220   : > { %2881 = vmatprep.subr.mxu1 %v2753_v49  ;;  %2842 = vmatprep.subr.mxu0 %v2721_v50  ;;  %v2937_v49 = vld [vmem:[#allocation8 + $0x540] sm:$0xff]  ;;  %v2936_v50 = vld [vmem:[#allocation8 + $0x538] sm:$0xff] }
 0x221   : > { %2882 = vmatpush1.msra.mxu1 %v2752_v52  ;;  %2843 = vmatpush2.msra.mxu0 %v2720_v53  ;;  %v2934_v52 = vld [vmem:[#allocation8 + $0x528] sm:$0xff]  ;;  %v2932_v53 = vld [vmem:[#allocation8 + $0x518] sm:$0xff] }
 0x222   : > { %2883 = vmatprep.subr.mxu1 %v2751_v55  ;;  %2844 = vmatprep.subr.mxu0 %v2719_v59  ;;  %v2930_v55 = vld [vmem:[#allocation8 + $0x508] sm:$0xff]  ;;  %v2929_v59 = vld [vmem:[#allocation8 + $0x500] sm:$0xff] }
 0x223   : > { %2884 = vmatpush1.msra.mxu1 %v2750_v60  ;;  %2845 = vmatpush2.msra.mxu0 %v2718_v61  ;;  %v2991_v60 = vld [vmem:[#allocation8 + $0x6f0] sm:$0xff]  ;;  %v2990_v61 = vld [vmem:[#allocation8 + $0x6e8] sm:$0xff] }
 0x224   : > { %2885 = vmatprep.subr.mxu1 %v2749_v62  ;;  %2846 = vmatprep.subr.mxu0 %v2717_v12  ;;  %v2989_v62 = vld [vmem:[#allocation8 + $0x6e0] sm:$0xff]  ;;  %v2988_v12 = vld [vmem:[#allocation8 + $0x6d8] sm:$0xff] }
 0x225   : > { %2886 = vmatpush1.msra.mxu1 %v2748_v3  ;;  %2919 = vmatprep.mubr.f32.mxu1 %v4261_v1  ;;  %v2985_v3 = vld [vmem:[#allocation8 + $0x6c0] sm:$0xff] }
 0x226   : > { %2847 = vmatpush2.msra.mxu0 %v2716_v6  ;;  %3803 = vmatmul.mubr.msk.f32.vlgmr.msra.gmra.mxu1 %vm1585_vm2, %v4735_v7  ;;  %v2982_v6 = vld [vmem:[#allocation8 + $0x6a8] sm:$0xff] }
 0x227   : > { %3009 = vmatprep.subr.mxu1 %v2960_v0  ;;  %2849 = vmatmul.mubr.f32.vlgmr.msra.gmra.mxu0 %v4740_v9  ;;  %v2981_v0 = vld [vmem:[#allocation8 + $0x6a0] sm:$0xff] }
 0x228   : > { %3010 = vmatpush1.msra.mxu1 %v2959_v8  ;;  %3073 = vmatprep.mubr.f32.mxu1 %v4729_v58  ;;  %v3001_v58 = vld [vmem:[#allocation8 + $0x740] sm:$0xff]  ;;  %v2979_v8 = vld [vmem:[#allocation8 + $0x690] sm:$0xff] }
 0x229   : > { %3096 = vmatprep.subr.mxu0 %v3008_v10  ;;  %3011 = vmatprep.subr.mxu1 %v2958_v2  ;;  %v2978_v10 = vld [vmem:[#allocation8 + $0x688] sm:$0xff]  ;;  %v2977_v2 = vld [vmem:[#allocation8 + $0x680] sm:$0xff] }
 0x22a   : > { %3097 = vmatpush1.msra.mxu0 %v3007_v11  ;;  %3012 = vmatpush1.msra.mxu1 %v2957_v13  ;;  %v2976_v11 = vld [vmem:[#allocation8 + $0x678] sm:$0xff]  ;;  %v2975_v13 = vld [vmem:[#allocation8 + $0x670] sm:$0xff] }
 0x22b   : > { %3098 = vmatprep.subr.mxu0 %v3006_v14  ;;  %3013 = vmatprep.subr.mxu1 %v2956_v15  ;;  %v2974_v14 = vld [vmem:[#allocation8 + $0x668] sm:$0xff]  ;;  %v2973_v15 = vld [vmem:[#allocation8 + $0x660] sm:$0xff] }
 0x22c   : > { %3099 = vmatpush1.msra.mxu0 %v3005_v17  ;;  %3014 = vmatpush1.msra.mxu1 %v2955_v18  ;;  %v2972_v17 = vld [vmem:[#allocation8 + $0x658] sm:$0xff]  ;;  %v2971_v18 = vld [vmem:[#allocation8 + $0x650] sm:$0xff] }
 0x22d   : > { %3100 = vmatprep.subr.mxu0 %v3004_v20  ;;  %3015 = vmatprep.subr.mxu1 %v2954_v23  ;;  %v2970_v20 = vld [vmem:[#allocation8 + $0x648] sm:$0xff]  ;;  %v2969_v23 = vld [vmem:[#allocation8 + $0x640] sm:$0xff] }
 0x22e   : > { %3101 = vmatpush1.msra.mxu0 %v3003_v22  ;;  %3016 = vmatpush1.msra.mxu1 %v2953_v25  ;;  %v2968_v22 = vld [vmem:[#allocation8 + $0x638] sm:$0xff]  ;;  %v2967_v25 = vld [vmem:[#allocation8 + $0x630] sm:$0xff] }
 0x22f   : > { %3102 = vmatprep.subr.mxu0 %v3002_v26  ;;  %3017 = vmatprep.subr.mxu1 %v2952_v24  ;;  %v2966_v26 = vld [vmem:[#allocation8 + $0x628] sm:$0xff]  ;;  %v2965_v24 = vld [vmem:[#allocation8 + $0x620] sm:$0xff] }
 0x230   : > { %3103 = vmatpush1.msra.mxu0 %v3001_v58  ;;  %3018 = vmatpush1.msra.mxu1 %v2951_v32  ;;  %v2964_v58 = vld [vmem:[#allocation8 + $0x618] sm:$0xff]  ;;  %v2963_v32 = vld [vmem:[#allocation8 + $0x610] sm:$0xff] }
 0x231   : > { %3104 = vmatprep.subr.mxu0 %v3000_v28  ;;  %3019 = vmatprep.subr.mxu1 %v2950_v33  ;;  %v2962_v28 = vld [vmem:[#allocation8 + $0x608] sm:$0xff]  ;;  %v2961_v33 = vld [vmem:[#allocation8 + $0x600] sm:$0xff] }
 0x232   : > { %3105 = vmatpush1.msra.mxu0 %v2999_v30  ;;  %3020 = vmatpush1.msra.mxu1 %v2949_v34  ;;  %v3212_v30 = vld [vmem:[#allocation9 + $0xf8] sm:$0xff] }
 0x233   : > { %3106 = vmatprep.subr.mxu0 %v2998_v35  ;;  %3021 = vmatprep.subr.mxu1 %v2948_v36  ;;  %v3196_v34 = vld [vmem:[#allocation9 + $0x78] sm:$0xff]  ;;  %v3211_v36 = vld [vmem:[#allocation9 + $0xf0] sm:$0xff] }
 0x234   : > { %3107 = vmatpush1.msra.mxu0 %v2997_v29  ;;  %3022 = vmatpush1.msra.mxu1 %v2947_v37  ;;  %v3245_v35 = vld [vmem:[#allocation9 + $0x1f8] sm:$0xff]  ;;  %v3195_v37 = vld [vmem:[#allocation9 + $0x70] sm:$0xff] }
 0x235   : > { %3108 = vmatprep.subr.mxu0 %v2996_v38  ;;  %3023 = vmatprep.subr.mxu1 %v2946_v39  ;;  %v3229_v29 = vld [vmem:[#allocation9 + $0x178] sm:$0xff]  ;;  %v3244_v38 = vld [vmem:[#allocation9 + $0x1f0] sm:$0xff]  ;;  %v3210_v39 = vld [vmem:[#allocation9 + $0xe8] sm:$0xff] }
 0x236   : > { %3109 = vmatpush1.msra.mxu0 %v2995_v40  ;;  %3024 = vmatpush1.msra.mxu1 %v2945_v41  ;;  %v3228_v40 = vld [vmem:[#allocation9 + $0x170] sm:$0xff]  ;;  %v3194_v41 = vld [vmem:[#allocation9 + $0x68] sm:$0xff] }
 0x237   : > { %3110 = vmatprep.subr.mxu0 %v2994_v31  ;;  %3025 = vmatprep.subr.mxu1 %v2944_v43  ;;  %v3243_v31 = vld [vmem:[#allocation9 + $0x1e8] sm:$0xff] }
 0x238   : > { %3111 = vmatpush1.msra.mxu0 %v2993_v42  ;;  %3144 = vmatprep.mubr.f32.mxu0 %v4261_v1  ;;  %v2933_v1 = vld [vmem:[#allocation8 + $0x520] sm:$0xff]  ;;  %v3227_v43 = vld [vmem:[#allocation9 + $0x168] sm:$0xff] }
 0x239   : > { %3026 = vmatpush1.msra.mxu1 %v2943_v44  ;;  %3804 = vmatmul.mubr.msk.f32.vlgmr.msra.gmra.mxu0 %vm1585_vm2, %v4735_v7  ;;  %v2980_v7 = vld [vmem:[#allocation8 + $0x698] sm:$0xff]  ;;  %v3242_v42 = vld [vmem:[#allocation9 + $0x1e0] sm:$0xff] }
 0x23a   : > { %3027 = vmatprep.subr.mxu1 %v2942_v45  ;;  %3849 = vmatprep.subr.mxu0 %v3245_v35  ;;  %v3193_v44 = vld [vmem:[#allocation9 + $0x60] sm:$0xff]  ;;  %v3532_v35 = vld [vmem:[#allocation9 + $0x3f8] sm:$0xff] }
 0x23b   : > { %3028 = vmatpush1.msra.mxu1 %v2941_v27  ;;  %3850 = vmatpush3.msra.mxu0 %v3229_v29  ;;  %v3226_v45 = vld [vmem:[#allocation9 + $0x160] sm:$0xff]  ;;  %v3208_v27 = vld [vmem:[#allocation9 + $0xd8] sm:$0xff] }
 0x23c   : > { %3029 = vmatprep.subr.mxu1 %v2940_v46  ;;  %3851 = vmatprep.subr.mxu0 %v3244_v38  ;;  %v3241_v46 = vld [vmem:[#allocation9 + $0x1d8] sm:$0xff] }
 0x23d   : > { %3030 = vmatpush1.msra.mxu1 %v2939_v47  ;;  %3852 = vmatpush3.msra.mxu0 %v3228_v40  ;;  %v3192_v47 = vld [vmem:[#allocation9 + $0x58] sm:$0xff] }
 0x23e   : > { %3031 = vmatprep.subr.mxu1 %v2938_v48  ;;  %3853 = vmatprep.subr.mxu0 %v3243_v31  ;;  %v3225_v48 = vld [vmem:[#allocation9 + $0x158] sm:$0xff] }
 0x23f   : > { %3032 = vmatpush1.msra.mxu1 %v2937_v49  ;;  %3854 = vmatpush3.msra.mxu0 %v3227_v43  ;;  %v3207_v49 = vld [vmem:[#allocation9 + $0xd0] sm:$0xff]  ;;  %v3424_v29 = vld [vmem:[#allocation9 + $0x2f8] sm:$0xff] }
 0x240   : > { %3033 = vmatprep.subr.mxu1 %v2936_v50  ;;  %3855 = vmatprep.subr.mxu0 %v3242_v42  ;;  %v3240_v50 = vld [vmem:[#allocation9 + $0x1d0] sm:$0xff]  ;;  %v2091_v38 = vpop.f32.mrf.mxu0 }
 0x241   : > { %3034 = vmatpush1.msra.mxu1 %v2935_v51  ;;  %3856 = vmatpush3.msra.mxu0 %v3226_v45  ;;  %v3191_v51 = vld [vmem:[#allocation9 + $0x50] sm:$0xff] }
 0x242   : > { %3035 = vmatprep.subr.mxu1 %v2934_v52  ;;  %3857 = vmatprep.subr.mxu0 %v3241_v46  ;;  %v3224_v52 = vld [vmem:[#allocation9 + $0x150] sm:$0xff]  ;;  %v2093_v40 = vpop.f32.mrf.mxu0 }
 0x243   : > { %3036 = vmatpush1.msra.mxu1 %v2933_v1  ;;  %3858 = vmatpush3.msra.mxu0 %v3225_v48  ;;  %v3206_v1 = vld [vmem:[#allocation9 + $0xc8] sm:$0xff] }
 0x244   : > { %3037 = vmatprep.subr.mxu1 %v2932_v53  ;;  %v3239_v53 = vld [vmem:[#allocation9 + $0x1c8] sm:$0xff]  ;;  %3859 = vmatprep.subr.mxu0 %v3240_v50 }
 0x245   : > { %3038 = vmatpush1.msra.mxu1 %v2931_v54  ;;  %v3190_v54 = vld [vmem:[#allocation9 + $0x48] sm:$0xff]  ;;  %3860 = vmatpush3.msra.mxu0 %v3224_v52 }
 0x246   : > { %3039 = vmatprep.subr.mxu1 %v2930_v55  ;;  %v3205_v55 = vld [vmem:[#allocation9 + $0xc0] sm:$0xff]  ;;  %3861 = vmatprep.subr.mxu0 %v3239_v53 }
 0x247   : > { %3040 = vmatpush1.msra.mxu1 %v2929_v59  ;;  %v3223_v59 = vld [vmem:[#allocation9 + $0x148] sm:$0xff] }
 0x248   : > { %3041 = vmatprep.subr.mxu1 %v2992_v57  ;;  %v3189_v57 = vld [vmem:[#allocation9 + $0x40] sm:$0xff]  ;;  %3862 = vmatpush3.msra.mxu0 %v3223_v59 }
 0x249   : > { %3042 = vmatpush2.msra.mxu1 %v2991_v60  ;;  %v3238_v60 = vld [vmem:[#allocation9 + $0x1c0] sm:$0xff] }
 0x24a   : > { %3043 = vmatprep.subr.mxu1 %v2990_v61  ;;  %v3204_v61 = vld [vmem:[#allocation9 + $0xb8] sm:$0xff]  ;;  %3863 = vmatprep.subr.mxu0 %v3238_v60 }
 0x24b   : > { %3044 = vmatpush2.msra.mxu1 %v2989_v62  ;;  %v3222_v62 = vld [vmem:[#allocation9 + $0x140] sm:$0xff] }
 0x24c   : > { %3045 = vmatprep.subr.mxu1 %v2988_v12  ;;  %v3188_v12 = vld [vmem:[#allocation9 + $0x38] sm:$0xff]  ;;  %3864 = vmatpush3.msra.mxu0 %v3222_v62 }
 0x24d   : > { %3046 = vmatpush2.msra.mxu1 %v2987_v56  ;;  %v3237_v56 = vld [vmem:[#allocation9 + $0x1b8] sm:$0xff] }
 0x24e   : > { %3047 = vmatprep.subr.mxu1 %v2986_v63  ;;  %v3203_v63 = vld [vmem:[#allocation9 + $0xb0] sm:$0xff]  ;;  %3865 = vmatprep.subr.mxu0 %v3237_v56 }
 0x24f   : > { %3048 = vmatpush2.msra.mxu1 %v2985_v3  ;;  %v3221_v3 = vld [vmem:[#allocation9 + $0x138] sm:$0xff] }
 0x250   : > { %3049 = vmatprep.subr.mxu1 %v2984_v4  ;;  %v3187_v4 = vld [vmem:[#allocation9 + $0x30] sm:$0xff]  ;;  %3866 = vmatpush3.msra.mxu0 %v3221_v3 }
 0x251   : > { %3050 = vmatpush2.msra.mxu1 %v2983_v5  ;;  %v3236_v5 = vld [vmem:[#allocation9 + $0x1b0] sm:$0xff] }
 0x252   : > { %3051 = vmatprep.subr.mxu1 %v2982_v6  ;;  %v3202_v6 = vld [vmem:[#allocation9 + $0xa8] sm:$0xff]  ;;  %3867 = vmatprep.subr.mxu0 %v3236_v5 }
 0x253   : > { %3052 = vmatpush2.msra.mxu1 %v2981_v0  ;;  %v3220_v0 = vld [vmem:[#allocation9 + $0x130] sm:$0xff] }
 0x254   : > { %3053 = vmatprep.subr.mxu1 %v2980_v7  ;;  %v3186_v7 = vld [vmem:[#allocation9 + $0x28] sm:$0xff]  ;;  %3868 = vmatpush3.msra.mxu0 %v3220_v0 }
 0x255   : > { %3054 = vmatpush2.msra.mxu1 %v2979_v8  ;;  %v3235_v8 = vld [vmem:[#allocation9 + $0x1a8] sm:$0xff] }
 0x256   : > { %3055 = vmatprep.subr.mxu1 %v2978_v10  ;;  %v3201_v10 = vld [vmem:[#allocation9 + $0xa0] sm:$0xff]  ;;  %3869 = vmatprep.subr.mxu0 %v3235_v8 }
 0x257   : > { %3056 = vmatpush2.msra.mxu1 %v2977_v2  ;;  %v3219_v2 = vld [vmem:[#allocation9 + $0x128] sm:$0xff] }
 0x258   : > { %3057 = vmatprep.subr.mxu1 %v2976_v11  ;;  %v3185_v11 = vld [vmem:[#allocation9 + $0x20] sm:$0xff]  ;;  %3870 = vmatpush3.msra.mxu0 %v3219_v2 }
 0x259   : > { %3058 = vmatpush2.msra.mxu1 %v2975_v13  ;;  %v3234_v13 = vld [vmem:[#allocation9 + $0x1a0] sm:$0xff] }
 0x25a   : > { %3059 = vmatprep.subr.mxu1 %v2974_v14  ;;  %v3200_v14 = vld [vmem:[#allocation9 + $0x98] sm:$0xff]  ;;  %3871 = vmatprep.subr.mxu0 %v3234_v13 }
 0x25b   : > { %3060 = vmatpush2.msra.mxu1 %v2973_v15  ;;  %v3218_v15 = vld [vmem:[#allocation9 + $0x120] sm:$0xff] }
 0x25c   : > { %3061 = vmatprep.subr.mxu1 %v2972_v17  ;;  %v3184_v17 = vld [vmem:[#allocation9 + $0x18] sm:$0xff]  ;;  %3872 = vmatpush3.msra.mxu0 %v3218_v15 }
 0x25d   : > { %3062 = vmatpush2.msra.mxu1 %v2971_v18  ;;  %v3233_v18 = vld [vmem:[#allocation9 + $0x198] sm:$0xff] }
 0x25e   : > { %3063 = vmatprep.subr.mxu1 %v2970_v20  ;;  %v3199_v20 = vld [vmem:[#allocation9 + $0x90] sm:$0xff]  ;;  %3873 = vmatprep.subr.mxu0 %v3233_v18 }
 0x25f   : > { %3064 = vmatpush2.msra.mxu1 %v2969_v23  ;;  %v3217_v23 = vld [vmem:[#allocation9 + $0x118] sm:$0xff] }
 0x260   : > { %3065 = vmatprep.subr.mxu1 %v2968_v22  ;;  %v3183_v22 = vld [vmem:[#allocation9 + $0x10] sm:$0xff]  ;;  %3874 = vmatpush3.msra.mxu0 %v3217_v23 }
 0x261   : > { %3066 = vmatpush2.msra.mxu1 %v2967_v25  ;;  %v3232_v25 = vld [vmem:[#allocation9 + $0x190] sm:$0xff] }
 0x262   : > { %3067 = vmatprep.subr.mxu1 %v2966_v26  ;;  %v3198_v26 = vld [vmem:[#allocation9 + $0x88] sm:$0xff]  ;;  %3875 = vmatprep.subr.mxu0 %v3232_v25 }
 0x263   : > { %3068 = vmatpush2.msra.mxu1 %v2965_v24  ;;  %v3216_v24 = vld [vmem:[#allocation9 + $0x110] sm:$0xff] }
 0x264   : > { %3069 = vmatprep.subr.mxu1 %v2964_v58  ;;  %v3182_v58 = vld [vmem:[#allocation9 + $0x8] sm:$0xff]  ;;  %3876 = vmatpush3.msra.mxu0 %v3216_v24 }
 0x265   : > { %3070 = vmatpush2.msra.mxu1 %v2963_v32  ;;  %v3231_v32 = vld [vmem:[#allocation9 + $0x188] sm:$0xff] }
 0x266   : > { %3071 = vmatprep.subr.mxu1 %v2962_v28  ;;  %v3197_v28 = vld [vmem:[#allocation9 + $0x80] sm:$0xff]  ;;  %3877 = vmatprep.subr.mxu0 %v3231_v32 }
 0x267   : > { %3072 = vmatpush2.msra.mxu1 %v2961_v33  ;;  %v3215_v33 = vld [vmem:[#allocation9 + $0x108] sm:$0xff] }
 0x268   : > { %3074 = vmatmul.mubr.f32.vlgmr.msra.gmra.mxu1 %v4740_v9  ;;  %3884 = vmatprep.subr.mxu1 %v3212_v30  ;;  %v3209_v9 = vld [vmem:[#allocation9 + $0xe0] sm:$0xff] }
 0x269   : > { %3885 = vmatpush3.msra.mxu1 %v3196_v34  ;;  %v3181_v30 = vld [vmem:[#allocation9] sm:$0xff]  ;;  %3878 = vmatpush3.msra.mxu0 %v3215_v33 }
 0x26a   : > { %3886 = vmatprep.subr.mxu1 %v3211_v36  ;;  %v3230_v34 = vld [vmem:[#allocation9 + $0x180] sm:$0xff] }
 0x26b   : > { %3887 = vmatpush3.msra.mxu1 %v3195_v37  ;;  %v3214_v36 = vld [vmem:[#allocation9 + $0x100] sm:$0xff]  ;;  %3879 = vmatprep.subr.mxu0 %v3230_v34  ;;  %v2162_v37 = vpop.f32.mrf.mxu1 }
 0x26c   : > { %3888 = vmatprep.subr.mxu1 %v3210_v39  ;;  %3880 = vmatpush3.msra.mxu0 %v3214_v36  ;;  %v2163_v52 = vadd.f32 %v2162_v37, %v2091_v38  ;;  %v3408_v38 = vld [vmem:[#allocation9 + $0x278] sm:$0xff] }
 0x26d   : > { %3889 = vmatpush3.msra.mxu1 %v3194_v41  ;;  %3919 = vmatprep.subr.mxu0 %v3424_v29  ;;  %v2164_v39 = vpop.f32.mrf.mxu1  ;;  %v2307_v41 = vpop.f32.mrf.mxu0  ;;  %v3515_v29 = vld [vmem:[#allocation9 + $0x370] sm:$0xff] }
 0x26e   : > { %3890 = vmatprep.subr.mxu1 %v3209_v9 }
 0x26f   : > { %3891 = vmatpush3.msra.mxu1 %v3193_v44  ;;  %v2309_v9 = vpop.f32.mrf.mxu0 }
 0x270   : > { %3892 = vmatprep.subr.mxu1 %v3208_v27 }
 0x271   : > { %3893 = vmatpush3.msra.mxu1 %v3192_v47 }
 0x272   : > { %3894 = vmatprep.subr.mxu1 %v3207_v49 }
 0x273   : > { %3895 = vmatpush3.msra.mxu1 %v3191_v51 }
 0x274   : > { %3896 = vmatprep.subr.mxu1 %v3206_v1  ;;  %v2165_v1 = vadd.f32 %v2164_v39, %v2093_v40  ;;  %v3423_v39 = vld [vmem:[#allocation9 + $0x2f0] sm:$0xff] }
 0x275   : > { %3897 = vmatpush3.msra.mxu1 %v3190_v54 }
 0x276   : > { %3898 = vmatprep.subr.mxu1 %v3205_v55 }
 0x277   : > { %3899 = vmatpush3.msra.mxu1 %v3189_v57 }
 0x278   : > { %3900 = vmatprep.subr.mxu1 %v3204_v61 }
 0x279   : > { %3901 = vmatpush3.msra.mxu1 %v3188_v12  ;;  %v3153_v12 = vld [vmem:[%s4780_s6] sm:$0x3] }
 0x27a   : > { %3902 = vmatprep.subr.mxu1 %v3203_v63  ;;  %v3158_v5 = vrot.slane %v3153_v12, %v1546_v19  ;;  %v3162_v2 = vrot.slane %v3153_v12, %v1550_v21  ;;  %v3516_v21 = vld [vmem:[#allocation9 + $0x378] sm:$0xff] }
 0x27b   : > { %3903 = vmatpush3.msra.mxu1 %v3187_v4  ;;  %v3524_v12 = vld [vmem:[#allocation9 + $0x3b8] sm:$0xff] }
 0x27c   : > { %3904 = vmatprep.subr.mxu1 %v3202_v6 }
 0x27d   : > { %3905 = vmatpush3.msra.mxu1 %v3186_v7 }
 0x27e   : > { %3906 = vmatprep.subr.mxu1 %v3201_v10 }
 0x27f   : > { %3907 = vmatpush3.msra.mxu1 %v3185_v11 }
 0x280   : > { %3908 = vmatprep.subr.mxu1 %v3200_v14 }
 0x281   : > { %3909 = vmatpush3.msra.mxu1 %v3184_v17  ;;  %v2236_v31 = vpop.f32.mrf.mxu1 }
 0x282   : > { %3910 = vmatprep.subr.mxu1 %v3199_v20  ;;  %v2237_v53 = vadd.f32 %v2236_v31, %v2163_v52  ;;  %v3407_v31 = vld [vmem:[#allocation9 + $0x270] sm:$0xff] }
 0x283   : > { %3911 = vmatpush3.msra.mxu1 %v3183_v22  ;;  %v2238_v43 = vpop.f32.mrf.mxu1  ;;  %v3511_v52 = vld [vmem:[#allocation9 + $0x350] sm:$0xff] }
 0x284   : > { %3912 = vmatprep.subr.mxu1 %v3198_v26  ;;  %v2239_v57 = vadd.f32 %v2238_v43, %v2165_v1  ;;  %v2308_v63 = vadd.f32 %v2307_v41, %v2237_v53  ;;  %v3530_v41 = vld [vmem:[#allocation9 + $0x3e8] sm:$0xff]  ;;  %v3419_v1 = vld [vmem:[#allocation9 + $0x2d0] sm:$0xff] }
 0x285   : > { %3913 = vmatpush3.msra.mxu1 %v3182_v58  ;;  %v3422_v43 = vld [vmem:[#allocation9 + $0x2e8] sm:$0xff] }
 0x286   : > { %3914 = vmatprep.subr.mxu1 %v3197_v28  ;;  %v2310_v0 = vadd.f32 %v2309_v9, %v2239_v57  ;;  %v3514_v9 = vld [vmem:[#allocation9 + $0x368] sm:$0xff]  ;;  %v3525_v57 = vld [vmem:[#allocation9 + $0x3c0] sm:$0xff] }
 0x287   : > { %3915 = vmatpush3.msra.mxu1 %v3181_v30  ;;  %v3526_v53 = vld [vmem:[#allocation9 + $0x3c8] sm:$0xff] }
 0x288   : > { %3954 = vmatprep.subr.mxu1 %v3532_v35  ;;  %v3531_v35 = vld [vmem:[#allocation9 + $0x3f0] sm:$0xff] }
 0x292   : > { %v2530_v42 = vpop.f32.mrf.mxu1 }
 0x293   : > { %v2459_v44 = vpop.f32.mrf.mxu0 }
 0x294   : > { %v2532_v45 = vpop.f32.mrf.mxu1  ;;  %v2531_v54 = vadd.f32 %v2530_v42, %v2459_v44  ;;  %v3529_v42 = vld [vmem:[#allocation9 + $0x3e0] sm:$0xff]  ;;  %v3406_v44 = vld [vmem:[#allocation9 + $0x268] sm:$0xff] }
 0x295   : > { %v2461_v27 = vpop.f32.mrf.mxu0 }
 0x296   : > { %v2533_v60 = vadd.f32 %v2532_v45, %v2461_v27  ;;  %v3513_v45 = vld [vmem:[#allocation9 + $0x360] sm:$0xff] }
 0x297   : > { %v3421_v27 = vld [vmem:[#allocation9 + $0x2e0] sm:$0xff] }
 0x2a5   : > { %v2672_v46 = vpop.f32.mrf.mxu0 }
 0x2a7   : > { %v2674_v48 = vpop.f32.mrf.mxu0 }
 0x2d5   : > { %v2601_v47 = vpop.f32.mrf.mxu1 }
 0x2d6   : > { %v2602_v61 = vadd.f32 %v2601_v47, %v2531_v54  ;;  %v3405_v47 = vld [vmem:[#allocation9 + $0x260] sm:$0xff]  ;;  %v3403_v54 = vld [vmem:[#allocation9 + $0x250] sm:$0xff] }
 0x2d7   : > { %v2603_v49 = vpop.f32.mrf.mxu1 }
 0x2d8   : > { %v2604_v3 = vadd.f32 %v2603_v49, %v2533_v60  ;;  %v2673_v7 = vadd.f32 %v2672_v46, %v2602_v61  ;;  %v3528_v46 = vld [vmem:[#allocation9 + $0x3d8] sm:$0xff]  ;;  %v3402_v60 = vld [vmem:[#allocation9 + $0x248] sm:$0xff]  ;;  %v3509_v61 = vld [vmem:[#allocation9 + $0x340] sm:$0xff] }
 0x2d9   : > { %v3420_v49 = vld [vmem:[#allocation9 + $0x2d8] sm:$0xff] }
 0x2da   : > { %v2675_v14 = vadd.f32 %v2674_v48, %v2604_v3  ;;  %v3512_v48 = vld [vmem:[#allocation9 + $0x358] sm:$0xff] }
 0x2db   : > { %v3416_v3 = vld [vmem:[#allocation9 + $0x2b8] sm:$0xff] }
 0x2e6   : > { %v2921_v50 = vpop.f32.mrf.mxu1 }
 0x2e7   : > { %v2850_v51 = vpop.f32.mrf.mxu0 }
 0x2e8   : > { %v2923_v55 = vpop.f32.mrf.mxu1  ;;  %v2922_v62 = vadd.f32 %v2921_v50, %v2850_v51  ;;  %v3527_v50 = vld [vmem:[#allocation9 + $0x3d0] sm:$0xff]  ;;  %v3404_v51 = vld [vmem:[#allocation9 + $0x258] sm:$0xff] }
 0x2e9   : > { %v2852_v59 = vpop.f32.mrf.mxu0 }
 0x2ea   : > { %v2924_v4 = vadd.f32 %v2923_v55, %v2852_v59  ;;  %v2926_v8 = vadd.f32 %v2922_v62, %v2308_v63  ;;  %v3510_v55 = vld [vmem:[#allocation9 + $0x348] sm:$0xff]  ;;  %v3417_v62 = vld [vmem:[#allocation9 + $0x2c0] sm:$0xff]  ;;  %v3508_v63 = vld [vmem:[#allocation9 + $0x338] sm:$0xff] }
 0x2eb   : > { %v3418_v59 = vld [vmem:[#allocation9 + $0x2c8] sm:$0xff] }
 0x2ec   : > { %v2927_v15 = vadd.f32 %v2924_v4, %v2310_v0  ;;  %v3165_v20 = vadd.f32 %v3158_v5, %v2926_v8  ;;  %v3523_v4 = vld [vmem:[#allocation9 + $0x3b0] sm:$0xff] }
 0x2ed   : > { %v3415_v0 = vld [vmem:[#allocation9 + $0x2b0] sm:$0xff] }
 0x2ee   : > { %v3166_v25 = vadd.f32 %v3162_v2, %v2927_v15  ;;  %v3399_v8 = vld [vmem:[#allocation9 + $0x230] sm:$0xff]  ;;  %v3413_v15 = vld [vmem:[#allocation9 + $0x2a0] sm:$0xff] }
 0x2f9   : > { %v3146_v56 = vpop.f32.mrf.mxu0 }
 0x2fb   : > { %v3148_v11 = vpop.f32.mrf.mxu0 }
 0x328   : > { %v3075_v6 = vpop.f32.mrf.mxu1 }
 0x329   : > { %v3147_v10 = vadd.f32 %v3146_v56, %v3075_v6  ;;  %v3401_v56 = vld [vmem:[#allocation9 + $0x240] sm:$0xff]  ;;  %v3507_v6 = vld [vmem:[#allocation9 + $0x330] sm:$0xff] }
 0x32a   : > { %v3077_v13 = vpop.f32.mrf.mxu1 }
 0x32b   : > { %v3151_v17 = vadd.f32 %v3147_v10, %v2673_v7  ;;  %v3149_v18 = vadd.f32 %v3148_v11, %v3077_v13  ;;  %v3522_v7 = vld [vmem:[#allocation9 + $0x3a8] sm:$0xff]  ;;  %v3521_v11 = vld [vmem:[#allocation9 + $0x3a0] sm:$0xff] }
 0x32c   : > { %v3506_v10 = vld [vmem:[#allocation9 + $0x328] sm:$0xff] }
 0x32d   : > { %v3167_v23 = vadd.f32 %v3158_v5, %v3151_v17  ;;  %v3152_v22 = vadd.f32 %v3149_v18, %v2675_v14  ;;  %v3400_v5 = vld [vmem:[#allocation9 + $0x238] sm:$0xff]  ;;  %v3398_v13 = vld [vmem:[#allocation9 + $0x228] sm:$0xff]  ;;  %v3505_v14 = vld [vmem:[#allocation9 + $0x320] sm:$0xff] }
 0x32e   : > { %v3520_v17 = vld [vmem:[#allocation9 + $0x398] sm:$0xff]  ;;  %v3397_v18 = vld [vmem:[#allocation9 + $0x220] sm:$0xff] }
 0x32f   : > { %v3169_v26 = vmax.f32 %v3165_v20, %v3167_v23  ;;  %v3168_v19 = vadd.f32 %v3162_v2, %v3152_v22  ;;  %v3414_v2 = vld [vmem:[#allocation9 + $0x2a8] sm:$0xff]  ;;  %v3504_v20 = vld [vmem:[#allocation9 + $0x318] sm:$0xff]  ;;  %v3519_v22 = vld [vmem:[#allocation9 + $0x390] sm:$0xff] }
 0x330   : > { %v3412_v23 = vld [vmem:[#allocation9 + $0x298] sm:$0xff] }
 0x331   : > { %v3171_v24 = vmax.f32 %v3169_v26, 0.0  ;;  %v3170_v58 = vmax.f32 %v3166_v25, %v3168_v19  ;;  %v3396_v25 = vld [vmem:[#allocation9 + $0x218] sm:$0xff]  ;;  %v3503_v26 = vld [vmem:[#allocation9 + $0x310] sm:$0xff] }
 0x332   : > { %v3411_v19 = vld [vmem:[#allocation9 + $0x290] sm:$0xff] }
 0x333   : > { %v3175_v32 = vrot.slane %v3171_v24, 1  ;;  %v3172_v28 = vmax.f32 %v3170_v58, 0.0  ;;  %v3395_v58 = vld [vmem:[#allocation9 + $0x210] sm:$0xff] }
 0x335   : > { %v3176_v33 = vrot.slane %v3172_v28, 1  ;;  %v4755_v16 = vmax.f32 %v3171_v24, %v3175_v32  ;;  %v3518_v24 = vld [vmem:[#allocation9 + $0x388] sm:$0xff] }
 0x336   : > { %v3502_v32 = vld [vmem:[#allocation9 + $0x308] sm:$0xff] }
 0x337   : > { %v3180_v30 = vmax.f32 %v3172_v28, %v3176_v33  ;;  %v3248_v37 = vrot.slane %v4755_v16, 2  ;;  %v3410_v28 = vld [vmem:[#allocation9 + $0x288] sm:$0xff]  ;;  %v3517_v33 = vld [vmem:[#allocation9 + $0x380] sm:$0xff] }
 0x339   : > { %3386 = vmatprep.mubr.f32.mxu1 %v3180_v30  ;;  %v3249_v34 = vrot.slane %v3180_v30, 2  ;;  %v3534_v36 = vrot.slane %v3180_v30, 6  ;;  %v3426_v40 = vrot.slane %v3180_v30, 4  ;;  %v3394_v30 = vld [vmem:[#allocation9 + $0x208] sm:$0xff] }
 0x33a   : > { %3387 = vmatmul.mubr.f32.vlgmr.msra.gmra.mxu1 %v4755_v16 }
 0x33b   : > { %3955 = vmatpush3.msra.mxu1 %v3516_v21  ;;  %3316 = vmatprep.mubr.f32.mxu0 %v3249_v34  ;;  %v3501_v21 = vld [vmem:[#allocation9 + $0x300] sm:$0xff] }
 0x33c   : > { %3956 = vmatprep.subr.mxu1 %v3531_v35  ;;  %3601 = vmatprep.mubr.f32.mxu1 %v3534_v36  ;;  %v3409_v34 = vld [vmem:[#allocation9 + $0x280] sm:$0xff]  ;;  %v3533_v35 = vrot.slane %v4755_v16, 6 }
 0x33d   : > { %3317 = vmatmul.mubr.f32.vlgmr.msra.gmra.mxu0 %v3248_v37  ;;  %3957 = vmatpush3.msra.mxu1 %v3515_v29  ;;  %v3393_v36 = vld [vmem:[#allocation9 + $0x200] sm:$0xff]  ;;  %v3425_v29 = vrot.slane %v4755_v16, 4 }
 0x33e   : > { %3920 = vmatpush3.msra.mxu0 %v3408_v38  ;;  %3493 = vmatprep.mubr.f32.mxu0 %v3426_v40  ;;  %v3608_v16 = vld [vmem:[%s4782_s8] sm:$0x1] }
 0x33f   : > { %3921 = vmatprep.subr.mxu0 %v3423_v39  ;;  %3958 = vmatprep.subr.mxu1 %v3530_v41 }
 0x340   : > { %3922 = vmatpush3.msra.mxu0 %v3407_v31  ;;  %3959 = vmatpush3.msra.mxu1 %v3514_v9 }
 0x341   : > { %3923 = vmatprep.subr.mxu0 %v3422_v43  ;;  %3960 = vmatprep.subr.mxu1 %v3529_v42 }
 0x342   : > { %3924 = vmatpush3.msra.mxu0 %v3406_v44  ;;  %3961 = vmatpush3.msra.mxu1 %v3513_v45 }
 0x343   : > { %3925 = vmatprep.subr.mxu0 %v3421_v27  ;;  %3962 = vmatprep.subr.mxu1 %v3528_v46 }
 0x344   : > { %3926 = vmatpush3.msra.mxu0 %v3405_v47  ;;  %3963 = vmatpush3.msra.mxu1 %v3512_v48 }
 0x345   : > { %3927 = vmatprep.subr.mxu0 %v3420_v49  ;;  %3964 = vmatprep.subr.mxu1 %v3527_v50  ;;  %v3611_v50 = vld [vmem:[%s4783_s9] sm:$0x1] }
 0x346   : > { %3928 = vmatpush3.msra.mxu0 %v3404_v51  ;;  %3965 = vmatpush3.msra.mxu1 %v3511_v52 }
 0x347   : > { %3929 = vmatprep.subr.mxu0 %v3419_v1  ;;  %3966 = vmatprep.subr.mxu1 %v3526_v53  ;;  %v4263_v53 = vmov 0  }
 0x348   : > { %3930 = vmatpush3.msra.mxu0 %v3403_v54  ;;  %3967 = vmatpush3.msra.mxu1 %v3510_v55  ;;  %v3617_v54 = vld [vmem:[#allocation3] sm:$0x1] }
 0x349   : > { %3931 = vmatprep.subr.mxu0 %v3418_v59  ;;  %3968 = vmatprep.subr.mxu1 %v3525_v57 }
 0x34a   : > { %3932 = vmatpush3.msra.mxu0 %v3402_v60  ;;  %3969 = vmatpush3.msra.mxu1 %v3509_v61 }
 0x34b   : > { %3933 = vmatprep.subr.mxu0 %v3417_v62  ;;  %3970 = vmatprep.subr.mxu1 %v3524_v12 }
 0x34c   : > { %3934 = vmatpush3.msra.mxu0 %v3401_v56  ;;  %3971 = vmatpush3.msra.mxu1 %v3508_v63 }
 0x34d   : > { %3935 = vmatprep.subr.mxu0 %v3416_v3  ;;  %3972 = vmatprep.subr.mxu1 %v3523_v4 }
 0x34e   : > { %3936 = vmatpush3.msra.mxu0 %v3400_v5  ;;  %3973 = vmatpush3.msra.mxu1 %v3507_v6 }
 0x34f   : > { %3937 = vmatprep.subr.mxu0 %v3415_v0  ;;  %3974 = vmatprep.subr.mxu1 %v3522_v7 }
 0x350   : > { %3938 = vmatpush3.msra.mxu0 %v3399_v8  ;;  %3975 = vmatpush3.msra.mxu1 %v3506_v10 }
 0x351   : > { %3939 = vmatprep.subr.mxu0 %v3414_v2  ;;  %3976 = vmatprep.subr.mxu1 %v3521_v11 }
 0x352   : > { %3940 = vmatpush3.msra.mxu0 %v3398_v13  ;;  %3977 = vmatpush3.msra.mxu1 %v3505_v14 }
 0x353   : > { %3941 = vmatprep.subr.mxu0 %v3413_v15  ;;  %3978 = vmatprep.subr.mxu1 %v3520_v17 }
 0x354   : > { %3942 = vmatpush3.msra.mxu0 %v3397_v18  ;;  %3979 = vmatpush3.msra.mxu1 %v3504_v20 }
 0x355   : > { %3943 = vmatprep.subr.mxu0 %v3412_v23  ;;  %3980 = vmatprep.subr.mxu1 %v3519_v22 }
 0x356   : > { %3944 = vmatpush3.msra.mxu0 %v3396_v25  ;;  %3981 = vmatpush3.msra.mxu1 %v3503_v26 }
 0x357   : > { %3945 = vmatprep.subr.mxu0 %v3411_v19  ;;  %3982 = vmatprep.subr.mxu1 %v3518_v24 }
 0x358   : > { %3946 = vmatpush3.msra.mxu0 %v3395_v58  ;;  %3983 = vmatpush3.msra.mxu1 %v3502_v32 }
 0x359   : > { %3947 = vmatprep.subr.mxu0 %v3410_v28  ;;  %3984 = vmatprep.subr.mxu1 %v3517_v33 }
 0x35a   : > { %3948 = vmatpush3.msra.mxu0 %v3394_v30  ;;  %3985 = vmatpush3.msra.mxu1 %v3501_v21 }
 0x35b   : > { %3949 = vmatprep.subr.mxu0 %v3409_v34  ;;  %3602 = vmatmul.mubr.f32.vlgmr.msra.gmra.mxu1 %v3533_v35 }
 0x35c   : > { %3950 = vmatpush3.msra.mxu0 %v3393_v36  ;;  %4126 = vset.pattern.permute.xlu0 %v4263_v53 }
 0x35d   : > { %3494 = vmatmul.mubr.f32.vlgmr.msra.gmra.mxu0 %v3425_v29 }
 0x3fa   : > { %v3916_v37 = vpop.f32.mrf.mxu1 }
 0x3fc   : > { %v3917_v39 = vpop.f32.mrf.mxu1 }
 0x3fd   : > { %v3881_v38 = vpop.f32.mrf.mxu0  ;;  %v3918_v43 = vadd.f32 %v3917_v39, %v3916_v37 }
 0x3ff   : > { %v3882_v40 = vpop.f32.mrf.mxu0 }
 0x400   : > { %v3883_v31 = vadd.f32 %v3882_v40, %v3881_v38 }
 0x402   : > { %v3389_v45 = vadd.f32 %v3918_v43, %v3883_v31 }
 0x41b   : > { %v3986_v41 = vpop.f32.mrf.mxu1 }
 0x41d   : > { %v3951_v9 = vpop.f32.mrf.mxu0  ;;  %v3987_v42 = vpop.f32.mrf.mxu1 }
 0x41e   : > { %v3988_v46 = vadd.f32 %v3987_v42, %v3986_v41 }
 0x41f   : > { %v3952_v44 = vpop.f32.mrf.mxu0 }
 0x420   : > { %v3953_v27 = vadd.f32 %v3952_v44, %v3951_v9 }
 0x422   : > { %v3499_v47 = vadd.f32 %v3953_v27, %v3389_v45 }
 0x424   : > { %v3607_v48 = vadd.f32 %v3988_v46, %v3499_v47 }
 0x426   : > { %v3609_v49 = vadd.f32 %v3608_v16, %v3607_v48 }
 0x428   : > { %v3610_v51 = vmax.f32 %v3609_v49, 0.0 }
 0x42a   : > { %v3612_v52 = vmul.f32 %v3611_v50, %v3610_v51 }
 0x42c   : > { %v3614_v1 = vsel %vm3613_vm7, %v3612_v52, 0.0 }
 0x42d   : > { %3615 = vadd.xlane.f32.xlu0 %v3614_v1 }
 0x4b6   : > { %v3616_v55 = vpop.xlane.xlu0 %3615 }
 0x4b7   : > { %v3618_v59 = vadd.f32 %v3617_v54, %v3616_v55 }
 0x4b9   : > { %3621 = vperm.xlu0 %4126, %v3618_v59  }
 0x534   : > { %v3622_v57 = vpop.permute.xlu0 %3621 }
 0x535   : > { %3624 = vst [vmem:[%s443_s15] sm:$0x1] %v3622_v57 }
 0x536 PF: > { %s26_s19 = sadd.s32 1, %s4249_s19  }
 0x537   : > { %p23_p2 = scmp.ge.s32.totalorder %s26_s19, 4  }
 0x539   :  { %25 = sbr.rel (!%p23_p2) target bundleno = 6 (0x6), region = 130 }
 0x53e   :  { %3642 = vsyncpa [#allocation5], 1 }
 0x53f   :  { %3644 = vsyncpa [#allocation5 + $0x1], 1 }
 0x540   :  { %3645 = vsyncpa [#allocation7], 1 }
 0x541   :  { %3646 = vsyncpa [#allocation10], 1 }

</bundles_post_ra>
